<compile_context>
chip_gen: v5e
topology: v5e:2x2
jax: 0.10.0
libtpu: 0.0.40
codegen_flags: <defaults>
</compile_context>

<pallas_src>
import jax
import jax.numpy as jnp
from jax import lax
from jax.experimental import pallas as pl
from jax.experimental.pallas import tpu as pltpu

_NORM_EPS = 1e-12  # matches torch.nn.functional.normalize default eps


def _esn_kernel(z_ref, sc_ref, sA_ref, sB_ref, sC_ref, sD_ref, out_ref):
    K = z_ref.shape[1] // 3
    KK = K * K
    L = sc_ref.shape[1]
    H4 = sA_ref.shape[1]           # flat hidden width (4 * hidden_dim)
    H = sB_ref.shape[1]            # hidden_dim
    H8 = sC_ref.shape[1]           # 2 * H4

    z = z_ref[...]                 # [TN, 3K]  (d-major: x | y | z planes)
    zx, zy, zz = z[:, 0:K], z[:, K:2 * K], z[:, 2 * K:3 * K]

    # Gram matrix G[n, i*K+j] = sum_d Z[n,d,i] * Z[n,d,j]; built as an in-vreg
    # value (no scratch, no store/reload), same i-major order as torch's reshape.
    cols = []
    for i in range(K):
        cols.append(zx[:, i:i + 1] * zx + zy[:, i:i + 1] * zy + zz[:, i:i + 1] * zz)
    gram = jnp.concatenate(cols, axis=1)                     # [TN, K*K]
    sumsq = jnp.sum(gram * gram, axis=1, keepdims=True)      # [TN, 1]
    inv_norm = lax.rsqrt(jnp.maximum(sumsq, _NORM_EPS * _NORM_EPS))

    # in_scalar_net (flat): Linear(K*K+L, 4H) -> Tanh -> Linear(4H, H) -> Tanh
    # concat([normalize(gram), scalars]) @ W1 == (gram @ W1g) * inv_norm + scalars @ W1s
    w1g = sA_ref[0:KK, :]
    w1s = sA_ref[KK:KK + L, :]
    b1 = sA_ref[KK + L:KK + L + 1, :]
    h1 = jnp.tanh(
        jnp.dot(gram, w1g, preferred_element_type=jnp.float32) * inv_norm
        + jnp.dot(sc_ref[...], w1s, preferred_element_type=jnp.float32)
        + b1
    )                                                        # [TN, 4H]

    w2 = sB_ref[0:H4, :]
    b2 = sB_ref[H4:H4 + 1, :]
    s = jnp.tanh(jnp.dot(h1, w2, preferred_element_type=jnp.float32) + b2)   # [TN, H]

    # Fused hidden layers of out_vector_net | out_scalar_net: one 256-wide matmul.
    wc = sC_ref[0:H, :]
    bc = sC_ref[H:H + 1, :]
    hc = jnp.tanh(jnp.dot(s, wc, preferred_element_type=jnp.float32) + bc)   # [TN, 2*4H]

    # Fused output layers: block-diag(wv2, wo2) -> [vec_scalar | scalar_out].
    wd = sD_ref[0:H8, :]
    bd = sD_ref[H8:H8 + 1, :]
    d = jnp.dot(hc, wd, preferred_element_type=jnp.float32) + bd             # [TN, K+H]
    vs = d[:, 0:K]
    s_out = d[:, K:K + H]

    # vector[n, d] = sum_k Z[n, d, k] * vec_scalar[n, k]; single combined store.
    vec = jnp.concatenate(
        [jnp.sum(zx * vs, axis=1, keepdims=True),
         jnp.sum(zy * vs, axis=1, keepdims=True),
         jnp.sum(zz * vs, axis=1, keepdims=True)], axis=1)                    # [TN, 3]
    out_ref[...] = jnp.concatenate([vec, s_out], axis=1)                      # [TN, 3+H]


def _pick_tile_n(n, tile_n):
    """Largest divisor of n <= tile_n, preferring an even >=2-step grid (v7x TCs)."""
    tile_n = max(8, min(tile_n, n))
    while n % tile_n:
        tile_n -= 1
    if n // tile_n == 1 and n % 2 == 0 and (n // 2) % 8 == 0:
        tile_n = n // 2
    if tile_n < n and tile_n % 8 != 0:
        tile_n = n  # block == full dim is always a legal block shape
    return tile_n


def equivariant_scalar_net(Z, scalars, params, *, tile_n=1024):
    """Z: [N, 3, K] f32; scalars: [N, L] f32 or None. Returns (vector [N,3], scalar [N,H])."""
    N, D, K = Z.shape
    assert D == 3
    z2d = Z.astype(jnp.float32).reshape(N, 3 * K)

    H4 = params["b1"].shape[-1]
    H = params["b2"].shape[-1]
    f32 = lambda a: a.astype(jnp.float32)

    if scalars is None:
        # n_scalar_input == 0: emulate the zero-width concat with one zero column
        # against a zero weight row (harmless, single tiny matmul).
        scalars_in = jnp.zeros((N, 1), jnp.float32)
        w1s = jnp.zeros((1, H4), jnp.float32)
    else:
        scalars_in = f32(scalars)
        w1s = f32(params["w1s"])
    L = scalars_in.shape[1]

    # Pre-concatenated weight slabs (host side, once).
    # Slab A: in_scalar_net layer 1   [K*K + L + 1, 4H] = [w1g ; w1s ; b1]
    slab_a = jnp.concatenate([f32(params["w1g"]), w1s, f32(params["b1"])], axis=0)
    # Slab B: in_scalar_net layer 2   [4H + 1, H] = [w2 ; b2]
    slab_b = jnp.concatenate([f32(params["w2"]), f32(params["b2"])], axis=0)
    # Slab C: fused hidden layers of out_vector_net | out_scalar_net
    #         [H + 1, 2*4H] = [wv1 | wo1 ; bv1 | bo1]
    slab_c = jnp.concatenate(
        [jnp.concatenate([f32(params["wv1"]), f32(params["wo1"])], axis=1),
         jnp.concatenate([f32(params["bv1"]), f32(params["bo1"])], axis=1)], axis=0)
    # Slab D: fused output layers  [2*4H + 1, K + H] = [blockdiag(wv2, wo2) ; bv2 | bo2]
    wd = jnp.concatenate(
        [jnp.concatenate([f32(params["wv2"]), jnp.zeros((H4, H), jnp.float32)], axis=1),
         jnp.concatenate([jnp.zeros((H4, K), jnp.float32), f32(params["wo2"])], axis=1)],
        axis=0)
    bd = jnp.concatenate([f32(params["bv2"]), f32(params["bo2"])], axis=1)
    slab_d = jnp.concatenate([wd, bd], axis=0)

    tile_n = _pick_tile_n(N, tile_n)
    grid = (N // tile_n,)

    def rows(width):
        return pl.BlockSpec((tile_n, width), lambda i: (i, 0))

    def full(arr):
        return pl.BlockSpec(arr.shape, lambda i: (0,) * arr.ndim)

    out = pl.pallas_call(
        _esn_kernel,
        out_shape=jax.ShapeDtypeStruct((N, 3 + H), jnp.float32),
        grid_spec=pltpu.PrefetchScalarGridSpec(
            num_scalar_prefetch=0,
            grid=grid,
            in_specs=[rows(3 * K), rows(L),
                      full(slab_a), full(slab_b), full(slab_c), full(slab_d)],
            out_specs=rows(3 + H),
        ),
        compiler_params=pltpu.CompilerParams(dimension_semantics=("parallel",)),
    )(z2d, scalars_in, slab_a, slab_b, slab_c, slab_d)

    return out[:, :3], out[:, 3:]


# ---------------------- pure-JAX reference (for verification) ----------------------
def esn_reference(Z, scalars, params):
    N, _, K = Z.shape
    gram = jnp.einsum("ndi,ndj->nij", Z, Z).reshape(N, K * K)
    norm = jnp.linalg.norm(gram, axis=-1, keepdims=True)
    gram = gram / jnp.maximum(norm, _NORM_EPS)
    if scalars is not None:
        s0 = jnp.concatenate([gram, scalars], axis=-1)
        w1 = jnp.concatenate([params["w1g"], params["w1s"]], axis=0)
    else:
        s0, w1 = gram, params["w1g"]
    h1 = jnp.tanh(s0 @ w1 + params["b1"])
    s = jnp.tanh(h1 @ params["w2"] + params["b2"])
    hv = jnp.tanh(s @ params["wv1"] + params["bv1"])
    vs = hv @ params["wv2"] + params["bv2"]
    vector = jnp.einsum("ndk,nk->nd", Z, vs)
    ho = jnp.tanh(s @ params["wo1"] + params["bo1"])
    scalar_out = ho @ params["wo2"] + params["bo2"]
    return vector, scalar_out


# ------------------------------------ main ------------------------------------
if __name__ == "__main__":
    N = 256        # nodes
    K = 4          # n_vector_input
    L = 8          # n_scalar_input
    H = 32         # hidden_dim
    H4 = 4 * H     # flat BaseMLP hidden width (lane-dense: 128)

    key = jax.random.PRNGKey(0)
    ks = jax.random.split(key, 16)
    Z = jax.random.normal(ks[0], (N, 3, K), jnp.float32)
    scalars = jax.random.normal(ks[1], (N, L), jnp.float32)

    def w(k, shape, scale=0.3):
        return jax.random.normal(k, shape, jnp.float32) * scale

    params = dict(
        w1g=w(ks[2], (K * K, H4)),
        w1s=w(ks[3], (L, H4)),
        b1=w(ks[4], (1, H4), 0.1),
        w2=w(ks[5], (H4, H), 0.1),
        b2=w(ks[6], (1, H), 0.1),
        wv1=w(ks[7], (H, H4), 0.2),
        bv1=w(ks[8], (1, H4), 0.1),
        wv2=w(ks[9], (H4, K), 0.1),
        bv2=w(ks[10], (1, K), 0.1),
        wo1=w(ks[11], (H, H4), 0.2),
        bo1=w(ks[12], (1, H4), 0.1),
        wo2=w(ks[13], (H4, H), 0.1),
        bo2=w(ks[14], (1, H), 0.1),
    )

    vec, sc = equivariant_scalar_net(Z, scalars, params)
    vec, sc = jax.block_until_ready((vec, sc))

    vec_r, sc_r = esn_reference(Z, scalars, params)
    assert vec.shape == (N, 3) and sc.shape == (N, H)
    assert bool(jnp.allclose(vec, vec_r, atol=1e-3, rtol=1e-3)), "vector mismatch vs reference"
    assert bool(jnp.allclose(sc, sc_r, atol=1e-3, rtol=1e-3)), "scalar mismatch vs reference"

    print("KERNEL_OK")
</pallas_src>

<mosaic_0001>
module attributes {stable_mosaic.version = 11 : i64} {
  func.func @_esn_kernel(%arg0: i32, %arg1: memref<128x12xf32, #tpu.memory_space<vmem>>, %arg2: memref<128x8xf32, #tpu.memory_space<vmem>>, %arg3: memref<25x128xf32, #tpu.memory_space<vmem>>, %arg4: memref<129x32xf32, #tpu.memory_space<vmem>>, %arg5: memref<33x256xf32, #tpu.memory_space<vmem>>, %arg6: memref<257x36xf32, #tpu.memory_space<vmem>>, %arg7: memref<128x35xf32, #tpu.memory_space<vmem>>) attributes {dimension_semantics = [#tpu.dimension_semantics<parallel>], iteration_bounds = array<i64: 2>, scalar_prefetch = 0 : i64, scratch_operands = 0 : i64, tpu.core_type = #tpu.core_type<tc>, window_params = [{transform_indices = @transform_0, window_bounds = array<i64: 128, 12>}, {transform_indices = @transform_1, window_bounds = array<i64: 128, 8>}, {pipeline_mode = #tpu.pipeline_mode<synchronous>, transform_indices = @transform_2, window_bounds = array<i64: 25, 128>}, {pipeline_mode = #tpu.pipeline_mode<synchronous>, transform_indices = @transform_3, window_bounds = array<i64: 129, 32>}, {pipeline_mode = #tpu.pipeline_mode<synchronous>, transform_indices = @transform_4, window_bounds = array<i64: 33, 256>}, {pipeline_mode = #tpu.pipeline_mode<synchronous>, transform_indices = @transform_5, window_bounds = array<i64: 257, 36>}, {transform_indices = @transform_6, window_bounds = array<i64: 128, 35>}]} {
    %c0 = arith.constant 0 : index
    %c0_0 = arith.constant 0 : index
    %0 = vector.load %arg1[%c0, %c0_0] : memref<128x12xf32, #tpu.memory_space<vmem>>, vector<128x12xf32>
    %1 = vector.extract_strided_slice %0 {offsets = [0, 0], sizes = [128, 4], strides = [1, 1]} : vector<128x12xf32> to vector<128x4xf32>
    %2 = vector.extract_strided_slice %0 {offsets = [0, 4], sizes = [128, 4], strides = [1, 1]} : vector<128x12xf32> to vector<128x4xf32>
    %3 = vector.extract_strided_slice %0 {offsets = [0, 8], sizes = [128, 4], strides = [1, 1]} : vector<128x12xf32> to vector<128x4xf32>
    %4 = vector.extract_strided_slice %1 {offsets = [0, 0], sizes = [128, 1], strides = [1, 1]} : vector<128x4xf32> to vector<128x1xf32>
    %5 = vector.broadcast %4 : vector<128x1xf32> to vector<128x4xf32>
    %6 = arith.mulf %5, %1 : vector<128x4xf32>
    %7 = vector.extract_strided_slice %2 {offsets = [0, 0], sizes = [128, 1], strides = [1, 1]} : vector<128x4xf32> to vector<128x1xf32>
    %8 = vector.broadcast %7 : vector<128x1xf32> to vector<128x4xf32>
    %9 = arith.mulf %8, %2 : vector<128x4xf32>
    %10 = arith.addf %6, %9 : vector<128x4xf32>
    %11 = vector.extract_strided_slice %3 {offsets = [0, 0], sizes = [128, 1], strides = [1, 1]} : vector<128x4xf32> to vector<128x1xf32>
    %12 = vector.broadcast %11 : vector<128x1xf32> to vector<128x4xf32>
    %13 = arith.mulf %12, %3 : vector<128x4xf32>
    %14 = arith.addf %10, %13 : vector<128x4xf32>
    %15 = vector.extract_strided_slice %1 {offsets = [0, 1], sizes = [128, 1], strides = [1, 1]} : vector<128x4xf32> to vector<128x1xf32>
    %16 = vector.broadcast %15 : vector<128x1xf32> to vector<128x4xf32>
    %17 = arith.mulf %16, %1 : vector<128x4xf32>
    %18 = vector.extract_strided_slice %2 {offsets = [0, 1], sizes = [128, 1], strides = [1, 1]} : vector<128x4xf32> to vector<128x1xf32>
    %19 = vector.broadcast %18 : vector<128x1xf32> to vector<128x4xf32>
    %20 = arith.mulf %19, %2 : vector<128x4xf32>
    %21 = arith.addf %17, %20 : vector<128x4xf32>
    %22 = vector.extract_strided_slice %3 {offsets = [0, 1], sizes = [128, 1], strides = [1, 1]} : vector<128x4xf32> to vector<128x1xf32>
    %23 = vector.broadcast %22 : vector<128x1xf32> to vector<128x4xf32>
    %24 = arith.mulf %23, %3 : vector<128x4xf32>
    %25 = arith.addf %21, %24 : vector<128x4xf32>
    %26 = vector.extract_strided_slice %1 {offsets = [0, 2], sizes = [128, 1], strides = [1, 1]} : vector<128x4xf32> to vector<128x1xf32>
    %27 = vector.broadcast %26 : vector<128x1xf32> to vector<128x4xf32>
    %28 = arith.mulf %27, %1 : vector<128x4xf32>
    %29 = vector.extract_strided_slice %2 {offsets = [0, 2], sizes = [128, 1], strides = [1, 1]} : vector<128x4xf32> to vector<128x1xf32>
    %30 = vector.broadcast %29 : vector<128x1xf32> to vector<128x4xf32>
    %31 = arith.mulf %30, %2 : vector<128x4xf32>
    %32 = arith.addf %28, %31 : vector<128x4xf32>
    %33 = vector.extract_strided_slice %3 {offsets = [0, 2], sizes = [128, 1], strides = [1, 1]} : vector<128x4xf32> to vector<128x1xf32>
    %34 = vector.broadcast %33 : vector<128x1xf32> to vector<128x4xf32>
    %35 = arith.mulf %34, %3 : vector<128x4xf32>
    %36 = arith.addf %32, %35 : vector<128x4xf32>
    %37 = vector.extract_strided_slice %1 {offsets = [0, 3], sizes = [128, 1], strides = [1, 1]} : vector<128x4xf32> to vector<128x1xf32>
    %38 = vector.broadcast %37 : vector<128x1xf32> to vector<128x4xf32>
    %39 = arith.mulf %38, %1 : vector<128x4xf32>
    %40 = vector.extract_strided_slice %2 {offsets = [0, 3], sizes = [128, 1], strides = [1, 1]} : vector<128x4xf32> to vector<128x1xf32>
    %41 = vector.broadcast %40 : vector<128x1xf32> to vector<128x4xf32>
    %42 = arith.mulf %41, %2 : vector<128x4xf32>
    %43 = arith.addf %39, %42 : vector<128x4xf32>
    %44 = vector.extract_strided_slice %3 {offsets = [0, 3], sizes = [128, 1], strides = [1, 1]} : vector<128x4xf32> to vector<128x1xf32>
    %45 = vector.broadcast %44 : vector<128x1xf32> to vector<128x4xf32>
    %46 = arith.mulf %45, %3 : vector<128x4xf32>
    %47 = arith.addf %43, %46 : vector<128x4xf32>
    %48 = tpu.concatenate %14, %25, %36, %47 in 1 : vector<128x4xf32>, vector<128x4xf32>, vector<128x4xf32>, vector<128x4xf32> -> vector<128x16xf32>
    %49 = arith.mulf %48, %48 : vector<128x16xf32>
    %cst = arith.constant dense<0.000000e+00> : vector<128xf32>
    %50 = vector.multi_reduction <add>, %49, %cst [1] : vector<128x16xf32> to vector<128xf32>
    %51 = vector.shape_cast %50 : vector<128xf32> to vector<128x1xf32>
    %cst_1 = arith.constant 1.000000e-24 : f32
    %52 = vector.broadcast %cst_1 : f32 to vector<128x1xf32>
    %53 = arith.maximumf %51, %52 : vector<128x1xf32>
    %54 = math.rsqrt %53 : vector<128x1xf32>
    %c0_2 = arith.constant 0 : index
    %c0_3 = arith.constant 0 : index
    %55 = vector.load %arg3[%c0_2, %c0_3] : memref<25x128xf32, #tpu.memory_space<vmem>>, vector<16x128xf32>
    %c16 = arith.constant 16 : index
    %c0_4 = arith.constant 0 : index
    %56 = vector.load %arg3[%c16, %c0_4] : memref<25x128xf32, #tpu.memory_space<vmem>>, vector<8x128xf32>
    %c24 = arith.constant 24 : index
    %c0_5 = arith.constant 0 : index
    %57 = vector.load %arg3[%c24, %c0_5] : memref<25x128xf32, #tpu.memory_space<vmem>>, vector<1x128xf32>
    %cst_6 = arith.constant dense<0.000000e+00> : vector<128x128xf32>
    %58 = tpu.matmul %48, %55, %cst_6 {dimension_numbers = #tpu.dot_dimension_numbers<[1], [0], [0], [1], [0, 0, 1, 1], [], []>} : vector<128x16xf32>, vector<16x128xf32>, vector<128x128xf32> -> vector<128x128xf32>
    %59 = vector.broadcast %54 : vector<128x1xf32> to vector<128x128xf32>
    %60 = arith.mulf %58, %59 : vector<128x128xf32>
    %c0_7 = arith.constant 0 : index
    %c0_8 = arith.constant 0 : index
    %61 = vector.load %arg2[%c0_7, %c0_8] : memref<128x8xf32, #tpu.memory_space<vmem>>, vector<128x8xf32>
    %cst_9 = arith.constant dense<0.000000e+00> : vector<128x128xf32>
    %62 = tpu.matmul %61, %56, %cst_9 {dimension_numbers = #tpu.dot_dimension_numbers<[1], [0], [0], [1], [0, 0, 1, 1], [], []>} : vector<128x8xf32>, vector<8x128xf32>, vector<128x128xf32> -> vector<128x128xf32>
    %63 = arith.addf %60, %62 : vector<128x128xf32>
    %64 = vector.broadcast %57 : vector<1x128xf32> to vector<128x128xf32>
    %65 = arith.addf %63, %64 : vector<128x128xf32>
    %66 = math.tanh %65 : vector<128x128xf32>
    %c0_10 = arith.constant 0 : index
    %c0_11 = arith.constant 0 : index
    %67 = vector.load %arg4[%c0_10, %c0_11] : memref<129x32xf32, #tpu.memory_space<vmem>>, vector<128x32xf32>
    %c128 = arith.constant 128 : index
    %c0_12 = arith.constant 0 : index
    %68 = vector.load %arg4[%c128, %c0_12] : memref<129x32xf32, #tpu.memory_space<vmem>>, vector<1x32xf32>
    %cst_13 = arith.constant dense<0.000000e+00> : vector<128x32xf32>
    %69 = tpu.matmul %66, %67, %cst_13 {dimension_numbers = #tpu.dot_dimension_numbers<[1], [0], [0], [1], [0, 0, 1, 1], [], []>} : vector<128x128xf32>, vector<128x32xf32>, vector<128x32xf32> -> vector<128x32xf32>
    %70 = vector.broadcast %68 : vector<1x32xf32> to vector<128x32xf32>
    %71 = arith.addf %69, %70 : vector<128x32xf32>
    %72 = math.tanh %71 : vector<128x32xf32>
    %c0_14 = arith.constant 0 : index
    %c0_15 = arith.constant 0 : index
    %73 = vector.load %arg5[%c0_14, %c0_15] : memref<33x256xf32, #tpu.memory_space<vmem>>, vector<32x256xf32>
    %c32 = arith.constant 32 : index
    %c0_16 = arith.constant 0 : index
    %74 = vector.load %arg5[%c32, %c0_16] : memref<33x256xf32, #tpu.memory_space<vmem>>, vector<1x256xf32>
    %cst_17 = arith.constant dense<0.000000e+00> : vector<128x256xf32>
    %75 = tpu.matmul %72, %73, %cst_17 {dimension_numbers = #tpu.dot_dimension_numbers<[1], [0], [0], [1], [0, 0, 1, 1], [], []>} : vector<128x32xf32>, vector<32x256xf32>, vector<128x256xf32> -> vector<128x256xf32>
    %76 = vector.broadcast %74 : vector<1x256xf32> to vector<128x256xf32>
    %77 = arith.addf %75, %76 : vector<128x256xf32>
    %78 = math.tanh %77 : vector<128x256xf32>
    %c0_18 = arith.constant 0 : index
    %c0_19 = arith.constant 0 : index
    %79 = vector.load %arg6[%c0_18, %c0_19] : memref<257x36xf32, #tpu.memory_space<vmem>>, vector<256x36xf32>
    %c256 = arith.constant 256 : index
    %c0_20 = arith.constant 0 : index
    %80 = vector.load %arg6[%c256, %c0_20] : memref<257x36xf32, #tpu.memory_space<vmem>>, vector<1x36xf32>
    %cst_21 = arith.constant dense<0.000000e+00> : vector<128x36xf32>
    %81 = tpu.matmul %78, %79, %cst_21 {dimension_numbers = #tpu.dot_dimension_numbers<[1], [0], [0], [1], [0, 0, 1, 1], [], []>} : vector<128x256xf32>, vector<256x36xf32>, vector<128x36xf32> -> vector<128x36xf32>
    %82 = vector.broadcast %80 : vector<1x36xf32> to vector<128x36xf32>
    %83 = arith.addf %81, %82 : vector<128x36xf32>
    %84 = vector.extract_strided_slice %83 {offsets = [0, 0], sizes = [128, 4], strides = [1, 1]} : vector<128x36xf32> to vector<128x4xf32>
    %85 = vector.extract_strided_slice %83 {offsets = [0, 4], sizes = [128, 32], strides = [1, 1]} : vector<128x36xf32> to vector<128x32xf32>
    %86 = arith.mulf %1, %84 : vector<128x4xf32>
    %cst_22 = arith.constant dense<0.000000e+00> : vector<128xf32>
    %87 = vector.multi_reduction <add>, %86, %cst_22 [1] : vector<128x4xf32> to vector<128xf32>
    %88 = vector.shape_cast %87 : vector<128xf32> to vector<128x1xf32>
    %89 = arith.mulf %2, %84 : vector<128x4xf32>
    %cst_23 = arith.constant dense<0.000000e+00> : vector<128xf32>
    %90 = vector.multi_reduction <add>, %89, %cst_23 [1] : vector<128x4xf32> to vector<128xf32>
    %91 = vector.shape_cast %90 : vector<128xf32> to vector<128x1xf32>
    %92 = arith.mulf %3, %84 : vector<128x4xf32>
    %cst_24 = arith.constant dense<0.000000e+00> : vector<128xf32>
    %93 = vector.multi_reduction <add>, %92, %cst_24 [1] : vector<128x4xf32> to vector<128xf32>
    %94 = vector.shape_cast %93 : vector<128xf32> to vector<128x1xf32>
    %95 = tpu.concatenate %88, %91, %94 in 1 : vector<128x1xf32>, vector<128x1xf32>, vector<128x1xf32> -> vector<128x3xf32>
    %96 = tpu.concatenate %95, %85 in 1 : vector<128x3xf32>, vector<128x32xf32> -> vector<128x35xf32>
    %c0_25 = arith.constant 0 : index
    %c0_26 = arith.constant 0 : index
    %97 = vector.load %arg7[%c0_25, %c0_26] : memref<128x35xf32, #tpu.memory_space<vmem>>, vector<128x35xf32>
    tpu.vector_store %arg7[%c0_25, %c0_26], %96 {strides = array<i32>} : memref<128x35xf32, #tpu.memory_space<vmem>>, vector<128x35xf32>,
    return
  }
  func.func @transform_0(%arg0: i32) -> (i32, i32) {
    %c0_i32 = arith.constant 0 : i32
    %c0_i32_0 = arith.constant 0 : i32
    return %arg0, %c0_i32 : i32, i32
  }
  func.func @transform_1(%arg0: i32) -> (i32, i32) {
    %c0_i32 = arith.constant 0 : i32
    %c0_i32_0 = arith.constant 0 : i32
    return %arg0, %c0_i32 : i32, i32
  }
  func.func @transform_2(%arg0: i32) -> (i32, i32) {
    %c0_i32 = arith.constant 0 : i32
    %c0_i32_0 = arith.constant 0 : i32
    %c0_i32_1 = arith.constant 0 : i32
    return %c0_i32, %c0_i32_0 : i32, i32
  }
  func.func @transform_3(%arg0: i32) -> (i32, i32) {
    %c0_i32 = arith.constant 0 : i32
    %c0_i32_0 = arith.constant 0 : i32
    %c0_i32_1 = arith.constant 0 : i32
    return %c0_i32, %c0_i32_0 : i32, i32
  }
  func.func @transform_4(%arg0: i32) -> (i32, i32) {
    %c0_i32 = arith.constant 0 : i32
    %c0_i32_0 = arith.constant 0 : i32
    %c0_i32_1 = arith.constant 0 : i32
    return %c0_i32, %c0_i32_0 : i32, i32
  }
  func.func @transform_5(%arg0: i32) -> (i32, i32) {
    %c0_i32 = arith.constant 0 : i32
    %c0_i32_0 = arith.constant 0 : i32
    %c0_i32_1 = arith.constant 0 : i32
    return %c0_i32, %c0_i32_0 : i32, i32
  }
  func.func @transform_6(%arg0: i32) -> (i32, i32) {
    %c0_i32 = arith.constant 0 : i32
    %c0_i32_0 = arith.constant 0 : i32
    return %arg0, %c0_i32 : i32, i32
  }
}

</mosaic_0001>

<bundles_post_ra>
// kernel: tpu_custom_call.1
= control target key start
LH: loop header
LB: loop body
LE: loop exit
PB: predicated region body
PF: predicated region fallthrough
CT: control target
= control target key end

     0   :  { %s4238_s21 = smov 0   ;;  %s6601_s0 = inlined_call_operand.vmem [shape: f32[256,12], index: 0, kind: input, shape index: {}]   ;;  %s6602_s1 = inlined_call_operand.vmem [shape: f32[256,8], index: 1, kind: input, shape index: {}]   ;;  %s6603_s2 = inlined_call_operand.vmem [shape: f32[25,128], index: 2, kind: input, shape index: {}]   ;;  %s6604_s3 = inlined_call_operand.vmem [shape: f32[129,32], index: 3, kind: input, shape index: {}]   ;;  %s6605_s4 = inlined_call_operand.vmem [shape: f32[33,256], index: 4, kind: input, shape index: {}]   ;;  %s6606_s5 = inlined_call_operand.vmem [shape: f32[257,36], index: 5, kind: input, shape index: {}]   ;;  %s6607_s6 = inlined_call_operand.vmem [shape: f32[256,35], index: 6, kind: output, shape index: {}]  }
   0x1 LB: > { %s3809_s22 = sadd.s32 4294967295, %s4183_s21   ;;  %p3813_p0 = scmp.ge.s32.totalorder %s4183_s21, 1  ;;  %s4183_s21 = sphi %s4238_s21, %s16_s21  }
   0x2   : > { %p224_p1 = scmp.lt.s32.totalorder %s4183_s21, 3 }
   0x4   : > { %p225_p2 = pnand %p3813_p0, %p224_p1 }
   0x6   : > { %228 = sbr.rel (%p225_p2) target bundleno = 3161 (0xc59), region = 44 }
   0xb   : > { %s3814_s23 = sshll.u32 %s3809_s22, 4  ;;  %v4185_v0 = vmov 0   ;;  %v4186_v17 = vmov 4   ;;  %s4187_s28 = smov 124   ;;  %v4188_v45 = vmov 8   ;;  %vm2101_vm0 = vcmask 31744  }
   0xc   : > { %3925 = vset.pattern.permute.xlu2 %v4185_v0  ;;  %3924 = vset.pattern.permute.xlu1 %v4185_v0  ;;  %p260_p3 = scmp.lt.s32.totalorder %s3814_s23, 31  ;;  %s4189_s29 = smov 120   ;;  %vm2118_vm1 = vcmask 64512   ;;  %vm2135_vm2 = vcmask 97280   ;;  %vm2168_vm3 = vcmask 130048  }
   0xd   : > { %3923 = vset.pattern.permute.xlu0 %v4185_v0  ;;  %s4199_s30 = smov 4   ;;  %s4200_s7 = smov 8  }
   0xe   : > { %s6881_s23 = smov (!%p260_p3, %s3814_s23), 31  ;;  %s4201_s8 = smov 12  }
   0xf   : > { %s4246_s24 = sshll.u32 %s6881_s23, 3 }
  0x10   : > { %s4252_s27 = scalar_lea.vmem %s6601_s0, %s4246_s24  ;;  %s5420_s17 = scalar_lea.vmem %s6602_s1, %s4246_s24 }
  0x11   : > { %v4255_v1 = vld [vmem:[%s4252_s27 + $0x20] sm:$0xff]  ;;  %v4258_v2 = vld [vmem:[%s4252_s27 + $0x10] sm:$0xff]  ;;  %v4267_v4 = vld [vmem:[%s4252_s27 + $0x28] sm:$0xff] }
  0x12   : > { %v4261_v3 = vld [vmem:[%s4252_s27] sm:$0xff]  ;;  %315 = vperm.xlu2 %3925, %v4255_v1   ;;  %305 = vperm.xlu1 %3924, %v4258_v2   ;;  %v4270_v5 = vld [vmem:[%s4252_s27 + $0x18] sm:$0xff]  ;;  %v4273_v6 = vld [vmem:[%s4252_s27 + $0x8] sm:$0xff] }
  0x13   : > { %295 = vperm.xlu0 %3923, %v4261_v3   ;;  %v4279_v7 = vld [vmem:[%s4252_s27 + $0x40] sm:$0xff]  ;;  %v4282_v8 = vld [vmem:[%s4252_s27 + $0x38] sm:$0xff]  ;;  %v4285_v9 = vld [vmem:[%s4252_s27 + $0x30] sm:$0xff] }
  0x14   : > { %v4291_v10 = vld [vmem:[%s4252_s27 + $0x58] sm:$0xff]  ;;  %v4294_v11 = vld [vmem:[%s4252_s27 + $0x50] sm:$0xff]  ;;  %v4297_v12 = vld [vmem:[%s4252_s27 + $0x48] sm:$0xff] }
  0x15   : > { %v4303_v13 = vld [vmem:[%s4252_s27 + $0x70] sm:$0xff]  ;;  %v4306_v14 = vld [vmem:[%s4252_s27 + $0x68] sm:$0xff]  ;;  %v4309_v15 = vld [vmem:[%s4252_s27 + $0x60] sm:$0xff] }
  0x16   : > { %v4315_v16 = vld [vmem:[%s4252_s27 + $0x78] sm:$0xff] }
  0x1a   : > { %320 = vperm.xlu2 %3925, %v4267_v4   ;;  %310 = vperm.xlu1 %3924, %v4270_v5  }
  0x1b   : > { %300 = vperm.xlu0 %3923, %v4273_v6  }
  0x22   : > { %335 = vperm.xlu2 %3925, %v4279_v7   ;;  %330 = vperm.xlu1 %3924, %v4282_v8  }
  0x23   : > { %325 = vperm.xlu0 %3923, %v4285_v9  }
  0x2a   : > { %350 = vperm.xlu2 %3925, %v4291_v10   ;;  %345 = vperm.xlu1 %3924, %v4294_v11  }
  0x2b   : > { %340 = vperm.xlu0 %3923, %v4297_v12  }
  0x32   : > { %365 = vperm.xlu2 %3925, %v4303_v13   ;;  %360 = vperm.xlu1 %3924, %v4306_v14  }
  0x33   : > { %355 = vperm.xlu0 %3923, %v4309_v15  }
  0x3a   : > { %3927 = vset.pattern.permute.xlu2 %v4186_v17  ;;  %3926 = vset.pattern.permute.xlu1 %v4186_v17 }
  0x3b   : > { %370 = vperm.xlu0 %3923, %v4315_v16   ;;  %394 = vperm.xlu2 %3927, %v4273_v6  }
  0x3c   : > { %390 = vperm.xlu1 %3926, %v4261_v3  }
  0x43   : > { %3928 = vset.pattern.permute.xlu0 %v4186_v17  ;;  %406 = vperm.xlu2 %3927, %v4255_v1  }
  0x44   : > { %402 = vperm.xlu1 %3926, %v4270_v5   ;;  %398 = vperm.xlu0 %3928, %v4258_v2  }
  0x4b   : > { %414 = vperm.xlu2 %3927, %v4285_v9  }
  0x4c   : > { %410 = vperm.xlu1 %3926, %v4267_v4   ;;  %418 = vperm.xlu0 %3928, %v4282_v8  }
  0x53   : > { %426 = vperm.xlu2 %3927, %v4297_v12  }
  0x54   : > { %422 = vperm.xlu1 %3926, %v4279_v7   ;;  %430 = vperm.xlu0 %3928, %v4294_v11  }
  0x5b   : > { %438 = vperm.xlu2 %3927, %v4309_v15  }
  0x5c   : > { %434 = vperm.xlu1 %3926, %v4291_v10   ;;  %442 = vperm.xlu0 %3928, %v4306_v14  }
  0x63   : > { %450 = vperm.xlu2 %3927, %v4315_v16  }
  0x64   : > { %446 = vperm.xlu1 %3926, %v4303_v13   ;;  %3931 = vset.pattern.permute.xlu0 %v4188_v45 }
  0x6b   : > { %3930 = vset.pattern.permute.xlu2 %v4188_v45 }
  0x6c   : > { %v4334_v18 = vpop.permute.xlu2 %315  ;;  %3929 = vset.pattern.permute.xlu1 %v4188_v45 }
  0x6d   : > { %6613 = vst [vmem:[#allocation2_spill] sm:$0xff] %v4334_v18 }
  0x74   : > { %v4336_v19 = vpop.permute.xlu2 %320 }
  0x75   : > { %6614 = vst [vmem:[#allocation3_spill] sm:$0xff] %v4336_v19 }
  0x7c   : > { %v4338_v20 = vpop.permute.xlu2 %335 }
  0x7d   : > { %6615 = vst [vmem:[#allocation4_spill] sm:$0xff] %v4338_v20 }
  0x84   : > { %v4340_v21 = vpop.permute.xlu2 %350  ;;  %v4342_v22 = vpop.permute.xlu1 %305 }
  0x85   : > { %6616 = vst [vmem:[#allocation5_spill] sm:$0xff] %v4340_v21  ;;  %v4344_v23 = vpop.permute.xlu0 %295 }
  0x86   : > { %6617 = vst [vmem:[#allocation6_spill] sm:$0xff] %v4342_v22 }
  0x87   : > { %6618 = vst [vmem:[#allocation7_spill] sm:$0xff] %v4344_v23 }
  0x8c   : > { %v4346_v24 = vpop.permute.xlu2 %365  ;;  %v4348_v25 = vpop.permute.xlu1 %310 }
  0x8d   : > { %6619 = vst [vmem:[#allocation8_spill] sm:$0xff] %v4346_v24  ;;  %v4350_v26 = vpop.permute.xlu0 %300 }
  0x8e   : > { %6620 = vst [vmem:[#allocation9_spill] sm:$0xff] %v4348_v25 }
  0x8f   : > { %6621 = vst [vmem:[#allocation10_spill] sm:$0xff] %v4350_v26 }
  0x94   : > { %v4352_v27 = vpop.permute.xlu1 %330 }
  0x95   : > { %6622 = vst [vmem:[#allocation11_spill] sm:$0xff] %v4352_v27  ;;  %v4354_v28 = vpop.permute.xlu0 %325  ;;  %v395_v29 = vpop.permute.xlu2 %394 }
  0x96   : > { %6623 = vst [vmem:[#allocation12_spill] sm:$0xff] %v4354_v28  ;;  %v454_v30 = vmul.f32 %v395_v29, %v4273_v6 }
  0x98   : > { %487 = vrot.lane.b32.xlu1 %v454_v30, %s4187_s28 }
  0x9c   : > { %v4358_v31 = vpop.permute.xlu1 %345 }
  0x9d   : > { %6624 = vst [vmem:[#allocation13_spill] sm:$0xff] %v4358_v31  ;;  %v4360_v32 = vpop.permute.xlu0 %340  ;;  %v407_v33 = vpop.permute.xlu2 %406 }
  0x9e   : > { %6625 = vst [vmem:[#allocation14_spill] sm:$0xff] %v4360_v32  ;;  %v457_v34 = vmul.f32 %v407_v33, %v4255_v1 }
  0xa0   : > { %493 = vrot.lane.b32.xlu1 %v457_v34, %s4187_s28 }
  0xa4   : > { %v4364_v35 = vpop.permute.xlu1 %360 }
  0xa5   : > { %6626 = vst [vmem:[#allocation15_spill] sm:$0xff] %v4364_v35  ;;  %v4366_v36 = vpop.permute.xlu0 %355  ;;  %v415_v40 = vpop.permute.xlu2 %414 }
  0xa6   : > { %6627 = vst [vmem:[#allocation16_spill] sm:$0xff] %v4366_v36  ;;  %v459_v48 = vmul.f32 %v415_v40, %v4285_v9 }
  0xad   : > { %v4368_v37 = vpop.permute.xlu0 %370  ;;  %v427_v51 = vpop.permute.xlu2 %426 }
  0xae   : > { %6628 = vst [vmem:[#allocation17_spill] sm:$0xff] %v4368_v37  ;;  %v391_v38 = vpop.permute.xlu1 %390  ;;  %v462_v54 = vmul.f32 %v427_v51, %v4297_v12 }
  0xaf   : > { %v453_v39 = vmul.f32 %v391_v38, %v4261_v3 }
  0xb1   : > { %485 = vrot.lane.b32.xlu0 %v453_v39, %s4187_s28 }
  0xb5   : > { %v439_v57 = vpop.permute.xlu2 %438 }
  0xb6   : > { %v403_v41 = vpop.permute.xlu1 %402  ;;  %v399_v42 = vpop.permute.xlu0 %398  ;;  %v465_v60 = vmul.f32 %v439_v57, %v4309_v15 }
  0xb7   : > { %v456_v43 = vmul.f32 %v403_v41, %v4270_v5  ;;  %v455_v44 = vmul.f32 %v399_v42, %v4258_v2 }
  0xb9   : > { %491 = vrot.lane.b32.xlu0 %v456_v43, %s4187_s28  ;;  %489 = vrot.lane.b32.xlu2 %v455_v44, %s4187_s28 }
  0xbd   : > { %v451_v63 = vpop.permute.xlu2 %450 }
  0xbe   : > { %v411_v46 = vpop.permute.xlu1 %410  ;;  %v419_v47 = vpop.permute.xlu0 %418  ;;  %v468_v17 = vmul.f32 %v451_v63, %v4315_v16 }
  0xbf   : > { %v458_v49 = vmul.f32 %v411_v46, %v4267_v4  ;;  %v460_v50 = vmul.f32 %v419_v47, %v4282_v8 }
  0xc1   : > { %497 = vrot.lane.b32.xlu0 %v459_v48, %s4187_s28  ;;  %495 = vrot.lane.b32.xlu2 %v458_v49, %s4187_s28 }
  0xc2   : > { %499 = vrot.lane.b32.xlu1 %v460_v50, %s4187_s28 }
  0xc6   : > { %v423_v52 = vpop.permute.xlu1 %422  ;;  %v431_v53 = vpop.permute.xlu0 %430 }
  0xc7   : > { %v461_v55 = vmul.f32 %v423_v52, %v4279_v7  ;;  %v463_v56 = vmul.f32 %v431_v53, %v4294_v11 }
  0xc9   : > { %503 = vrot.lane.b32.xlu0 %v462_v54, %s4187_s28  ;;  %501 = vrot.lane.b32.xlu2 %v461_v55, %s4187_s28 }
  0xca   : > { %505 = vrot.lane.b32.xlu1 %v463_v56, %s4187_s28 }
  0xce   : > { %v435_v58 = vpop.permute.xlu1 %434  ;;  %v443_v59 = vpop.permute.xlu0 %442 }
  0xcf   : > { %v464_v61 = vmul.f32 %v435_v58, %v4291_v10  ;;  %v466_v62 = vmul.f32 %v443_v59, %v4306_v14 }
  0xd1   : > { %509 = vrot.lane.b32.xlu0 %v465_v60, %s4187_s28  ;;  %507 = vrot.lane.b32.xlu2 %v464_v61, %s4187_s28 }
  0xd2   : > { %511 = vrot.lane.b32.xlu1 %v466_v62, %s4187_s28  ;;  %v4190_v62 = vmov 1  }
  0xd6   : > { %v447_v0 = vpop.permute.xlu1 %446 }
  0xd7   : > { %v467_v29 = vmul.f32 %v447_v0, %v4303_v13 }
  0xd9   : > { %515 = vrot.lane.b32.xlu0 %v468_v17, %s4187_s28  ;;  %513 = vrot.lane.b32.xlu2 %v467_v29, %s4187_s28 }
  0xda   : > { %550 = vperm.xlu1 %3929, %v4261_v3  }
  0xe1   : > { %558 = vperm.xlu0 %3931, %v4258_v2   ;;  %554 = vperm.xlu2 %3930, %v4273_v6  }
  0xe2   : > { %562 = vperm.xlu1 %3929, %v4270_v5  }
  0xe9   : > { %578 = vperm.xlu0 %3931, %v4282_v8   ;;  %566 = vperm.xlu2 %3930, %v4255_v1  }
  0xea   : > { %570 = vperm.xlu1 %3929, %v4267_v4  }
  0xf1   : > { %590 = vperm.xlu0 %3931, %v4294_v11   ;;  %574 = vperm.xlu2 %3930, %v4285_v9  }
  0xf2   : > { %582 = vperm.xlu1 %3929, %v4279_v7  }
  0xf9   : > { %602 = vperm.xlu0 %3931, %v4306_v14   ;;  %586 = vperm.xlu2 %3930, %v4297_v12  }
  0xfa   : > { %594 = vperm.xlu1 %3929, %v4291_v10  }
 0x101   : > { %598 = vperm.xlu2 %3930, %v4309_v15   ;;  %3934 = vset.pattern.permute.xlu0 %v4190_v62 }
 0x102   : > { %606 = vperm.xlu1 %3929, %v4303_v13  }
 0x109   : > { %610 = vperm.xlu2 %3930, %v4315_v16  }
 0x10a   : > { %v4418_v34 = vpop.permute.xlu1 %487  ;;  %3932 = vset.pattern.permute.xlu1 %v4190_v62 }
 0x10b   : > { %6631 = vst [vmem:[#allocation20_spill] sm:$0xff] %v4418_v34 }
 0x111   : > { %3933 = vset.pattern.permute.xlu2 %v4190_v62 }
 0x112   : > { %v4428_v42 = vpop.permute.xlu1 %493 }
 0x113   : > { %v4414_v30 = vpop.permute.xlu2 %489  ;;  %6636 = vst [vmem:[#allocation25_spill] sm:$0xff] %v4428_v42 }
 0x114   : > { %6629 = vst [vmem:[#allocation18_spill] sm:$0xff] %v4414_v30 }
 0x11b   : > { %v4416_v33 = vpop.permute.xlu2 %495 }
 0x11c   : > { %6630 = vst [vmem:[#allocation19_spill] sm:$0xff] %v4416_v33 }
 0x123   : > { %v4420_v38 = vpop.permute.xlu2 %501  ;;  %v4422_v39 = vpop.permute.xlu0 %485 }
 0x124   : > { %6632 = vst [vmem:[#allocation21_spill] sm:$0xff] %v4420_v38 }
 0x125   : > { %6633 = vst [vmem:[#allocation22_spill] sm:$0xff] %v4422_v39 }
 0x12b   : > { %v4424_v40 = vpop.permute.xlu2 %507  ;;  %v4426_v41 = vpop.permute.xlu0 %491 }
 0x12c   : > { %6634 = vst [vmem:[#allocation23_spill] sm:$0xff] %v4424_v40 }
 0x12d   : > { %6635 = vst [vmem:[#allocation24_spill] sm:$0xff] %v4426_v41 }
 0x133   : > { %v4430_v43 = vpop.permute.xlu2 %513  ;;  %v4432_v44 = vpop.permute.xlu0 %497 }
 0x134   : > { %6637 = vst [vmem:[#allocation26_spill] sm:$0xff] %v4430_v43  ;;  %v4434_v45 = vpop.permute.xlu1 %499 }
 0x135   : > { %6638 = vst [vmem:[#allocation27_spill] sm:$0xff] %v4432_v44 }
 0x136   : > { %6639 = vst [vmem:[#allocation28_spill] sm:$0xff] %v4434_v45  ;;  %v4192_v45 = vmov 9  }
 0x13b   : > { %v555_v46 = vpop.permute.xlu2 %554  ;;  %v4436_v47 = vpop.permute.xlu0 %503 }
 0x13c   : > { %6640 = vst [vmem:[#allocation29_spill] sm:$0xff] %v4436_v47  ;;  %v614_v48 = vmul.f32 %v555_v46, %v4273_v6  ;;  %v4439_v49 = vpop.permute.xlu1 %505 }
 0x13d   : > { %6641 = vst [vmem:[#allocation30_spill] sm:$0xff] %v4439_v49 }
 0x13e   : > { %647 = vrot.lane.b32.xlu1 %v614_v48, %s4189_s29 }
 0x143   : > { %v567_v50 = vpop.permute.xlu2 %566  ;;  %v4442_v51 = vpop.permute.xlu0 %509 }
 0x144   : > { %6642 = vst [vmem:[#allocation31_spill] sm:$0xff] %v4442_v51  ;;  %v617_v52 = vmul.f32 %v567_v50, %v4255_v1  ;;  %v4445_v53 = vpop.permute.xlu1 %511 }
 0x145   : > { %6643 = vst [vmem:[#allocation32_spill] sm:$0xff] %v4445_v53 }
 0x146   : > { %653 = vrot.lane.b32.xlu1 %v617_v52, %s4189_s29 }
 0x14b   : > { %v4448_v54 = vpop.permute.xlu0 %515  ;;  %v575_v58 = vpop.permute.xlu2 %574 }
 0x14c   : > { %6644 = vst [vmem:[#allocation33_spill] sm:$0xff] %v4448_v54  ;;  %v551_v55 = vpop.permute.xlu1 %550  ;;  %v619_v29 = vmul.f32 %v575_v58, %v4285_v9 }
 0x14d   : > { %v613_v56 = vmul.f32 %v551_v55, %v4261_v3 }
 0x14f   : > { %645 = vrot.lane.b32.xlu0 %v613_v56, %s4189_s29 }
 0x153   : > { %v559_v57 = vpop.permute.xlu0 %558  ;;  %v587_v48 = vpop.permute.xlu2 %586 }
 0x154   : > { %v563_v59 = vpop.permute.xlu1 %562  ;;  %v615_v60 = vmul.f32 %v559_v57, %v4258_v2  ;;  %v622_v56 = vmul.f32 %v587_v48, %v4297_v12  ;;  %v4191_v48 = vmov 5  }
 0x155   : > { %v616_v61 = vmul.f32 %v563_v59, %v4270_v5 }
 0x156   : > { %649 = vrot.lane.b32.xlu2 %v615_v60, %s4189_s29 }
 0x157   : > { %651 = vrot.lane.b32.xlu0 %v616_v61, %s4189_s29 }
 0x15b   : > { %v579_v63 = vpop.permute.xlu0 %578  ;;  %v599_v58 = vpop.permute.xlu2 %598 }
 0x15c   : > { %v571_v0 = vpop.permute.xlu1 %570  ;;  %v620_v17 = vmul.f32 %v579_v63, %v4282_v8  ;;  %v625_v62 = vmul.f32 %v599_v58, %v4309_v15 }
 0x15d   : > { %v618_v46 = vmul.f32 %v571_v0, %v4267_v4 }
 0x15e   : > { %659 = vrot.lane.b32.xlu1 %v620_v17, %s4189_s29 }
 0x15f   : > { %657 = vrot.lane.b32.xlu0 %v619_v29, %s4189_s29  ;;  %655 = vrot.lane.b32.xlu2 %v618_v46, %s4189_s29 }
 0x163   : > { %v591_v50 = vpop.permute.xlu0 %590  ;;  %v611_v0 = vpop.permute.xlu2 %610 }
 0x164   : > { %v583_v52 = vpop.permute.xlu1 %582  ;;  %v623_v55 = vmul.f32 %v591_v50, %v4294_v11  ;;  %v628_v29 = vmul.f32 %v611_v0, %v4315_v16 }
 0x165   : > { %v621_v57 = vmul.f32 %v583_v52, %v4279_v7 }
 0x166   : > { %665 = vrot.lane.b32.xlu1 %v623_v55, %s4189_s29 }
 0x167   : > { %663 = vrot.lane.b32.xlu0 %v622_v56, %s4189_s29  ;;  %661 = vrot.lane.b32.xlu2 %v621_v57, %s4189_s29 }
 0x16b   : > { %v603_v59 = vpop.permute.xlu0 %602 }
 0x16c   : > { %v595_v60 = vpop.permute.xlu1 %594  ;;  %v626_v61 = vmul.f32 %v603_v59, %v4306_v14 }
 0x16d   : > { %v624_v63 = vmul.f32 %v595_v60, %v4291_v10 }
 0x16e   : > { %671 = vrot.lane.b32.xlu1 %v626_v61, %s4189_s29 }
 0x16f   : > { %669 = vrot.lane.b32.xlu0 %v625_v62, %s4189_s29  ;;  %667 = vrot.lane.b32.xlu2 %v624_v63, %s4189_s29 }
 0x174   : > { %v607_v17 = vpop.permute.xlu1 %606 }
 0x175   : > { %v627_v46 = vmul.f32 %v607_v17, %v4303_v13 }
 0x176   : > { %710 = vperm.xlu1 %3932, %v4261_v3  }
 0x177   : > { %675 = vrot.lane.b32.xlu0 %v628_v29, %s4189_s29  ;;  %673 = vrot.lane.b32.xlu2 %v627_v46, %s4189_s29 }
 0x17e   : > { %722 = vperm.xlu1 %3932, %v4270_v5  }
 0x17f   : > { %718 = vperm.xlu0 %3934, %v4258_v2   ;;  %714 = vperm.xlu2 %3933, %v4273_v6  }
 0x186   : > { %730 = vperm.xlu1 %3932, %v4267_v4  }
 0x187   : > { %738 = vperm.xlu0 %3934, %v4282_v8   ;;  %726 = vperm.xlu2 %3933, %v4255_v1  }
 0x18e   : > { %742 = vperm.xlu1 %3932, %v4279_v7  }
 0x18f   : > { %750 = vperm.xlu0 %3934, %v4294_v11   ;;  %734 = vperm.xlu2 %3933, %v4285_v9  }
 0x196   : > { %754 = vperm.xlu1 %3932, %v4291_v10  }
 0x197   : > { %762 = vperm.xlu0 %3934, %v4306_v14   ;;  %746 = vperm.xlu2 %3933, %v4297_v12  }
 0x19e   : > { %766 = vperm.xlu1 %3932, %v4303_v13  }
 0x19f   : > { %3935 = vset.pattern.permute.xlu0 %v4191_v48  ;;  %758 = vperm.xlu2 %3933, %v4309_v15  }
 0x1a0   : > { %790 = vperm.xlu0 %3935, %v4261_v3  }
 0x1a6   : > { %3936 = vset.pattern.permute.xlu1 %v4191_v48 }
 0x1a7   : > { %770 = vperm.xlu2 %3933, %v4315_v16   ;;  %794 = vperm.xlu1 %3936, %v4273_v6  }
 0x1a8   : > { %810 = vperm.xlu0 %3935, %v4267_v4  }
 0x1af   : > { %3937 = vset.pattern.permute.xlu2 %v4191_v48  ;;  %802 = vperm.xlu1 %3936, %v4270_v5  }
 0x1b0   : > { %822 = vperm.xlu0 %3935, %v4279_v7   ;;  %798 = vperm.xlu2 %3937, %v4258_v2   ;;  %v4500_v50 = vpop.permute.xlu2 %649  ;;  %v4507_v55 = vpop.permute.xlu1 %647 }
 0x1b1   : > { %6645 = vst [vmem:[#allocation34_spill] sm:$0xff] %v4500_v50 }
 0x1b2   : > { %6647 = vst [vmem:[#allocation36_spill] sm:$0xff] %v4507_v55 }
 0x1b7   : > { %814 = vperm.xlu1 %3936, %v4285_v9  }
 0x1b8   : > { %834 = vperm.xlu0 %3935, %v4291_v10   ;;  %806 = vperm.xlu2 %3937, %v4255_v1   ;;  %v4517_v58 = vpop.permute.xlu1 %653 }
 0x1b9   : > { %v4505_v52 = vpop.permute.xlu2 %655  ;;  %6650 = vst [vmem:[#allocation39_spill] sm:$0xff] %v4517_v58 }
 0x1ba   : > { %6646 = vst [vmem:[#allocation35_spill] sm:$0xff] %v4505_v52 }
 0x1bf   : > { %826 = vperm.xlu1 %3936, %v4297_v12  }
 0x1c0   : > { %846 = vperm.xlu0 %3935, %v4303_v13   ;;  %818 = vperm.xlu2 %3937, %v4282_v8  }
 0x1c1   : > { %v4512_v56 = vpop.permute.xlu2 %661  ;;  %v4514_v57 = vpop.permute.xlu0 %645 }
 0x1c2   : > { %6648 = vst [vmem:[#allocation37_spill] sm:$0xff] %v4512_v56 }
 0x1c3   : > { %6649 = vst [vmem:[#allocation38_spill] sm:$0xff] %v4514_v57 }
 0x1c7   : > { %838 = vperm.xlu1 %3936, %v4309_v15  }
 0x1c8   : > { %830 = vperm.xlu2 %3937, %v4294_v11   ;;  %3938 = vset.pattern.permute.xlu0 %v4192_v45 }
 0x1c9   : > { %v4520_v59 = vpop.permute.xlu2 %667  ;;  %v4522_v60 = vpop.permute.xlu0 %651 }
 0x1ca   : > { %6651 = vst [vmem:[#allocation40_spill] sm:$0xff] %v4520_v59 }
 0x1cb   : > { %6652 = vst [vmem:[#allocation41_spill] sm:$0xff] %v4522_v60 }
 0x1cf   : > { %850 = vperm.xlu1 %3936, %v4315_v16  }
 0x1d0   : > { %842 = vperm.xlu2 %3937, %v4306_v14   ;;  %v4526_v61 = vpop.permute.xlu1 %659 }
 0x1d1   : > { %6653 = vst [vmem:[#allocation42_spill] sm:$0xff] %v4526_v61  ;;  %v4528_v62 = vpop.permute.xlu2 %673  ;;  %v4530_v63 = vpop.permute.xlu0 %657 }
 0x1d2   : > { %6654 = vst [vmem:[#allocation43_spill] sm:$0xff] %v4528_v62 }
 0x1d3   : > { %6655 = vst [vmem:[#allocation44_spill] sm:$0xff] %v4530_v63 }
 0x1d7   : > { %3939 = vset.pattern.permute.xlu1 %v4192_v45 }
 0x1d8   : > { %v4532_v0 = vpop.permute.xlu1 %665  ;;  %3940 = vset.pattern.permute.xlu2 %v4192_v45 }
 0x1d9   : > { %6656 = vst [vmem:[#allocation45_spill] sm:$0xff] %v4532_v0  ;;  %v4534_v17 = vpop.permute.xlu2 %714  ;;  %v4536_v29 = vpop.permute.xlu0 %663 }
 0x1da   : > { %6657 = vst [vmem:[#allocation46_spill] sm:$0xff] %v4536_v29 }
 0x1e0   : > { %v4538_v46 = vpop.permute.xlu1 %671 }
 0x1e1   : > { %6658 = vst [vmem:[#allocation47_spill] sm:$0xff] %v4538_v46  ;;  %v4540_v48 = vpop.permute.xlu2 %726  ;;  %v4542_v54 = vpop.permute.xlu0 %669 }
 0x1e2   : > { %6659 = vst [vmem:[#allocation48_spill] sm:$0xff] %v4542_v54 }
 0x1e8   : > { %v4544_v37 = vpop.permute.xlu1 %710 }
 0x1e9   : > { %v4546_v43 = vpop.permute.xlu2 %734  ;;  %v4548_v24 = vpop.permute.xlu0 %675 }
 0x1ea   : > { %6660 = vst [vmem:[#allocation49_spill] sm:$0xff] %v4546_v43 }
 0x1eb   : > { %6661 = vst [vmem:[#allocation50_spill] sm:$0xff] %v4548_v24 }
 0x1f0   : > { %v4550_v62 = vpop.permute.xlu1 %722 }
 0x1f1   : > { %v4552_v53 = vpop.permute.xlu2 %746  ;;  %v4554_v35 = vpop.permute.xlu0 %718 }
 0x1f2   : > { %6662 = vst [vmem:[#allocation51_spill] sm:$0xff] %v4552_v53 }
 0x1f8   : > { %v4556_v51 = vpop.permute.xlu1 %730 }
 0x1f9   : > { %v4558_v36 = vpop.permute.xlu2 %758  ;;  %v4560_v46 = vpop.permute.xlu0 %738 }
 0x1fa   : > { %6663 = vst [vmem:[#allocation52_spill] sm:$0xff] %v4558_v36 }
 0x1fb   : > { %6664 = vst [vmem:[#allocation53_spill] sm:$0xff] %v4560_v46 }
 0x200   : > { %v4562_v59 = vpop.permute.xlu1 %742 }
 0x201   : > { %6665 = vst [vmem:[#allocation54_spill] sm:$0xff] %v4562_v59  ;;  %v4564_v54 = vpop.permute.xlu2 %770  ;;  %v4566_v40 = vpop.permute.xlu0 %750 }
 0x202   : > { %6666 = vst [vmem:[#allocation55_spill] sm:$0xff] %v4564_v54 }
 0x203   : > { %6667 = vst [vmem:[#allocation56_spill] sm:$0xff] %v4566_v40 }
 0x208   : > { %v4568_v21 = vpop.permute.xlu1 %754 }
 0x209   : > { %6668 = vst [vmem:[#allocation57_spill] sm:$0xff] %v4568_v21  ;;  %v4570_v24 = vpop.permute.xlu0 %762 }
 0x20a   : > { %6669 = vst [vmem:[#allocation58_spill] sm:$0xff] %v4570_v24  ;;  %v799_v0 = vpop.permute.xlu2 %798 }
 0x20b   : > { %v855_v49 = vmul.f32 %v799_v0, %v4258_v2 }
 0x20d   : > { %889 = vrot.lane.b32.xlu1 %v855_v49, %s4187_s28 }
 0x210   : > { %v4574_v31 = vpop.permute.xlu1 %766 }
 0x211   : > { %6670 = vst [vmem:[#allocation59_spill] sm:$0xff] %v4574_v31 }
 0x212   : > { %v791_v29 = vpop.permute.xlu0 %790  ;;  %v807_v32 = vpop.permute.xlu2 %806 }
 0x213   : > { %v853_v47 = vmul.f32 %v791_v29, %v4261_v3  ;;  %v857_v0 = vmul.f32 %v807_v32, %v4255_v1 }
 0x215   : > { %885 = vrot.lane.b32.xlu2 %v853_v47, %s4187_s28 }
 0x219   : > { %v795_v56 = vpop.permute.xlu1 %794 }
 0x21a   : > { %v854_v38 = vmul.f32 %v795_v56, %v4273_v6  ;;  %v811_v20 = vpop.permute.xlu0 %810  ;;  %v819_v27 = vpop.permute.xlu2 %818 }
 0x21b   : > { %v858_v61 = vmul.f32 %v811_v20, %v4267_v4 }
 0x21c   : > { %887 = vrot.lane.b32.xlu0 %v854_v38, %s4187_s28  ;;  %v860_v38 = vmul.f32 %v819_v27, %v4282_v8 }
 0x21d   : > { %895 = vrot.lane.b32.xlu1 %v858_v61, %s4187_s28 }
 0x221   : > { %v803_v49 = vpop.permute.xlu1 %802 }
 0x222   : > { %v856_v47 = vmul.f32 %v803_v49, %v4270_v5  ;;  %v823_v29 = vpop.permute.xlu0 %822  ;;  %v831_v49 = vpop.permute.xlu2 %830 }
 0x223   : > { %v861_v56 = vmul.f32 %v823_v29, %v4279_v7 }
 0x224   : > { %893 = vrot.lane.b32.xlu0 %v857_v0, %s4187_s28  ;;  %891 = vrot.lane.b32.xlu2 %v856_v47, %s4187_s28  ;;  %v863_v47 = vmul.f32 %v831_v49, %v4294_v11 }
 0x225   : > { %901 = vrot.lane.b32.xlu1 %v861_v56, %s4187_s28 }
 0x229   : > { %v815_v20 = vpop.permute.xlu1 %814 }
 0x22a   : > { %v859_v45 = vmul.f32 %v815_v20, %v4285_v9  ;;  %v835_v61 = vpop.permute.xlu0 %834  ;;  %v843_v20 = vpop.permute.xlu2 %842 }
 0x22b   : > { %v864_v32 = vmul.f32 %v835_v61, %v4291_v10 }
 0x22c   : > { %899 = vrot.lane.b32.xlu0 %v860_v38, %s4187_s28  ;;  %897 = vrot.lane.b32.xlu2 %v859_v45, %s4187_s28  ;;  %v866_v45 = vmul.f32 %v843_v20, %v4306_v14 }
 0x22d   : > { %907 = vrot.lane.b32.xlu1 %v864_v32, %s4187_s28 }
 0x231   : > { %v827_v0 = vpop.permute.xlu1 %826 }
 0x232   : > { %v862_v29 = vmul.f32 %v827_v0, %v4297_v12  ;;  %v847_v56 = vpop.permute.xlu0 %846 }
 0x233   : > { %v867_v27 = vmul.f32 %v847_v56, %v4303_v13 }
 0x234   : > { %905 = vrot.lane.b32.xlu0 %v863_v47, %s4187_s28  ;;  %903 = vrot.lane.b32.xlu2 %v862_v29, %s4187_s28 }
 0x235   : > { %913 = vrot.lane.b32.xlu1 %v867_v27, %s4187_s28 }
 0x239   : > { %v839_v38 = vpop.permute.xlu1 %838 }
 0x23a   : > { %v865_v61 = vmul.f32 %v839_v38, %v4309_v15 }
 0x23c   : > { %911 = vrot.lane.b32.xlu0 %v866_v45, %s4187_s28  ;;  %909 = vrot.lane.b32.xlu2 %v865_v61, %s4187_s28 }
 0x23d   : > { %954 = vperm.xlu1 %3939, %v4273_v6  }
 0x241   : > { %v851_v32 = vpop.permute.xlu1 %850 }
 0x242   : > { %v868_v49 = vmul.f32 %v851_v32, %v4315_v16 }
 0x244   : > { %950 = vperm.xlu0 %3938, %v4261_v3   ;;  %915 = vrot.lane.b32.xlu2 %v868_v49, %s4187_s28 }
 0x245   : > { %962 = vperm.xlu1 %3939, %v4270_v5  }
 0x24c   : > { %970 = vperm.xlu0 %3938, %v4267_v4   ;;  %958 = vperm.xlu2 %3940, %v4258_v2  }
 0x24d   : > { %974 = vperm.xlu1 %3939, %v4285_v9  }
 0x254   : > { %982 = vperm.xlu0 %3938, %v4279_v7   ;;  %966 = vperm.xlu2 %3940, %v4255_v1  }
 0x255   : > { %986 = vperm.xlu1 %3939, %v4297_v12  }
 0x25c   : > { %994 = vperm.xlu0 %3938, %v4291_v10   ;;  %978 = vperm.xlu2 %3940, %v4282_v8  }
 0x25d   : > { %998 = vperm.xlu1 %3939, %v4309_v15  }
 0x264   : > { %1006 = vperm.xlu0 %3938, %v4303_v13   ;;  %990 = vperm.xlu2 %3940, %v4294_v11  }
 0x265   : > { %1010 = vperm.xlu1 %3939, %v4315_v16  }
 0x26c   : > { %1002 = vperm.xlu2 %3940, %v4306_v14  }
 0x26f   : > { %v4622_v0 = vpop.permute.xlu2 %885 }
 0x27e   : > { %v4624_v47 = vpop.permute.xlu2 %891 }
 0x27f   : > { %v4628_v56 = vpop.permute.xlu1 %889 }
 0x286   : > { %v4626_v29 = vpop.permute.xlu2 %897 }
 0x287   : > { %6671 = vst [vmem:[#allocation60_spill] sm:$0xff] %v4626_v29 }
 0x28e   : > { %v4630_v27 = vpop.permute.xlu2 %903  ;;  %v4632_v20 = vpop.permute.xlu0 %887 }
 0x28f   : > { %6672 = vst [vmem:[#allocation61_spill] sm:$0xff] %v4630_v27  ;;  %v4634_v38 = vpop.permute.xlu1 %895 }
 0x296   : > { %v4636_v45 = vpop.permute.xlu2 %909  ;;  %v4638_v61 = vpop.permute.xlu0 %893 }
 0x297   : > { %6673 = vst [vmem:[#allocation62_spill] sm:$0xff] %v4636_v45  ;;  %v4640_v32 = vpop.permute.xlu1 %901 }
 0x298   : > { %6674 = vst [vmem:[#allocation63_spill] sm:$0xff] %v4640_v32 }
 0x29e   : > { %v4642_v49 = vpop.permute.xlu2 %915  ;;  %v4644_v31 = vpop.permute.xlu0 %899 }
 0x29f   : > { %6675 = vst [vmem:[#allocation64_spill] sm:$0xff] %v4642_v49  ;;  %v4646_v54 = vpop.permute.xlu1 %907 }
 0x2a0   : > { %6676 = vst [vmem:[#allocation65_spill] sm:$0xff] %v4644_v31 }
 0x2a1   : > { %6677 = vst [vmem:[#allocation66_spill] sm:$0xff] %v4646_v54 }
 0x2a6   : > { %v959_v24 = vpop.permute.xlu2 %958  ;;  %v4648_v36 = vpop.permute.xlu0 %905 }
 0x2a7   : > { %6678 = vst [vmem:[#allocation67_spill] sm:$0xff] %v4648_v36  ;;  %v1015_v63 = vmul.f32 %v959_v24, %v4258_v2  ;;  %v4651_v44 = vpop.permute.xlu1 %913  ;;  %v4193_v24 = vmov 2  }
 0x2a8   : > { %6679 = vst [vmem:[#allocation68_spill] sm:$0xff] %v4651_v44  ;;  %3941 = vset.pattern.permute.xlu0 %v4193_v24  ;;  %3942 = vset.pattern.permute.xlu1 %v4193_v24 }
 0x2a9   : > { %1049 = vrot.lane.b32.xlu1 %v1015_v63, %s4189_s29  ;;  %3943 = vset.pattern.permute.xlu2 %v4193_v24 }
 0x2ae   : > { %v4654_v45 = vpop.permute.xlu0 %911  ;;  %v967_v28 = vpop.permute.xlu2 %966 }
 0x2af   : > { %6680 = vst [vmem:[#allocation69_spill] sm:$0xff] %v4654_v45  ;;  %v955_v52 = vpop.permute.xlu1 %954  ;;  %v1017_v49 = vmul.f32 %v967_v28, %v4255_v1 }
 0x2b0   : > { %v1014_v33 = vmul.f32 %v955_v52, %v4273_v6 }
 0x2b2   : > { %1047 = vrot.lane.b32.xlu0 %v1014_v33, %s4189_s29 }
 0x2b6   : > { %v951_v19 = vpop.permute.xlu0 %950  ;;  %v979_v18 = vpop.permute.xlu2 %978 }
 0x2b7   : > { %v963_v58 = vpop.permute.xlu1 %962  ;;  %v1013_v42 = vmul.f32 %v951_v19, %v4261_v3  ;;  %v1020_v28 = vmul.f32 %v979_v18, %v4282_v8 }
 0x2b8   : > { %v1016_v63 = vmul.f32 %v963_v58, %v4270_v5 }
 0x2b9   : > { %1045 = vrot.lane.b32.xlu2 %v1013_v42, %s4189_s29 }
 0x2ba   : > { %1053 = vrot.lane.b32.xlu0 %v1017_v49, %s4189_s29 }
 0x2be   : > { %v971_v52 = vpop.permute.xlu0 %970  ;;  %v991_v19 = vpop.permute.xlu2 %990 }
 0x2bf   : > { %v975_v44 = vpop.permute.xlu1 %974  ;;  %v1018_v33 = vmul.f32 %v971_v52, %v4267_v4  ;;  %v1023_v58 = vmul.f32 %v991_v19, %v4294_v11 }
 0x2c0   : > { %v1019_v42 = vmul.f32 %v975_v44, %v4285_v9 }
 0x2c1   : > { %1051 = vrot.lane.b32.xlu2 %v1016_v63, %s4189_s29  ;;  %1055 = vrot.lane.b32.xlu1 %v1018_v33, %s4189_s29 }
 0x2c2   : > { %1059 = vrot.lane.b32.xlu0 %v1020_v28, %s4189_s29 }
 0x2c6   : > { %v983_v49 = vpop.permute.xlu0 %982  ;;  %v1003_v18 = vpop.permute.xlu2 %1002 }
 0x2c7   : > { %v1021_v24 = vmul.f32 %v983_v49, %v4279_v7  ;;  %v987_v45 = vpop.permute.xlu1 %986  ;;  %v1026_v44 = vmul.f32 %v1003_v18, %v4306_v14 }
 0x2c8   : > { %v1022_v52 = vmul.f32 %v987_v45, %v4297_v12 }
 0x2c9   : > { %1057 = vrot.lane.b32.xlu2 %v1019_v42, %s4189_s29  ;;  %1061 = vrot.lane.b32.xlu1 %v1021_v24, %s4189_s29 }
 0x2ca   : > { %1065 = vrot.lane.b32.xlu0 %v1023_v58, %s4189_s29  ;;  %v4194_v58 = vmov 6  }
 0x2ce   : > { %v995_v63 = vpop.permute.xlu0 %994 }
 0x2cf   : > { %v1024_v33 = vmul.f32 %v995_v63, %v4291_v10  ;;  %v999_v28 = vpop.permute.xlu1 %998 }
 0x2d0   : > { %v1025_v42 = vmul.f32 %v999_v28, %v4309_v15 }
 0x2d1   : > { %1063 = vrot.lane.b32.xlu2 %v1022_v52, %s4189_s29  ;;  %1067 = vrot.lane.b32.xlu1 %v1024_v33, %s4189_s29 }
 0x2d2   : > { %1071 = vrot.lane.b32.xlu0 %v1026_v44, %s4189_s29 }
 0x2d6   : > { %v1007_v19 = vpop.permute.xlu0 %1006 }
 0x2d7   : > { %v1027_v49 = vmul.f32 %v1007_v19, %v4303_v13  ;;  %v1011_v45 = vpop.permute.xlu1 %1010 }
 0x2d8   : > { %v1028_v24 = vmul.f32 %v1011_v45, %v4315_v16 }
 0x2d9   : > { %1069 = vrot.lane.b32.xlu2 %v1025_v42, %s4189_s29  ;;  %1073 = vrot.lane.b32.xlu1 %v1027_v49, %s4189_s29 }
 0x2da   : > { %1110 = vperm.xlu0 %3941, %v4261_v3  }
 0x2e1   : > { %1075 = vrot.lane.b32.xlu2 %v1028_v24, %s4189_s29  ;;  %1114 = vperm.xlu1 %3942, %v4273_v6  }
 0x2e2   : > { %1130 = vperm.xlu0 %3941, %v4267_v4  }
 0x2e9   : > { %1118 = vperm.xlu2 %3943, %v4258_v2   ;;  %1122 = vperm.xlu1 %3942, %v4270_v5  }
 0x2ea   : > { %1142 = vperm.xlu0 %3941, %v4279_v7  }
 0x2f1   : > { %1126 = vperm.xlu2 %3943, %v4255_v1   ;;  %1134 = vperm.xlu1 %3942, %v4285_v9  }
 0x2f2   : > { %1154 = vperm.xlu0 %3941, %v4291_v10  }
 0x2f9   : > { %1138 = vperm.xlu2 %3943, %v4282_v8   ;;  %1146 = vperm.xlu1 %3942, %v4297_v12  }
 0x2fa   : > { %1166 = vperm.xlu0 %3941, %v4303_v13  }
 0x301   : > { %1150 = vperm.xlu2 %3943, %v4294_v11   ;;  %1158 = vperm.xlu1 %3942, %v4309_v15  }
 0x302   : > { %3945 = vset.pattern.permute.xlu0 %v4194_v58 }
 0x303   : > { %1194 = vperm.xlu0 %3945, %v4273_v6  }
 0x309   : > { %1162 = vperm.xlu2 %3943, %v4306_v14   ;;  %1170 = vperm.xlu1 %3942, %v4315_v16  }
 0x30b   : > { %1214 = vperm.xlu0 %3945, %v4285_v9  }
 0x311   : > { %3944 = vset.pattern.permute.xlu2 %v4194_v58  ;;  %3946 = vset.pattern.permute.xlu1 %v4194_v58 }
 0x312   : > { %1190 = vperm.xlu2 %3944, %v4261_v3   ;;  %1198 = vperm.xlu1 %3946, %v4258_v2  }
 0x313   : > { %1226 = vperm.xlu0 %3945, %v4297_v12   ;;  %v4707_v18 = vpop.permute.xlu2 %1045 }
 0x31a   : > { %1202 = vperm.xlu2 %3944, %v4270_v5   ;;  %1206 = vperm.xlu1 %3946, %v4255_v1  }
 0x31b   : > { %1238 = vperm.xlu0 %3945, %v4309_v15   ;;  %v4712_v63 = vpop.permute.xlu2 %1051  ;;  %v4723_v44 = vpop.permute.xlu1 %1049 }
 0x322   : > { %1210 = vperm.xlu2 %3944, %v4267_v4   ;;  %1218 = vperm.xlu1 %3946, %v4282_v8  }
 0x323   : > { %1250 = vperm.xlu0 %3945, %v4315_v16   ;;  %v4717_v52 = vpop.permute.xlu2 %1057 }
 0x324   : > { %6681 = vst [vmem:[#allocation70_spill] sm:$0xff] %v4717_v52  ;;  %v4719_v33 = vpop.permute.xlu0 %1047  ;;  %v6723_v52 = vmov 11  }
 0x32a   : > { %1222 = vperm.xlu2 %3944, %v4279_v7   ;;  %1230 = vperm.xlu1 %3946, %v4294_v11  }
 0x32b   : > { %v4725_v28 = vpop.permute.xlu2 %1063 }
 0x32c   : > { %6682 = vst [vmem:[#allocation71_spill] sm:$0xff] %v4725_v28  ;;  %v4727_v19 = vpop.permute.xlu0 %1053 }
 0x332   : > { %1234 = vperm.xlu2 %3944, %v4291_v10   ;;  %1242 = vperm.xlu1 %3946, %v4306_v14  }
 0x333   : > { %v4731_v42 = vpop.permute.xlu2 %1069  ;;  %v4733_v49 = vpop.permute.xlu1 %1055 }
 0x334   : > { %6683 = vst [vmem:[#allocation72_spill] sm:$0xff] %v4731_v42  ;;  %v4735_v45 = vpop.permute.xlu0 %1059 }
 0x335   : > { %6684 = vst [vmem:[#allocation73_spill] sm:$0xff] %v4735_v45 }
 0x33a   : > { %1246 = vperm.xlu2 %3944, %v4303_v13  }
 0x33b   : > { %v4738_v24 = vpop.permute.xlu2 %1075  ;;  %v4740_v58 = vpop.permute.xlu1 %1061 }
 0x33c   : > { %6685 = vst [vmem:[#allocation74_spill] sm:$0xff] %v4738_v24  ;;  %v4742_v27 = vpop.permute.xlu0 %1065 }
 0x33d   : > { %6686 = vst [vmem:[#allocation75_spill] sm:$0xff] %v4740_v58 }
 0x33e   : > { %6687 = vst [vmem:[#allocation76_spill] sm:$0xff] %v4742_v27 }
 0x343   : > { %v4744_v28 = vpop.permute.xlu2 %1118  ;;  %v4746_v60 = vpop.permute.xlu1 %1067 }
 0x344   : > { %6688 = vst [vmem:[#allocation77_spill] sm:$0xff] %v4746_v60  ;;  %v4748_v53 = vpop.permute.xlu0 %1071 }
 0x345   : > { %6689 = vst [vmem:[#allocation78_spill] sm:$0xff] %v4748_v53 }
 0x34b   : > { %v4750_v41 = vpop.permute.xlu2 %1126  ;;  %v4752_v42 = vpop.permute.xlu1 %1073 }
 0x34c   : > { %6690 = vst [vmem:[#allocation79_spill] sm:$0xff] %v4752_v42  ;;  %v4754_v54 = vpop.permute.xlu0 %1110 }
 0x353   : > { %v4756_v25 = vpop.permute.xlu2 %1138  ;;  %v4758_v21 = vpop.permute.xlu1 %1114 }
 0x354   : > { %6691 = vst [vmem:[#allocation80_spill] sm:$0xff] %v4756_v25  ;;  %v4760_v24 = vpop.permute.xlu0 %1130 }
 0x355   : > { %6692 = vst [vmem:[#allocation81_spill] sm:$0xff] %v4760_v24 }
 0x35b   : > { %v4762_v36 = vpop.permute.xlu2 %1150  ;;  %v4764_v27 = vpop.permute.xlu1 %1122 }
 0x35c   : > { %6693 = vst [vmem:[#allocation82_spill] sm:$0xff] %v4762_v36  ;;  %v4766_v58 = vpop.permute.xlu0 %1142 }
 0x35d   : > { %6694 = vst [vmem:[#allocation83_spill] sm:$0xff] %v4764_v27 }
 0x35e   : > { %6695 = vst [vmem:[#allocation84_spill] sm:$0xff] %v4766_v58 }
 0x363   : > { %v4768_v60 = vpop.permute.xlu2 %1162  ;;  %v4770_v53 = vpop.permute.xlu1 %1134 }
 0x364   : > { %6696 = vst [vmem:[#allocation85_spill] sm:$0xff] %v4768_v60  ;;  %v4772_v40 = vpop.permute.xlu0 %1154 }
 0x365   : > { %6697 = vst [vmem:[#allocation86_spill] sm:$0xff] %v4770_v53 }
 0x366   : > { %6698 = vst [vmem:[#allocation87_spill] sm:$0xff] %v4772_v40 }
 0x36b   : > { %v4774_v42 = vpop.permute.xlu1 %1146 }
 0x36c   : > { %6699 = vst [vmem:[#allocation88_spill] sm:$0xff] %v4774_v42  ;;  %v4776_v32 = vpop.permute.xlu0 %1166  ;;  %v1191_v59 = vpop.permute.xlu2 %1190 }
 0x36d   : > { %6700 = vst [vmem:[#allocation89_spill] sm:$0xff] %v4776_v32  ;;  %v1253_v50 = vmul.f32 %v1191_v59, %v4261_v3  ;;  %v4195_v3 = vmov 10  }
 0x36e   : > { %3949 = vset.pattern.permute.xlu1 %v4195_v3  ;;  %3948 = vset.pattern.permute.xlu0 %v4195_v3 }
 0x36f   : > { %1285 = vrot.lane.b32.xlu1 %v1253_v50, %s4187_s28  ;;  %3947 = vset.pattern.permute.xlu2 %v4195_v3 }
 0x373   : > { %v4780_v36 = vpop.permute.xlu1 %1158 }
 0x374   : > { %6701 = vst [vmem:[#allocation90_spill] sm:$0xff] %v4780_v36  ;;  %v1203_v30 = vpop.permute.xlu2 %1202 }
 0x375   : > { %v1256_v22 = vmul.f32 %v1203_v30, %v4270_v5  ;;  %v1195_v58 = vpop.permute.xlu0 %1194 }
 0x376   : > { %v1254_v60 = vmul.f32 %v1195_v58, %v4273_v6 }
 0x377   : > { %1291 = vrot.lane.b32.xlu1 %v1256_v22, %s4187_s28 }
 0x378   : > { %1287 = vrot.lane.b32.xlu2 %v1254_v60, %s4187_s28 }
 0x37b   : > { %v4786_v40 = vpop.permute.xlu1 %1170 }
 0x37c   : > { %6702 = vst [vmem:[#allocation91_spill] sm:$0xff] %v4786_v40  ;;  %v1211_v50 = vpop.permute.xlu2 %1210 }
 0x37d   : > { %v1215_v32 = vpop.permute.xlu0 %1214 }
 0x37e   : > { %v1259_v42 = vmul.f32 %v1215_v32, %v4285_v9  ;;  %v1258_v9 = vmul.f32 %v1211_v50, %v4267_v4 }
 0x380   : > { %1297 = vrot.lane.b32.xlu1 %v1259_v42, %s4187_s28 }
 0x384   : > { %v1199_v5 = vpop.permute.xlu1 %1198  ;;  %v1223_v58 = vpop.permute.xlu2 %1222 }
 0x385   : > { %v1255_v30 = vmul.f32 %v1199_v5, %v4258_v2  ;;  %v1227_v6 = vpop.permute.xlu0 %1226 }
 0x386   : > { %v1262_v22 = vmul.f32 %v1227_v6, %v4297_v12  ;;  %v1261_v12 = vmul.f32 %v1223_v58, %v4279_v7  ;;  %v4851_v58 = vld [vmem:[%s4252_s27 + $0x28] sm:$0xff] }
 0x387   : > { %1289 = vrot.lane.b32.xlu0 %v1255_v30, %s4187_s28 }
 0x388   : > { %1303 = vrot.lane.b32.xlu1 %v1262_v22, %s4187_s28  ;;  %v4823_v22 = vld [vmem:[%s4252_s27 + $0x8] sm:$0xff] }
 0x38c   : > { %v1207_v59 = vpop.permute.xlu1 %1206 }
 0x38d   : > { %v1257_v60 = vmul.f32 %v1207_v59, %v4255_v1  ;;  %v1239_v32 = vpop.permute.xlu0 %1238  ;;  %v1235_v1 = vpop.permute.xlu2 %1234  ;;  %v4827_v59 = vld [vmem:[%s4252_s27] sm:$0xff] }
 0x38e   : > { %v1265_v42 = vmul.f32 %v1239_v32, %v4309_v15  ;;  %v1264_v50 = vmul.f32 %v1235_v1, %v4291_v10  ;;  %v4847_v32 = vld [vmem:[%s4252_s27 + $0x48] sm:$0xff] }
 0x38f   : > { %1295 = vrot.lane.b32.xlu0 %v1258_v9, %s4187_s28  ;;  %1293 = vrot.lane.b32.xlu2 %v1257_v60, %s4187_s28  ;;  %v4839_v9 = vld [vmem:[%s4252_s27 + $0x18] sm:$0xff]  ;;  %v4843_v60 = vld [vmem:[%s4252_s27 + $0x50] sm:$0xff] }
 0x390   : > { %1309 = vrot.lane.b32.xlu1 %v1265_v42, %s4187_s28  ;;  %v4855_v42 = vld [vmem:[%s4252_s27 + $0x68] sm:$0xff] }
 0x394   : > { %v1219_v2 = vpop.permute.xlu1 %1218 }
 0x395   : > { %v1260_v3 = vmul.f32 %v1219_v2, %v4282_v8  ;;  %v1251_v5 = vpop.permute.xlu0 %1250  ;;  %v4811_v8 = vld [vmem:[%s4252_s27 + $0x10] sm:$0xff]  ;;  %v4859_v2 = vld [vmem:[%s4252_s27 + $0x60] sm:$0xff] }
 0x396   : > { %v1268_v4 = vmul.f32 %v1251_v5, %v4315_v16  ;;  %v1247_v16 = vpop.permute.xlu2 %1246  ;;  %v4871_v5 = vld [vmem:[%s4252_s27 + $0x58] sm:$0xff] }
 0x397   : > { %1301 = vrot.lane.b32.xlu0 %v1261_v12, %s4187_s28  ;;  %1299 = vrot.lane.b32.xlu2 %v1260_v3, %s4187_s28  ;;  %v1267_v6 = vmul.f32 %v1247_v16, %v4303_v13  ;;  %v4831_v13 = vld [vmem:[%s4252_s27 + $0x38] sm:$0xff]  ;;  %v4863_v12 = vld [vmem:[%s4252_s27 + $0x40] sm:$0xff] }
 0x398   : > { %1315 = vrot.lane.b32.xlu1 %v1268_v4, %s4187_s28  ;;  %v4867_v3 = vld [vmem:[%s4252_s27 + $0x78] sm:$0xff]  ;;  %v4875_v4 = vld [vmem:[%s4252_s27 + $0x70] sm:$0xff] }
 0x39c   : > { %v1231_v15 = vpop.permute.xlu1 %1230 }
 0x39d   : > { %v1263_v7 = vmul.f32 %v1231_v15, %v4294_v11  ;;  %v4819_v11 = vld [vmem:[%s4252_s27 + $0x20] sm:$0xff] }
 0x39f   : > { %1307 = vrot.lane.b32.xlu0 %v1264_v50, %s4187_s28  ;;  %1305 = vrot.lane.b32.xlu2 %v1263_v7, %s4187_s28 }
 0x3a0   : > { %1358 = vperm.xlu1 %3949, %v4811_v8  }
 0x3a4   : > { %v1243_v30 = vpop.permute.xlu1 %1242 }
 0x3a5   : > { %v1266_v10 = vmul.f32 %v1243_v30, %v4306_v14  ;;  %v4835_v14 = vld [vmem:[%s4252_s27 + $0x30] sm:$0xff] }
 0x3a7   : > { %1313 = vrot.lane.b32.xlu0 %v1267_v6, %s4187_s28  ;;  %1311 = vrot.lane.b32.xlu2 %v1266_v10, %s4187_s28 }
 0x3a8   : > { %1366 = vperm.xlu1 %3949, %v4819_v11  }
 0x3af   : > { %1354 = vperm.xlu0 %3948, %v4823_v22   ;;  %1350 = vperm.xlu2 %3947, %v4827_v59  }
 0x3b0   : > { %1378 = vperm.xlu1 %3949, %v4831_v13  }
 0x3b7   : > { %1374 = vperm.xlu0 %3948, %v4835_v14   ;;  %1362 = vperm.xlu2 %3947, %v4839_v9  }
 0x3b8   : > { %1390 = vperm.xlu1 %3949, %v4843_v60  }
 0x3bf   : > { %1386 = vperm.xlu0 %3948, %v4847_v32   ;;  %1370 = vperm.xlu2 %3947, %v4851_v58  }
 0x3c0   : > { %1402 = vperm.xlu1 %3949, %v4855_v42  }
 0x3c7   : > { %1398 = vperm.xlu0 %3948, %v4859_v2   ;;  %1382 = vperm.xlu2 %3947, %v4863_v12  }
 0x3cf   : > { %1410 = vperm.xlu0 %3948, %v4867_v3   ;;  %1394 = vperm.xlu2 %3947, %v4871_v5  }
 0x3d2   : > { %v4878_v1 = vpop.permute.xlu2 %1287 }
 0x3d7   : > { %1406 = vperm.xlu2 %3947, %v4875_v4  }
 0x3e1   : > { %v4880_v15 = vpop.permute.xlu1 %1285 }
 0x3e9   : > { %v4882_v50 = vpop.permute.xlu1 %1291  ;;  %v4884_v7 = vpop.permute.xlu2 %1293 }
 0x3ea   : > { %6703 = vst [vmem:[#allocation92_spill] sm:$0xff] %v4882_v50 }
 0x3f1   : > { %v4886_v16 = vpop.permute.xlu2 %1299 }
 0x3f2   : > { %6704 = vst [vmem:[#allocation93_spill] sm:$0xff] %v4886_v16  ;;  %v4888_v30 = vpop.permute.xlu1 %1297 }
 0x3f3   : > { %6705 = vst [vmem:[#allocation94_spill] sm:$0xff] %v4888_v30 }
 0x3f9   : > { %v4890_v6 = vpop.permute.xlu2 %1305  ;;  %v4892_v10 = vpop.permute.xlu0 %1289 }
 0x3fa   : > { %6706 = vst [vmem:[#allocation95_spill] sm:$0xff] %v4890_v6  ;;  %v4894_v40 = vpop.permute.xlu1 %1303 }
 0x3fb   : > { %6707 = vst [vmem:[#allocation96_spill] sm:$0xff] %v4894_v40 }
 0x401   : > { %v4896_v36 = vpop.permute.xlu2 %1311  ;;  %v4898_v25 = vpop.permute.xlu0 %1295 }
 0x402   : > { %6708 = vst [vmem:[#allocation97_spill] sm:$0xff] %v4896_v36  ;;  %v4900_v55 = vpop.permute.xlu1 %1309 }
 0x403   : > { %6709 = vst [vmem:[#allocation98_spill] sm:$0xff] %v4898_v25 }
 0x404   : > { %6710 = vst [vmem:[#allocation99_spill] sm:$0xff] %v4900_v55 }
 0x409   : > { %v1351_v34 = vpop.permute.xlu2 %1350  ;;  %v4902_v26 = vpop.permute.xlu0 %1301 }
 0x40a   : > { %6711 = vst [vmem:[#allocation100_spill] sm:$0xff] %v4902_v26  ;;  %v1413_v45 = vmul.f32 %v4827_v59, %v1351_v34  ;;  %v4905_v16 = vpop.permute.xlu1 %1315 }
 0x40b   : > { %6712 = vst [vmem:[#allocation101_spill] sm:$0xff] %v4905_v16 }
 0x40c   : > { %1445 = vrot.lane.b32.xlu1 %v1413_v45, %s4189_s29 }
 0x411   : > { %v1363_v6 = vpop.permute.xlu2 %1362  ;;  %v4908_v31 = vpop.permute.xlu0 %1307 }
 0x412   : > { %6713 = vst [vmem:[#allocation102_spill] sm:$0xff] %v4908_v31  ;;  %v1416_v40 = vmul.f32 %v4839_v9, %v1363_v6  ;;  %v1359_v46 = vpop.permute.xlu1 %1358 }
 0x413   : > { %v1415_v36 = vmul.f32 %v4811_v8, %v1359_v46 }
 0x414   : > { %1451 = vrot.lane.b32.xlu1 %v1416_v40, %s4189_s29  ;;  %v6608_v40 = vmov 3  }
 0x415   : > { %1449 = vrot.lane.b32.xlu0 %v1415_v36, %s4189_s29  ;;  %3950 = vset.pattern.permute.xlu2 %v6608_v40 }
 0x416   : > { %3951 = vset.pattern.permute.xlu0 %v6608_v40  ;;  %3952 = vset.pattern.permute.xlu1 %v6608_v40 }
 0x419   : > { %v1371_v55 = vpop.permute.xlu2 %1370  ;;  %v4914_v26 = vpop.permute.xlu0 %1313 }
 0x41a   : > { %6714 = vst [vmem:[#allocation103_spill] sm:$0xff] %v4914_v26  ;;  %v1418_v34 = vmul.f32 %v4851_v58, %v1371_v55  ;;  %v1367_v45 = vpop.permute.xlu1 %1366 }
 0x41b   : > { %v1417_v36 = vmul.f32 %v4819_v11, %v1367_v45 }
 0x41d   : > { %1455 = vrot.lane.b32.xlu0 %v1418_v34, %s4189_s29 }
 0x421   : > { %v1383_v16 = vpop.permute.xlu2 %1382  ;;  %v1355_v30 = vpop.permute.xlu0 %1354 }
 0x422   : > { %v1421_v31 = vmul.f32 %v4863_v12, %v1383_v16  ;;  %v1414_v6 = vmul.f32 %v4823_v22, %v1355_v30  ;;  %v1379_v30 = vpop.permute.xlu1 %1378 }
 0x424   : > { %1447 = vrot.lane.b32.xlu2 %v1414_v6, %s4189_s29 }
 0x425   : > { %1461 = vrot.lane.b32.xlu0 %v1421_v31, %s4189_s29  ;;  %v1420_v31 = vmul.f32 %v4831_v13, %v1379_v30 }
 0x429   : > { %v1395_v55 = vpop.permute.xlu2 %1394  ;;  %v1375_v46 = vpop.permute.xlu0 %1374 }
 0x42a   : > { %v1424_v34 = vmul.f32 %v4871_v5, %v1395_v55  ;;  %v1419_v16 = vmul.f32 %v4835_v14, %v1375_v46  ;;  %v1391_v55 = vpop.permute.xlu1 %1390 }
 0x42b   : > { %v1423_v46 = vmul.f32 %v4843_v60, %v1391_v55 }
 0x42c   : > { %1453 = vrot.lane.b32.xlu2 %v1417_v36, %s4189_s29  ;;  %1457 = vrot.lane.b32.xlu1 %v1419_v16, %s4189_s29 }
 0x42d   : > { %1467 = vrot.lane.b32.xlu0 %v1424_v34, %s4189_s29 }
 0x431   : > { %v1407_v6 = vpop.permute.xlu2 %1406  ;;  %v1387_v26 = vpop.permute.xlu0 %1386 }
 0x432   : > { %v1427_v40 = vmul.f32 %v4875_v4, %v1407_v6  ;;  %v1422_v45 = vmul.f32 %v4847_v32, %v1387_v26  ;;  %v1403_v16 = vpop.permute.xlu1 %1402  ;;  %v6611_v6 = vmov 7  }
 0x433   : > { %v1426_v30 = vmul.f32 %v4855_v42, %v1403_v16 }
 0x434   : > { %1459 = vrot.lane.b32.xlu2 %v1420_v31, %s4189_s29  ;;  %1463 = vrot.lane.b32.xlu1 %v1422_v45, %s4189_s29 }
 0x435   : > { %1473 = vrot.lane.b32.xlu0 %v1427_v40, %s4189_s29  ;;  %v6609_v40 = vmov 11  }
 0x439   : > { %v1399_v36 = vpop.permute.xlu0 %1398 }
 0x43a   : > { %v1425_v34 = vmul.f32 %v4859_v2, %v1399_v36 }
 0x43c   : > { %1465 = vrot.lane.b32.xlu2 %v1423_v46, %s4189_s29  ;;  %1469 = vrot.lane.b32.xlu1 %v1425_v34, %s4189_s29 }
 0x43d   : > { %1514 = vperm.xlu0 %3951, %v4823_v22  }
 0x441   : > { %v1411_v26 = vpop.permute.xlu0 %1410 }
 0x442   : > { %v1428_v31 = vmul.f32 %v4867_v3, %v1411_v26 }
 0x444   : > { %1471 = vrot.lane.b32.xlu2 %v1426_v30, %s4189_s29  ;;  %1475 = vrot.lane.b32.xlu1 %v1428_v31, %s4189_s29 }
 0x445   : > { %1534 = vperm.xlu0 %3951, %v4835_v14  }
 0x44c   : > { %1510 = vperm.xlu2 %3950, %v4827_v59   ;;  %1518 = vperm.xlu1 %3952, %v4811_v8  }
 0x44d   : > { %1546 = vperm.xlu0 %3951, %v4847_v32  }
 0x454   : > { %1522 = vperm.xlu2 %3950, %v4839_v9   ;;  %1526 = vperm.xlu1 %3952, %v4819_v11  }
 0x455   : > { %1558 = vperm.xlu0 %3951, %v4859_v2  }
 0x45c   : > { %1530 = vperm.xlu2 %3950, %v4851_v58   ;;  %1538 = vperm.xlu1 %3952, %v4831_v13  }
 0x45d   : > { %3954 = vset.pattern.permute.xlu0 %v6609_v40 }
 0x45e   : > { %1750 = vperm.xlu0 %3954, %v4827_v59  }
 0x464   : > { %1542 = vperm.xlu2 %3950, %v4863_v12   ;;  %1550 = vperm.xlu1 %3952, %v4843_v60  }
 0x466   : > { %3957 = vset.pattern.permute.xlu0 %v6611_v6 }
 0x467   : > { %1602 = vperm.xlu0 %3957, %v4839_v9  }
 0x46c   : > { %1554 = vperm.xlu2 %3950, %v4871_v5   ;;  %1562 = vperm.xlu1 %3952, %v4855_v42  }
 0x474   : > { %3953 = vset.pattern.permute.xlu2 %v6611_v6  ;;  %3955 = vset.pattern.permute.xlu1 %v6611_v6 }
 0x475   : > { %1590 = vperm.xlu2 %3953, %v4827_v59   ;;  %1594 = vperm.xlu1 %3955, %v4823_v22  }
 0x47d   : > { %1598 = vperm.xlu1 %3955, %v4811_v8   ;;  %3956 = vset.pattern.permute.xlu2 %v6609_v40 }
 0x47e   : > { %v4969_v45 = vpop.permute.xlu2 %1447  ;;  %1754 = vperm.xlu2 %3956, %v4823_v22   ;;  %v4979_v46 = vpop.permute.xlu1 %1445 }
 0x485   : > { %3958 = vset.pattern.permute.xlu1 %v6609_v40 }
 0x486   : > { %v4973_v55 = vpop.permute.xlu2 %1453  ;;  %1762 = vperm.xlu1 %3958, %v4839_v9   ;;  %1758 = vperm.xlu2 %3956, %v4811_v8   ;;  %v4988_v26 = vpop.permute.xlu1 %1451 }
 0x487   : > { %v4977_v36 = vpop.permute.xlu0 %1449  ;;  %6717 = vst [vmem:[#allocation106_spill] sm:$0xff] %v4988_v26 }
 0x48e   : > { %v4981_v34 = vpop.permute.xlu2 %1459  ;;  %1766 = vperm.xlu1 %3958, %v4819_v11   ;;  %3959 = vset.pattern.permute.xlu2 %v6611_v6 }
 0x48f   : > { %6715 = vst [vmem:[#allocation104_spill] sm:$0xff] %v4981_v34  ;;  %v4985_v16 = vpop.permute.xlu0 %1455  ;;  %1606 = vperm.xlu2 %3959, %v4819_v11  }
 0x490   : > { %6716 = vst [vmem:[#allocation105_spill] sm:$0xff] %v4985_v16 }
 0x496   : > { %v4990_v30 = vpop.permute.xlu2 %1465  ;;  %1770 = vperm.xlu1 %3958, %v4851_v58  }
 0x497   : > { %6718 = vst [vmem:[#allocation107_spill] sm:$0xff] %v4990_v30  ;;  %v4993_v31 = vpop.permute.xlu0 %1461  ;;  %1610 = vperm.xlu2 %3959, %v4851_v58  }
 0x498   : > { %6719 = vst [vmem:[#allocation108_spill] sm:$0xff] %v4993_v31 }
 0x49e   : > { %v4996_v40 = vpop.permute.xlu2 %1471  ;;  %v4998_v34 = vpop.permute.xlu1 %1457  ;;  %3961 = vset.pattern.permute.xlu1 %v6611_v6 }
 0x49f   : > { %6720 = vst [vmem:[#allocation109_spill] sm:$0xff] %v4996_v40  ;;  %v5001_v53 = vpop.permute.xlu0 %1467  ;;  %3960 = vset.pattern.permute.xlu2 %v6723_v52 }
 0x4a0   : > { %6721 = vst [vmem:[#allocation110_spill] sm:$0xff] %v4998_v34 }
 0x4a1   : > { %6722 = vst [vmem:[#allocation111_spill] sm:$0xff] %v5001_v53 }
 0x4a6   : > { %v5004_v29 = vpop.permute.xlu2 %1510  ;;  %v5006_v43 = vpop.permute.xlu1 %1463 }
 0x4a7   : > { %6724 = vst [vmem:[#allocation112_spill] sm:$0xff] %v5006_v43  ;;  %v5008_v30 = vpop.permute.xlu0 %1473 }
 0x4a8   : > { %6725 = vst [vmem:[#allocation113_spill] sm:$0xff] %v5008_v30 }
 0x4ae   : > { %v5010_v16 = vpop.permute.xlu2 %1522  ;;  %v5012_v31 = vpop.permute.xlu1 %1469 }
 0x4af   : > { %6726 = vst [vmem:[#allocation114_spill] sm:$0xff] %v5012_v31  ;;  %v5014_v26 = vpop.permute.xlu0 %1514 }
 0x4b6   : > { %v5016_v40 = vpop.permute.xlu2 %1530  ;;  %v5018_v34 = vpop.permute.xlu1 %1475 }
 0x4b7   : > { %6727 = vst [vmem:[#allocation115_spill] sm:$0xff] %v5018_v34  ;;  %v5020_v6 = vpop.permute.xlu0 %1534 }
 0x4b8   : > { %6728 = vst [vmem:[#allocation116_spill] sm:$0xff] %v5020_v6 }
 0x4be   : > { %v5022_v53 = vpop.permute.xlu2 %1542  ;;  %v5024_v25 = vpop.permute.xlu1 %1518 }
 0x4bf   : > { %6729 = vst [vmem:[#allocation117_spill] sm:$0xff] %v5022_v53  ;;  %v5026_v50 = vpop.permute.xlu0 %1546 }
 0x4c0   : > { %6730 = vst [vmem:[#allocation118_spill] sm:$0xff] %v5026_v50 }
 0x4c6   : > { %v5028_v43 = vpop.permute.xlu2 %1554  ;;  %v5030_v30 = vpop.permute.xlu1 %1526 }
 0x4c7   : > { %6731 = vst [vmem:[#allocation119_spill] sm:$0xff] %v5028_v43  ;;  %v5032_v24 = vpop.permute.xlu0 %1558 }
 0x4c8   : > { %6732 = vst [vmem:[#allocation120_spill] sm:$0xff] %v5030_v30 }
 0x4c9   : > { %6733 = vst [vmem:[#allocation121_spill] sm:$0xff] %v5032_v24 }
 0x4ce   : > { %v5034_v31 = vpop.permute.xlu1 %1538 }
 0x4cf   : > { %6734 = vst [vmem:[#allocation122_spill] sm:$0xff] %v5034_v31  ;;  %v1591_v27 = vpop.permute.xlu2 %1590 }
 0x4d0   : > { %v1653_v57 = vmul.f32 %v4827_v59, %v1591_v27  ;;  %v1751_v34 = vpop.permute.xlu0 %1750  ;;  %v6737_v27 = vmov 7  }
 0x4d1   : > { %v1813_v6 = vmul.f32 %v4827_v59, %v1751_v34 }
 0x4d2   : > { %1685 = vrot.lane.b32.xlu0 %v1653_v57, %s4187_s28 }
 0x4d3   : > { %1845 = vrot.lane.b32.xlu2 %v1813_v6, %s4189_s29 }
 0x4d6   : > { %v5040_v53 = vpop.permute.xlu1 %1550 }
 0x4d7   : > { %6735 = vst [vmem:[#allocation123_spill] sm:$0xff] %v5040_v53 }
 0x4d8   : > { %v1755_v43 = vpop.permute.xlu2 %1754 }
 0x4d9   : > { %v1814_v50 = vmul.f32 %v4823_v22, %v1755_v43 }
 0x4da   : > { %1614 = vperm.xlu0 %3957, %v4835_v14  }
 0x4db   : > { %1774 = vperm.xlu2 %3960, %v4835_v14  }
 0x4de   : > { %v5044_v24 = vpop.permute.xlu1 %1562 }
 0x4df   : > { %6736 = vst [vmem:[#allocation124_spill] sm:$0xff] %v5044_v24 }
 0x4e0   : > { %v1759_v31 = vpop.permute.xlu2 %1758 }
 0x4e1   : > { %v1815_v43 = vmul.f32 %v4811_v8, %v1759_v31 }
 0x4e2   : > { %1847 = vrot.lane.b32.xlu0 %v1814_v50, %s4189_s29 }
 0x4e3   : > { %3962 = vset.pattern.permute.xlu2 %v6737_v27 }
 0x4e7   : > { %v1595_v34 = vpop.permute.xlu1 %1594 }
 0x4e8   : > { %v1654_v57 = vmul.f32 %v4823_v22, %v1595_v34  ;;  %v1603_v34 = vpop.permute.xlu0 %1602 }
 0x4e9   : > { %v1607_v24 = vpop.permute.xlu2 %1606 }
 0x4ea   : > { %1687 = vrot.lane.b32.xlu1 %v1654_v57, %s4187_s28 }
 0x4ef   : > { %v1599_v6 = vpop.permute.xlu1 %1598 }
 0x4f0   : > { %v1655_v53 = vmul.f32 %v4811_v8, %v1599_v6  ;;  %v1656_v6 = vmul.f32 %v4839_v9, %v1603_v34 }
 0x4f1   : > { %v1611_v57 = vpop.permute.xlu2 %1610 }
 0x4f2   : > { %1618 = vperm.xlu1 %3961, %v4831_v13   ;;  %1689 = vrot.lane.b32.xlu2 %v1655_v53, %s4187_s28  ;;  %v1658_v23 = vmul.f32 %v4851_v58, %v1611_v57 }
 0x4f8   : > { %v1763_v30 = vpop.permute.xlu1 %1762 }
 0x4f9   : > { %v1816_v50 = vmul.f32 %v4839_v9, %v1763_v30  ;;  %v1657_v30 = vmul.f32 %v4819_v11, %v1607_v24 }
 0x4fa   : > { %1849 = vrot.lane.b32.xlu1 %v1815_v43, %s4189_s29  ;;  %1622 = vperm.xlu2 %3962, %v4863_v12  }
 0x4fb   : > { %1851 = vrot.lane.b32.xlu0 %v1816_v50, %s4189_s29 }
 0x500   : > { %v1767_v39 = vpop.permute.xlu1 %1766 }
 0x501   : > { %v1817_v43 = vmul.f32 %v4819_v11, %v1767_v39  ;;  %v1173_v39 = vmul.f32 %v4827_v59, %v4754_v54  ;;  %v1573_v54 = vmul.f32 %v4827_v59, %v5004_v29 }
 0x502   : > { %3963 = vset.pattern.permute.xlu2 %v6723_v52  ;;  %1691 = vrot.lane.b32.xlu1 %v1656_v6, %s4187_s28 }
 0x503   : > { %1695 = vrot.lane.b32.xlu0 %v1658_v23, %s4187_s28  ;;  %1782 = vperm.xlu2 %3963, %v4863_v12   ;;  %v773_v23 = vmul.f32 %v4827_v59, %v4544_v37  ;;  %v1333_v34 = vadd.f32 %v4880_v15, %v1173_v39 }
 0x505   : > { %v933_v24 = vadd.f32 %v4622_v0, %v773_v23  ;;  %v1493_v37 = vadd.f32 %v4979_v46, %v1333_v34  ;;  %v1174_v23 = vmul.f32 %v4823_v22, %v4758_v21  ;;  %v775_v21 = vmul.f32 %v4811_v8, %v4554_v35 }
 0x507   : > { %v1093_v50 = vadd.f32 %v4707_v18, %v933_v24  ;;  %v1334_v24 = vadd.f32 %v4878_v1, %v1174_v23 }
 0x508   : > { %v1771_v53 = vpop.permute.xlu1 %1770 }
 0x509   : > { %v1818_v31 = vmul.f32 %v4851_v58, %v1771_v53 }
 0x50a   : > { %1626 = vperm.xlu1 %3961, %v4847_v32  }
 0x50b   : > { %1855 = vrot.lane.b32.xlu0 %v1818_v31, %s4189_s29  ;;  %1693 = vrot.lane.b32.xlu2 %v1657_v30, %s4187_s28  ;;  %v774_v31 = vmul.f32 %v4823_v22, %v4534_v17  ;;  %v1494_v17 = vadd.f32 %v4969_v45, %v1334_v24 }
 0x50c   : > { %3964 = vset.pattern.permute.xlu2 %v6737_v27 }
 0x512   : > { %1853 = vrot.lane.b32.xlu1 %v1817_v43, %s4189_s29  ;;  %v934_v43 = vadd.f32 %v4632_v20, %v774_v31 }
 0x513   : > { %1634 = vperm.xlu0 %3957, %v4871_v5   ;;  %1630 = vperm.xlu2 %3964, %v4843_v60  }
 0x514   : > { %3965 = vset.pattern.permute.xlu1 %v6723_v52  ;;  %v1094_v29 = vadd.f32 %v4719_v33, %v934_v43 }
 0x51a   : > { %1790 = vperm.xlu1 %3965, %v4843_v60  }
 0x51b   : > { %3966 = vset.pattern.permute.xlu0 %v6723_v52  ;;  %1925 = vrot.lane.b32.xlu2 %v1093_v50, %s4199_s30  ;;  %v1574_v50 = vmul.f32 %v4823_v22, %v5014_v26  ;;  %v935_v26 = vadd.f32 %v4628_v56, %v775_v21  ;;  %v1177_v21 = vmul.f32 %v4819_v11, %v4750_v41  ;;  %v6738_v41 = vld [vmem:[#allocation7_spill] sm:$0xff] }
 0x51c   : > { %1778 = vperm.xlu0 %3966, %v4831_v13  }
 0x522   : > { %1989 = vrot.lane.b32.xlu1 %v1493_v37, %s4200_s7 }
 0x524   : > { %1786 = vperm.xlu0 %3966, %v4847_v32  }
 0x52d   : > { %v1846_v0 = vpop.permute.xlu2 %1845 }
 0x535   : > { %v1775_v18 = vpop.permute.xlu2 %1774 }
 0x536   : > { %v1819_v57 = vmul.f32 %v4835_v14, %v1775_v18 }
 0x538   : > { %1857 = vrot.lane.b32.xlu0 %v1819_v57, %s4189_s29  ;;  %v1175_v57 = vmul.f32 %v4811_v8, %v4744_v28  ;;  %v1576_v28 = vmul.f32 %v4839_v9, %v5010_v16  ;;  %v2394_v16 = vld [vmem:[%s6603_s2 + $0x8] sm:$0xff] }
 0x539   : > { %2459 = vmatpush.msra.mxu0 %v2394_v16  ;;  %3887 = vmatpush.msra.mxu2 %v2394_v16 }
 0x544   : > { %v1686_v6 = vpop.permute.xlu0 %1685 }
 0x545   : > { %v1733_v53 = vadd.f32 %v1686_v6, %v1573_v54  ;;  %v1335_v54 = vadd.f32 %v4892_v10, %v1175_v57 }
 0x547   : > { %v1893_v30 = vadd.f32 %v1846_v0, %v1733_v53  ;;  %v1095_v0 = vadd.f32 %v4723_v44, %v935_v26  ;;  %v1495_v6 = vadd.f32 %v4977_v36, %v1335_v54  ;;  %v776_v36 = vmul.f32 %v4839_v9, %v4550_v62 }
 0x548   : > { %v777_v62 = vmul.f32 %v4819_v11, %v4540_v48 }
 0x549   : > { %2053 = vrot.lane.b32.xlu2 %v1893_v30, %s4201_s8 }
 0x54c   : > { %v1615_v15 = vpop.permute.xlu0 %1614  ;;  %v5112_v37 = vpop.permute.xlu2 %1689 }
 0x54d   : > { %v1659_v46 = vmul.f32 %v4835_v14, %v1615_v15 }
 0x54f   : > { %1697 = vrot.lane.b32.xlu1 %v1659_v46, %s4187_s28 }
 0x551   : > { %1638 = vperm.xlu2 %3964, %v4859_v2  }
 0x554   : > { %v1848_v34 = vpop.permute.xlu0 %1847  ;;  %v1623_v18 = vpop.permute.xlu2 %1622 }
 0x555   : > { %v1661_v15 = vmul.f32 %v4863_v12, %v1623_v18 }
 0x557   : > { %1794 = vperm.xlu1 %3965, %v4871_v5  }
 0x559   : > { %1927 = vrot.lane.b32.xlu2 %v1094_v29, %s4199_s30 }
 0x55a   : > { %3967 = vset.pattern.permute.xlu2 %v6723_v52 }
 0x55c   : > { %v1688_v39 = vpop.permute.xlu1 %1687 }
 0x55d   : > { %v1734_v20 = vadd.f32 %v1688_v39, %v1574_v50  ;;  %v1783_v44 = vpop.permute.xlu2 %1782 }
 0x55e   : > { %v1821_v53 = vmul.f32 %v4863_v12, %v1783_v44 }
 0x55f   : > { %v1894_v33 = vadd.f32 %v1848_v34, %v1734_v20  ;;  %1991 = vrot.lane.b32.xlu1 %v1494_v17, %s4200_s7 }
 0x560   : > { %3969 = vset.pattern.permute.xlu1 %v6737_v27 }
 0x561   : > { %1798 = vperm.xlu2 %3967, %v4859_v2   ;;  %2055 = vrot.lane.b32.xlu0 %v1894_v33, %s4201_s8 }
 0x564   : > { %v1619_v1 = vpop.permute.xlu1 %1618 }
 0x565   : > { %v1660_v45 = vmul.f32 %v4831_v13, %v1619_v1  ;;  %v5159_v39 = vpop.permute.xlu2 %1693 }
 0x567   : > { %1699 = vrot.lane.b32.xlu1 %v1660_v45, %s4187_s28 }
 0x569   : > { %3968 = vset.pattern.permute.xlu2 %v6737_v27  ;;  %1929 = vrot.lane.b32.xlu0 %v1095_v0, %s4199_s30 }
 0x56a   : > { %1642 = vperm.xlu2 %3968, %v4855_v42  }
 0x56c   : > { %v1850_v56 = vpop.permute.xlu1 %1849 }
 0x56d   : > { %v1852_v35 = vpop.permute.xlu0 %1851  ;;  %v1631_v34 = vpop.permute.xlu2 %1630 }
 0x571   : > { %1802 = vperm.xlu0 %3966, %v4855_v42  }
 0x572   : > { %1993 = vrot.lane.b32.xlu2 %v1495_v6, %s4200_s7 }
 0x573   : > { %3970 = vset.pattern.permute.xlu2 %v6723_v52  ;;  %v936_v52 = vadd.f32 %v4624_v47, %v776_v36  ;;  %v2393_v47 = vld [vmem:[%s6603_s2] sm:$0xff] }
 0x574   : > { %v1692_v46 = vpop.permute.xlu1 %1691  ;;  %2460 = vmatpush.msra.mxu0 %v2393_v47  ;;  %3888 = vmatpush.msra.mxu2 %v2393_v47  ;;  %v6744_v36 = vld [vmem:[#allocation98_spill] sm:$0xff] }
 0x575   : > { %v1696_v30 = vpop.permute.xlu0 %1695  ;;  %v1736_v10 = vadd.f32 %v1692_v46, %v1576_v28  ;;  %v1096_v29 = vadd.f32 %v4712_v63, %v936_v52  ;;  %v937_v63 = vadd.f32 %v4638_v61, %v777_v62  ;;  %v778_v61 = vmul.f32 %v4851_v58, %v4556_v51  ;;  %v6743_v28 = vld [vmem:[#allocation92_spill] sm:$0xff]  ;;  %v6745_v52 = vld [vmem:[#allocation106_spill] sm:$0xff] }
 0x576   : > { %v6747_v62 = vmov 3  }
 0x577   : > { %v1896_v43 = vadd.f32 %v1852_v35, %v1736_v10  ;;  %v1097_v50 = vadd.f32 %v4727_v19, %v937_v63  ;;  %v1575_v19 = vmul.f32 %v4811_v8, %v5024_v25  ;;  %v938_v33 = vadd.f32 %v4634_v38, %v778_v61  ;;  %v1926_v38 = vpop.permute.xlu2 %1925  ;;  %v6740_v35 = vld [vmem:[#allocation38_spill] sm:$0xff] }
 0x578   : > { %v1578_v25 = vmul.f32 %v4851_v58, %v5016_v40 }
 0x579   : > { %1861 = vrot.lane.b32.xlu0 %v1821_v53, %s4189_s29  ;;  %v1735_v1 = vadd.f32 %v5112_v37, %v1575_v19  ;;  %v1098_v45 = vadd.f32 %v4733_v49, %v938_v33  ;;  %v373_v37 = vmul.f32 %v4827_v59, %v6738_v41  ;;  %v6739_v49 = vld [vmem:[#allocation22_spill] sm:$0xff]  ;;  %v6741_v59 = vld [vmem:[#allocation83_spill] sm:$0xff] }
 0x57a   : > { %1701 = vrot.lane.b32.xlu2 %v1661_v15, %s4187_s28  ;;  %v1738_v18 = vadd.f32 %v1696_v30, %v1578_v25  ;;  %v1176_v6 = vmul.f32 %v4839_v9, %v6741_v59  ;;  %v6742_v15 = vld [vmem:[#allocation81_spill] sm:$0xff]  ;;  %v6750_v19 = vld [vmem:[#allocation70_spill] sm:$0xff] }
 0x57b   : > { %v1895_v0 = vadd.f32 %v1850_v56, %v1735_v1  ;;  %v533_v57 = vadd.f32 %v6739_v49, %v373_v37  ;;  %v1178_v46 = vmul.f32 %v4851_v58, %v6742_v15  ;;  %v6751_v1 = vld [vmem:[#allocation86_spill] sm:$0xff]  ;;  %v6758_v59 = vld [vmem:[#allocation73_spill] sm:$0xff] }
 0x57c   : > { %v5147_v23 = vpop.permute.xlu1 %1626  ;;  %v1336_v10 = vadd.f32 %v6743_v28, %v1176_v6 }
 0x57d   : > { %v1856_v31 = vpop.permute.xlu0 %1855  ;;  %v693_v54 = vadd.f32 %v6740_v35, %v533_v57  ;;  %v1662_v61 = vmul.f32 %v4847_v32, %v5147_v23  ;;  %v6754_v23 = vld [vmem:[#allocation120_spill] sm:$0xff] }
 0x57e   : > { %v1577_v37 = vmul.f32 %v4819_v11, %v6754_v23 }
 0x57f   : > { %v2102_v40 = vsel %vm2101_vm0, %v693_v54, %v1926_v38  ;;  %v6753_v38 = vld [vmem:[#allocation110_spill] sm:$0xff] }
 0x580   : > { %v1737_v57 = vadd.f32 %v5159_v39, %v1577_v37  ;;  %v6767_v37 = vld [vmem:[#allocation108_spill] sm:$0xff] }
 0x581   : > { %2059 = vrot.lane.b32.xlu0 %v1896_v43, %s4201_s8  ;;  %v1496_v43 = vadd.f32 %v6745_v52, %v1336_v10  ;;  %v6760_v52 = vld [vmem:[#allocation20_spill] sm:$0xff] }
 0x582   : > { %1931 = vrot.lane.b32.xlu2 %v1096_v29, %s4199_s30  ;;  %v6746_v29 = vld [vmem:[#allocation105_spill] sm:$0xff] }
 0x584   : > { %v5163_v48 = vpop.permute.xlu1 %1853 }
 0x585   : > { %v5156_v24 = vpop.permute.xlu0 %1634  ;;  %v1897_v35 = vadd.f32 %v5163_v48, %v1737_v57 }
 0x589   : > { %1933 = vrot.lane.b32.xlu0 %v1097_v50, %s4199_s30  ;;  %v6748_v50 = vld [vmem:[#allocation49_spill] sm:$0xff] }
 0x58a   : > { %1806 = vperm.xlu2 %3970, %v4875_v4  }
 0x58c   : > { %v5178_v26 = vpop.permute.xlu1 %1790 }
 0x58d   : > { %v1823_v39 = vmul.f32 %v4843_v60, %v5178_v26  ;;  %v1664_v26 = vmul.f32 %v4871_v5, %v5156_v24 }
 0x58e   : > { %v1779_v17 = vpop.permute.xlu0 %1778 }
 0x58f   : > { %v1820_v20 = vmul.f32 %v4831_v13, %v1779_v17  ;;  %v779_v17 = vmul.f32 %v4835_v14, %v6748_v50 }
 0x591   : > { %1810 = vperm.xlu0 %3966, %v4867_v3   ;;  %1859 = vrot.lane.b32.xlu1 %v1820_v20, %s4189_s29  ;;  %v6749_v20 = vld [vmem:[#allocation60_spill] sm:$0xff] }
 0x592   : > { %3971 = vset.pattern.permute.xlu2 %v6737_v27  ;;  %v1337_v27 = vadd.f32 %v4884_v7, %v1177_v21  ;;  %v1663_v7 = vmul.f32 %v4843_v60, %v1631_v34  ;;  %v939_v34 = vadd.f32 %v6749_v20, %v779_v17 }
 0x593   : > { %1650 = vperm.xlu2 %3971, %v4867_v3  }
 0x594   : > { %v1497_v51 = vadd.f32 %v4973_v55, %v1337_v27  ;;  %v1898_v55 = vadd.f32 %v1856_v31, %v1738_v18  ;;  %v1990_v56 = vpop.permute.xlu1 %1989  ;;  %v1338_v31 = vadd.f32 %v6744_v36, %v1178_v46  ;;  %v1099_v33 = vadd.f32 %v6750_v19, %v939_v34  ;;  %v6755_v18 = vld [vmem:[#allocation53_spill] sm:$0xff]  ;;  %v6759_v36 = vld [vmem:[#allocation10_spill] sm:$0xff]  ;;  %v6762_v34 = vld [vmem:[#allocation80_spill] sm:$0xff] }
 0x595   : > { %v2119_v44 = vsel %vm2118_vm1, %v2102_v40, %v1990_v56  ;;  %v780_v49 = vmul.f32 %v4831_v13, %v6755_v18  ;;  %v6757_v56 = vld [vmem:[#allocation116_spill] sm:$0xff] }
 0x596   : > { %v1498_v16 = vadd.f32 %v6746_v29, %v1338_v31  ;;  %v1787_v21 = vpop.permute.xlu0 %1786  ;;  %v1579_v40 = vmul.f32 %v4835_v14, %v6757_v56  ;;  %v374_v31 = vmul.f32 %v4823_v22, %v6759_v36  ;;  %v6761_v29 = vld [vmem:[#allocation36_spill] sm:$0xff] }
 0x597   : > { %v1822_v25 = vmul.f32 %v4847_v32, %v1787_v21  ;;  %v6763_v21 = vld [vmem:[#allocation93_spill] sm:$0xff] }
 0x599   : > { %1935 = vrot.lane.b32.xlu0 %v1098_v45, %s4199_s30  ;;  %2057 = vrot.lane.b32.xlu1 %v1895_v0, %s4201_s8  ;;  %v1179_v45 = vmul.f32 %v4835_v14, %v6751_v1  ;;  %v6752_v0 = vld [vmem:[#allocation94_spill] sm:$0xff] }
 0x59b   : > { %1997 = vrot.lane.b32.xlu2 %v1497_v51, %s4200_s7  ;;  %v1339_v51 = vadd.f32 %v6752_v0, %v1179_v45 }
 0x59d   : > { %v1499_v41 = vadd.f32 %v6753_v38, %v1339_v51 }
 0x5a1   : > { %2063 = vrot.lane.b32.xlu0 %v1898_v55, %s4201_s8  ;;  %1646 = vperm.xlu1 %3969, %v4875_v4  }
 0x5a3   : > { %1705 = vrot.lane.b32.xlu2 %v1663_v7, %s4187_s28  ;;  %v2054_v53 = vpop.permute.xlu2 %2053  ;;  %v6756_v7 = vld [vmem:[#allocation65_spill] sm:$0xff] }
 0x5a4   : > { %v5201_v30 = vsel %vm2135_vm2, %v2119_v44, %v2054_v53  ;;  %v940_v55 = vadd.f32 %v6756_v7, %v780_v49  ;;  %v6768_v7 = vld [vmem:[#allocation122_spill] sm:$0xff] }
 0x5a5   : > { %3820 = vmatmul.msk.f32.vlgmr.msra.gmra.mxu0 %vm2168_vm3, %v5201_v30 }
 0x5a6   : > { %v1100_v6 = vadd.f32 %v6758_v59, %v940_v55  ;;  %v1580_v55 = vmul.f32 %v4831_v13, %v6768_v7 }
 0x5a9   : > { %1995 = vrot.lane.b32.xlu1 %v1496_v43, %s4200_s7  ;;  %v534_v43 = vadd.f32 %v6760_v52, %v374_v31  ;;  %v6775_v31 = vld [vmem:[#allocation54_spill] sm:$0xff] }
 0x5aa   : > { %3972 = vset.pattern.permute.xlu1 %v6747_v62  ;;  %v1858_v53 = vpop.permute.xlu0 %1857 }
 0x5ab   : > { %1999 = vrot.lane.b32.xlu2 %v1498_v16, %s4200_s7  ;;  %v1639_v47 = vpop.permute.xlu2 %1638  ;;  %v694_v16 = vadd.f32 %v6761_v29, %v534_v43  ;;  %v6776_v29 = vld [vmem:[#allocation63_spill] sm:$0xff] }
 0x5ac   : > { %v1665_v63 = vmul.f32 %v4859_v2, %v1639_v47 }
 0x5ae   : > { %1709 = vrot.lane.b32.xlu0 %v1665_v63, %s4187_s28 }
 0x5b1   : > { %1703 = vrot.lane.b32.xlu1 %v1662_v61, %s4187_s28  ;;  %v1180_v61 = vmul.f32 %v4831_v13, %v6762_v34  ;;  %v6774_v13 = vld [vmem:[#allocation112_spill] sm:$0xff]  ;;  %v6779_v34 = vld [vmem:[#allocation67_spill] sm:$0xff] }
 0x5b3   : > { %1937 = vrot.lane.b32.xlu2 %v1099_v33, %s4199_s30  ;;  %v1928_v27 = vpop.permute.xlu2 %1927  ;;  %v1340_v1 = vadd.f32 %v6763_v21, %v1180_v61  ;;  %v6781_v21 = vld [vmem:[#allocation117_spill] sm:$0xff] }
 0x5b4   : > { %v2103_v62 = vsel %vm2101_vm0, %v694_v16, %v1928_v27  ;;  %v6764_v27 = vld [vmem:[#allocation104_spill] sm:$0xff] }
 0x5b5   : > { %v1500_v0 = vadd.f32 %v6764_v27, %v1340_v1  ;;  %v1581_v1 = vmul.f32 %v4863_v12, %v6781_v21  ;;  %v6782_v27 = vld [vmem:[#allocation57_spill] sm:$0xff]  ;;  %v6797_v21 = vld [vmem:[#allocation95_spill] sm:$0xff] }
 0x5b9   : > { %1863 = vrot.lane.b32.xlu1 %v1822_v25, %s4189_s29  ;;  %v6765_v25 = vld [vmem:[#allocation84_spill] sm:$0xff] }
 0x5ba   : > { %v1181_v38 = vmul.f32 %v4863_v12, %v6765_v25 }
 0x5bb   : > { %2001 = vrot.lane.b32.xlu2 %v1499_v41, %s4200_s7  ;;  %v1799_v54 = vpop.permute.xlu2 %1798  ;;  %v6766_v41 = vld [vmem:[#allocation100_spill] sm:$0xff] }
 0x5bc   : > { %v1825_v24 = vmul.f32 %v4859_v2, %v1799_v54  ;;  %v1341_v23 = vadd.f32 %v6766_v41, %v1181_v38 }
 0x5be   : > { %v1501_v18 = vadd.f32 %v6767_v37, %v1341_v23  ;;  %v6783_v37 = vld [vmem:[#allocation9_spill] sm:$0xff] }
 0x5c1   : > { %v1698_v44 = vpop.permute.xlu1 %1697  ;;  %2061 = vrot.lane.b32.xlu1 %v1897_v35, %s4201_s8  ;;  %v6769_v35 = vld [vmem:[#allocation6_spill] sm:$0xff] }
 0x5c2   : > { %v1739_v15 = vadd.f32 %v1698_v44, %v1579_v40  ;;  %v375_v54 = vmul.f32 %v4811_v8, %v6769_v35  ;;  %v6770_v40 = vld [vmem:[#allocation88_spill] sm:$0xff]  ;;  %v6771_v44 = vld [vmem:[#allocation18_spill] sm:$0xff]  ;;  %v781_v8 = vmul.f32 %v4863_v12, %v6775_v31 }
 0x5c3   : > { %1939 = vrot.lane.b32.xlu2 %v1100_v6, %s4199_s30  ;;  %v1182_v59 = vmul.f32 %v4847_v32, %v6770_v40  ;;  %v6785_v12 = vld [vmem:[#allocation24_spill] sm:$0xff]  ;;  %v6791_v31 = vld [vmem:[#allocation118_spill] sm:$0xff] }
 0x5c4   : > { %v1899_v46 = vadd.f32 %v1858_v53, %v1739_v15  ;;  %v1643_v48 = vpop.permute.xlu2 %1642  ;;  %v535_v53 = vadd.f32 %v6771_v44, %v375_v54  ;;  %v941_v16 = vadd.f32 %v6776_v29, %v781_v8  ;;  %v6787_v54 = vld [vmem:[#allocation51_spill] sm:$0xff]  ;;  %v1582_v8 = vmul.f32 %v4847_v32, %v6791_v31 }
 0x5c5   : > { %v1666_v10 = vmul.f32 %v4855_v42, %v1643_v48 }
 0x5c6   : > { %2065 = vrot.lane.b32.xlu0 %v1899_v46, %s4201_s8 }
 0x5c9   : > { %v1795_v28 = vpop.permute.xlu1 %1794  ;;  %1865 = vrot.lane.b32.xlu1 %v1823_v39, %s4189_s29  ;;  %v6772_v39 = vld [vmem:[#allocation96_spill] sm:$0xff] }
 0x5ca   : > { %v1824_v22 = vmul.f32 %v4871_v5, %v1795_v28  ;;  %v1342_v48 = vadd.f32 %v6772_v39, %v1182_v59  ;;  %v6773_v28 = vld [vmem:[#allocation34_spill] sm:$0xff]  ;;  %v6790_v39 = vld [vmem:[#allocation71_spill] sm:$0xff] }
 0x5cc   : > { %v1994_v45 = vpop.permute.xlu2 %1993  ;;  %v1502_v36 = vadd.f32 %v6774_v13, %v1342_v48 }
 0x5ce   : > { %1711 = vrot.lane.b32.xlu0 %v1666_v10, %s4187_s28  ;;  %v695_v10 = vadd.f32 %v6773_v28, %v535_v53 }
 0x5d1   : > { %v1992_v47 = vpop.permute.xlu1 %1991  ;;  %1707 = vrot.lane.b32.xlu1 %v1664_v26, %s4187_s28  ;;  %v6777_v26 = vld [vmem:[#allocation56_spill] sm:$0xff] }
 0x5d2   : > { %v2120_v63 = vsel %vm2118_vm1, %v2103_v62, %v1992_v47  ;;  %v783_v62 = vmul.f32 %v4843_v60, %v6777_v26  ;;  %v6793_v26 = vld [vmem:[#allocation25_spill] sm:$0xff] }
 0x5d3   : > { %v2056_v50 = vpop.permute.xlu0 %2055 }
 0x5d4   : > { %v5259_v17 = vsel %vm2135_vm2, %v2120_v63, %v2056_v50  ;;  %v1702_v51 = vpop.permute.xlu2 %1701  ;;  %v6778_v50 = vld [vmem:[#allocation75_spill] sm:$0xff]  ;;  %v943_v61 = vadd.f32 %v6779_v34, %v783_v62 }
 0x5d5   : > { %3821 = vmatmul.msk.f32.gmra.mxu0 %vm2168_vm3, %v5259_v17 }
 0x5d9   : > { %1867 = vrot.lane.b32.xlu1 %v1824_v22, %s4189_s29  ;;  %v1700_v49 = vpop.permute.xlu1 %1699  ;;  %v1101_v22 = vadd.f32 %v6778_v50, %v941_v16 }
 0x5da   : > { %v1740_v56 = vadd.f32 %v1700_v49, %v1580_v55  ;;  %v6784_v49 = vld [vmem:[#allocation66_spill] sm:$0xff] }
 0x5db   : > { %v1930_v20 = vpop.permute.xlu0 %1929 }
 0x5dc   : > { %v2104_v52 = vsel %vm2101_vm0, %v695_v10, %v1930_v20 }
 0x5dd   : > { %v2121_v63 = vsel %vm2118_vm1, %v2104_v52, %v1994_v45  ;;  %v1741_v45 = vadd.f32 %v1702_v51, %v1581_v1  ;;  %v6786_v51 = vld [vmem:[#allocation77_spill] sm:$0xff]  ;;  %v6792_v52 = vld [vmem:[#allocation2_spill] sm:$0xff] }
 0x5e1   : > { %1869 = vrot.lane.b32.xlu1 %v1825_v24, %s4189_s29 }
 0x5e3   : > { %v1803_v19 = vpop.permute.xlu0 %1802 }
 0x5e4   : > { %v1826_v33 = vmul.f32 %v4855_v42, %v1803_v19  ;;  %v1932_v42 = vpop.permute.xlu2 %1931  ;;  %v6780_v19 = vld [vmem:[#allocation76_spill] sm:$0xff] }
 0x5e6   : > { %1871 = vrot.lane.b32.xlu0 %v1826_v33, %s4189_s29  ;;  %v1103_v33 = vadd.f32 %v6780_v19, %v943_v61  ;;  %v6795_v61 = vld [vmem:[#allocation82_spill] sm:$0xff]  ;;  %v6796_v19 = vld [vmem:[#allocation3_spill] sm:$0xff] }
 0x5e9   : > { %2003 = vrot.lane.b32.xlu1 %v1500_v0, %s4200_s7  ;;  %v784_v0 = vmul.f32 %v4871_v5, %v6782_v27  ;;  %v6798_v27 = vld [vmem:[#allocation19_spill] sm:$0xff] }
 0x5eb   : > { %v1862_v57 = vpop.permute.xlu0 %1861  ;;  %v944_v7 = vadd.f32 %v6784_v49, %v784_v0 }
 0x5ec   : > { %v1807_v15 = vpop.permute.xlu2 %1806  ;;  %v1901_v41 = vadd.f32 %v1862_v57, %v1741_v45  ;;  %v6788_v57 = vld [vmem:[#allocation41_spill] sm:$0xff] }
 0x5ed   : > { %v1104_v35 = vadd.f32 %v6786_v51, %v944_v7  ;;  %v1827_v44 = vmul.f32 %v4875_v4, %v1807_v15  ;;  %v6802_v7 = vld [vmem:[#allocation123_spill] sm:$0xff] }
 0x5f1   : > { %1566 = vperm.xlu1 %3972, %v4875_v4  }
 0x5f3   : > { %v2060_v43 = vpop.permute.xlu0 %2059 }
 0x5f4   : > { %v1651_v20 = vpop.permute.xlu2 %1650 }
 0x5f9   : > { %2005 = vrot.lane.b32.xlu1 %v1501_v18, %s4200_s7  ;;  %v376_v18 = vmul.f32 %v4839_v9, %v6783_v37 }
 0x5fb   : > { %v1934_v25 = vpop.permute.xlu0 %1933  ;;  %v536_v55 = vadd.f32 %v6785_v12, %v376_v18  ;;  %v1583_v12 = vmul.f32 %v4843_v60, %v6802_v7  ;;  %v2526_v7 = vld [vmem:[%s5420_s17] sm:$0xff] }
 0x5fc   : > { %v1998_v40 = vpop.permute.xlu2 %1997 }
 0x5fd   : > { %v696_v59 = vadd.f32 %v6788_v57, %v536_v55 }
 0x5ff   : > { %v2105_v53 = vsel %vm2101_vm0, %v696_v59, %v1932_v42  ;;  %v6804_v59 = vld [vmem:[#allocation12_spill] sm:$0xff] }
 0x601   : > { %1570 = vperm.xlu1 %3972, %v4867_v3  }
 0x603   : > { %v1860_v6 = vpop.permute.xlu1 %1859  ;;  %v1811_v10 = vpop.permute.xlu0 %1810 }
 0x604   : > { %v1900_v46 = vadd.f32 %v1860_v6, %v1740_v56  ;;  %v782_v56 = vmul.f32 %v4847_v32, %v6787_v54  ;;  %v6789_v6 = vld [vmem:[#allocation61_spill] sm:$0xff]  ;;  %v1706_v15 = vpop.permute.xlu2 %1705  ;;  %v1183_v32 = vmul.f32 %v4843_v60, %v6795_v61  ;;  %v6806_v60 = vld [vmem:[#allocation27_spill] sm:$0xff] }
 0x605   : > { %v5407_v61 = vld [vmem:[%s4252_s27 + $0x58] sm:$0xff] }
 0x606   : > { %2067 = vrot.lane.b32.xlu2 %v1900_v46, %s4201_s8  ;;  %v942_v9 = vadd.f32 %v6789_v6, %v782_v56  ;;  %v1343_v1 = vadd.f32 %v6797_v21, %v1183_v32  ;;  %v1743_v56 = vadd.f32 %v1706_v15, %v1583_v12  ;;  %v379_v6 = vmul.f32 %v4835_v14, %v6804_v59  ;;  %v6815_v32 = vld [vmem:[#allocation119_spill] sm:$0xff]  ;;  %v6821_v12 = vld [vmem:[#allocation69_spill] sm:$0xff]  ;;  %v6823_v59 = vld [vmem:[#allocation78_spill] sm:$0xff] }
 0x608   : > { %v1102_v48 = vadd.f32 %v6790_v39, %v942_v9  ;;  %v6805_v9 = vld [vmem:[#allocation111_spill] sm:$0xff]  ;;  %v6807_v39 = vld [vmem:[#allocation44_spill] sm:$0xff] }
 0x609   : > { %2007 = vrot.lane.b32.xlu1 %v1502_v36, %s4200_s7 }
 0x60b   : > { %v2058_v47 = vpop.permute.xlu1 %2057  ;;  %v1936_v36 = vpop.permute.xlu0 %1935 }
 0x60c   : > { %v5302_v24 = vsel %vm2135_vm2, %v2121_v63, %v2058_v47  ;;  %v1828_v47 = vmul.f32 %v4867_v3, %v1811_v10  ;;  %v2000_v63 = vpop.permute.xlu2 %1999  ;;  %v6809_v10 = vld [vmem:[#allocation90_spill] sm:$0xff] }
 0x60d   : > { %3822 = vmatmul.msk.f32.gmra.mxu0 %vm2168_vm3, %v5302_v24 }
 0x60e   : > { %1941 = vrot.lane.b32.xlu2 %v1101_v22, %s4199_s30  ;;  %v6794_v22 = vld [vmem:[#allocation39_spill] sm:$0xff] }
 0x611   : > { %1945 = vrot.lane.b32.xlu1 %v1103_v33, %s4199_s30  ;;  %v378_v33 = vmul.f32 %v4851_v58, %v6796_v19  ;;  %v6801_v58 = vld [vmem:[#allocation87_spill] sm:$0xff] }
 0x612   : > { %v1184_v49 = vmul.f32 %v4871_v5, %v6801_v58  ;;  %v6820_v58 = vld [vmem:[#allocation121_spill] sm:$0xff] }
 0x613   : > { %v1647_v38 = vpop.permute.xlu1 %1646  ;;  %v538_v0 = vadd.f32 %v6798_v27, %v378_v33  ;;  %v2395_v27 = vld [vmem:[%s6603_s2 + $0x10] sm:$0xff] }
 0x614   : > { %v1667_v23 = vmul.f32 %v4875_v4, %v1647_v38  ;;  %v1668_v4 = vmul.f32 %v4867_v3, %v1651_v20  ;;  %v6799_v38 = vld [vmem:[#allocation107_spill] sm:$0xff]  ;;  %v1938_v18 = vpop.permute.xlu2 %1937  ;;  %2605 = vmatpush.msra.mxu1 %v2395_v27 }
 0x615   : > { %3836 = vmatmul.msk.f32.vlgmr.msra.gmra.mxu1 %vm2118_vm1, %v2526_v7 }
 0x616   : > { %1713 = vrot.lane.b32.xlu0 %v1667_v23, %s4187_s28  ;;  %2069 = vrot.lane.b32.xlu2 %v1901_v41, %s4201_s8  ;;  %v1503_v41 = vadd.f32 %v6799_v38, %v1343_v1  ;;  %v6817_v1 = vld [vmem:[#allocation109_spill] sm:$0xff] }
 0x619   : > { %1947 = vrot.lane.b32.xlu1 %v1104_v35, %s4199_s30  ;;  %v6803_v35 = vld [vmem:[#allocation102_spill] sm:$0xff] }
 0x61a   : > { %v1344_v54 = vadd.f32 %v6803_v35, %v1184_v49  ;;  %v6822_v35 = vld [vmem:[#allocation103_spill] sm:$0xff] }
 0x61b   : > { %v1996_v46 = vpop.permute.xlu1 %1995 }
 0x61c   : > { %v2122_v28 = vsel %vm2118_vm1, %v2105_v53, %v1996_v46  ;;  %v539_v46 = vadd.f32 %v6806_v60, %v379_v6  ;;  %v2002_v15 = vpop.permute.xlu2 %2001  ;;  %v5446_v60 = vld [vmem:[%s4252_s27 + $0x78] sm:$0xff] }
 0x61d   : > { %v5332_v13 = vsel %vm2135_vm2, %v2122_v28, %v2060_v43  ;;  %v377_v43 = vmul.f32 %v4819_v11, %v6792_v52  ;;  %v2064_v11 = vpop.permute.xlu0 %2063  ;;  %v6808_v28 = vld [vmem:[#allocation52_spill] sm:$0xff] }
 0x61e   : > { %1873 = vrot.lane.b32.xlu0 %v1827_v44, %s4189_s29  ;;  %1943 = vrot.lane.b32.xlu2 %v1102_v48, %s4199_s30  ;;  %v1504_v44 = vadd.f32 %v6805_v9, %v1344_v54  ;;  %v699_v48 = vadd.f32 %v6807_v39, %v539_v46  ;;  %v785_v14 = vmul.f32 %v4859_v2, %v6808_v28  ;;  %v6824_v9 = vld [vmem:[#allocation113_spill] sm:$0xff]  ;;  %v6825_v46 = vld [vmem:[#allocation55_spill] sm:$0xff] }
 0x61f   : > { %3823 = vmatmul.msk.f32.gmra.mxu0 %vm2168_vm3, %v5332_v13  ;;  %v537_v62 = vadd.f32 %v6793_v26, %v377_v43  ;;  %v6812_v26 = vld [vmem:[#allocation72_spill] sm:$0xff]  ;;  %v788_v39 = vmul.f32 %v5446_v60, %v6825_v46  ;;  %v6838_v46 = vld [vmem:[#allocation14_spill] sm:$0xff] }
 0x620   : > { %v2108_v43 = vsel %vm2101_vm0, %v699_v48, %v1938_v18  ;;  %v5432_v18 = vld [vmem:[%s4252_s27 + $0x60] sm:$0xff] }
 0x621   : > { %v697_v34 = vadd.f32 %v6794_v22, %v537_v62  ;;  %v6814_v22 = vld [vmem:[#allocation85_spill] sm:$0xff]  ;;  %v1585_v49 = vmul.f32 %v5432_v18, %v6820_v58 }
 0x622   : > { %v2529_v58 = vld [vmem:[%s5420_s17 + $0x18] sm:$0xff] }
 0x623   : > { %v1704_v42 = vpop.permute.xlu1 %1703  ;;  %v2106_v20 = vsel %vm2101_vm0, %v697_v34, %v1934_v25  ;;  %v6800_v25 = vld [vmem:[#allocation35_spill] sm:$0xff] }
 0x624   : > { %v1742_v29 = vadd.f32 %v1704_v42, %v1582_v8  ;;  %v2123_v45 = vsel %vm2118_vm1, %v2106_v20, %v1998_v40  ;;  %v698_v37 = vadd.f32 %v6800_v25, %v538_v0  ;;  %v6811_v8 = vld [vmem:[#allocation99_spill] sm:$0xff]  ;;  %v1584_v20 = vmul.f32 %v5407_v61, %v6815_v32  ;;  %v6818_v0 = vld [vmem:[#allocation58_spill] sm:$0xff]  ;;  %v6819_v25 = vld [vmem:[#allocation89_spill] sm:$0xff]  ;;  %v1940_v28 = vpop.permute.xlu2 %1939 }
 0x625   : > { %v1710_v51 = vpop.permute.xlu0 %1709 }
 0x626   : > { %1715 = vrot.lane.b32.xlu0 %v1668_v4, %s4187_s28  ;;  %v2107_v55 = vsel %vm2101_vm0, %v698_v37, %v1936_v36  ;;  %v1185_v4 = vmul.f32 %v4859_v2, %v6809_v10  ;;  %v6810_v36 = vld [vmem:[#allocation62_spill] sm:$0xff]  ;;  %v5402_v2 = vld [vmem:[%s4252_s27 + $0x68] sm:$0xff] }
 0x627   : > { %v2124_v57 = vsel %vm2118_vm1, %v2107_v55, %v2000_v63  ;;  %v945_v31 = vadd.f32 %v6810_v36, %v785_v14  ;;  %v1186_v34 = vmul.f32 %v5402_v2, %v6814_v22  ;;  %v786_v38 = vmul.f32 %v5402_v2, %v6818_v0  ;;  %v4157_v14 = vld [vmem:[%s4252_s27 + $0x38] sm:$0xff]  ;;  %v6827_v10 = vld [vmem:[#allocation11_spill] sm:$0xff] }
 0x628   : > { %v5376_v5 = vsel %vm2135_vm2, %v2124_v57, %v2064_v11  ;;  %v1345_v52 = vadd.f32 %v6811_v8, %v1185_v4  ;;  %v6816_v11 = vld [vmem:[#allocation97_spill] sm:$0xff]  ;;  %v380_v4 = vmul.f32 %v4157_v14, %v6827_v10  ;;  %v2527_v36 = vld [vmem:[%s5420_s17 + $0x8] sm:$0xff]  ;;  %v2152_v14 = vmul.f32 %v5201_v30, %v5201_v30  ;;  %v6840_v10 = vld [vmem:[#allocation46_spill] sm:$0xff] }
 0x629   : > { %v1105_v62 = vadd.f32 %v6812_v26, %v945_v31  ;;  %v1346_v19 = vadd.f32 %v6816_v11, %v1186_v34  ;;  %v946_v55 = vadd.f32 %v6821_v12, %v786_v38  ;;  %v6829_v31 = vld [vmem:[#allocation64_spill] sm:$0xff]  ;;  %3837 = vmatmul.msk.f32.gmra.mxu1 %vm2118_vm1, %v2527_v36  ;;  %v6833_v34 = vld [vmem:[#allocation79_spill] sm:$0xff]  ;;  %v4158_v38 = vld [vmem:[%s4252_s27 + $0x40] sm:$0xff]  ;;  %v2155_v30 = vmul.f32 %v5332_v13, %v5332_v13 }
 0x62a   : > { %v948_v8 = vadd.f32 %v6829_v31, %v788_v39  ;;  %v6837_v12 = vld [vmem:[#allocation37_spill] sm:$0xff]  ;;  %v2169_v36 = vsel %vm2168_vm3, %v2152_v14, 0.0 }
 0x62b   : > { %v1864_v16 = vpop.permute.xlu1 %1863  ;;  %v1106_v6 = vadd.f32 %v6823_v59, %v946_v55  ;;  %v2530_v59 = vld [vmem:[%s5420_s17 + $0x20] sm:$0xff] }
 0x62c   : > { %v1902_v50 = vadd.f32 %v1864_v16, %v1742_v29  ;;  %v2125_v29 = vsel %vm2118_vm1, %v2108_v43, %v2002_v15  ;;  %v6828_v15 = vld [vmem:[#allocation124_spill] sm:$0xff] }
 0x62e   : > { %2071 = vrot.lane.b32.xlu2 %v1902_v50, %s4201_s8  ;;  %1875 = vrot.lane.b32.xlu0 %v1828_v47, %s4189_s29  ;;  %v6813_v47 = vld [vmem:[#allocation114_spill] sm:$0xff] }
 0x62f   : > { %v1505_v63 = vadd.f32 %v6813_v47, %v1345_v52  ;;  %v6830_v52 = vld [vmem:[#allocation68_spill] sm:$0xff] }
 0x633   : > { %v2062_v3 = vpop.permute.xlu1 %2061 }
 0x634   : > { %v5359_v23 = vsel %vm2135_vm2, %v2123_v45, %v2062_v3  ;;  %v1506_v3 = vadd.f32 %v6817_v1, %v1346_v19 }
 0x635   : > { %3824 = vmatmul.msk.f32.gmra.mxu0 %vm2168_vm3, %v5359_v23 }
 0x636   : > { %2009 = vrot.lane.b32.xlu2 %v1503_v41, %s4200_s7  ;;  %v5427_v41 = vld [vmem:[%s4252_s27 + $0x70] sm:$0xff] }
 0x637   : > { %v1187_v37 = vmul.f32 %v5427_v41, %v6819_v25  ;;  %v6835_v25 = vld [vmem:[#allocation4_spill] sm:$0xff] }
 0x638   : > { %v2066_v42 = vpop.permute.xlu0 %2065 }
 0x639   : > { %v5395_v50 = vsel %vm2135_vm2, %v2125_v29, %v2066_v42  ;;  %v1347_v54 = vadd.f32 %v6822_v35, %v1187_v37  ;;  %v1586_v42 = vmul.f32 %v5402_v2, %v6828_v15  ;;  %v381_v37 = vmul.f32 %v4158_v38, %v6835_v25 }
 0x63b   : > { %v1866_v40 = vpop.permute.xlu1 %1865 }
 0x63c   : > { %v1903_v53 = vadd.f32 %v1866_v40, %v1743_v56  ;;  %v1745_v56 = vadd.f32 %v1710_v51, %v1585_v49  ;;  %v6826_v51 = vld [vmem:[#allocation59_spill] sm:$0xff]  ;;  %v6836_v49 = vld [vmem:[#allocation21_spill] sm:$0xff] }
 0x63d   : > { %3825 = vmatmul.msk.f32.gmra.mxu0 %vm2168_vm3, %v5376_v5  ;;  %v787_v48 = vmul.f32 %v5427_v41, %v6826_v51  ;;  %v541_v7 = vadd.f32 %v6836_v49, %v381_v37  ;;  %v2532_v51 = vld [vmem:[%s5420_s17 + $0x30] sm:$0xff] }
 0x63e   : > { %2011 = vrot.lane.b32.xlu2 %v1504_v44, %s4200_s7  ;;  %2073 = vrot.lane.b32.xlu0 %v1903_v53, %s4201_s8  ;;  %v1507_v44 = vadd.f32 %v6824_v9, %v1347_v54  ;;  %v2536_v37 = vld [vmem:[%s5420_s17 + $0x50] sm:$0xff] }
 0x63f   : > { %v947_v43 = vadd.f32 %v6830_v52, %v787_v48  ;;  %v701_v55 = vadd.f32 %v6837_v12, %v541_v7  ;;  %v6839_v48 = vld [vmem:[#allocation29_spill] sm:$0xff]  ;;  %v4160_v49 = vld [vmem:[%s4252_s27 + $0x50] sm:$0xff]  ;;  %v6845_v12 = vld [vmem:[#allocation30_spill] sm:$0xff] }
 0x640   : > { %v1712_v40 = vpop.permute.xlu0 %1711  ;;  %v6844_v7 = vld [vmem:[#allocation13_spill] sm:$0xff] }
 0x641   : > { %v1107_v32 = vadd.f32 %v6833_v34, %v947_v43  ;;  %v2533_v43 = vld [vmem:[%s5420_s17 + $0x38] sm:$0xff]  ;;  %v2156_v34 = vmul.f32 %v5359_v23, %v5359_v23 }
 0x643   : > { %v1708_v16 = vpop.permute.xlu1 %1707 }
 0x644   : > { %v1744_v33 = vadd.f32 %v1708_v16, %v1584_v20  ;;  %v6831_v16 = vld [vmem:[#allocation28_spill] sm:$0xff]  ;;  %v6834_v20 = vld [vmem:[#allocation42_spill] sm:$0xff] }
 0x645   : > { %3826 = vmatmul.msk.f32.gmra.mxu0 %vm2168_vm3, %v5395_v50  ;;  %v540_v26 = vadd.f32 %v6831_v16, %v380_v4 }
 0x646   : > { %2013 = vrot.lane.b32.xlu2 %v1505_v63, %s4200_s7  ;;  %1949 = vrot.lane.b32.xlu0 %v1105_v62, %s4199_s30  ;;  %v1746_v62 = vadd.f32 %v1712_v40, %v1586_v42  ;;  %v6832_v63 = vld [vmem:[#allocation74_spill] sm:$0xff] }
 0x647   : > { %v1108_v22 = vadd.f32 %v6832_v63, %v948_v8  ;;  %v700_v11 = vadd.f32 %v6834_v20, %v540_v26  ;;  %v2534_v63 = vld [vmem:[%s5420_s17 + $0x40] sm:$0xff]  ;;  %v6842_v20 = vld [vmem:[#allocation101_spill] sm:$0xff] }
 0x64b   : > { %v1868_v21 = vpop.permute.xlu1 %1867 }
 0x64c   : > { %v1904_v45 = vadd.f32 %v1868_v21, %v1744_v33  ;;  %v2109_v33 = vsel %vm2101_vm0, %v700_v11, %v1940_v28  ;;  %v2528_v21 = vld [vmem:[%s5420_s17 + $0x10] sm:$0xff] }
 0x64d   : > { %3838 = vmatmul.msk.f32.gmra.mxu1 %vm2118_vm1, %v2528_v21  ;;  %v6843_v21 = vld [vmem:[#allocation115_spill] sm:$0xff] }
 0x64e   : > { %2075 = vrot.lane.b32.xlu1 %v1904_v45, %s4201_s8  ;;  %2015 = vrot.lane.b32.xlu2 %v1506_v3, %s4200_s7 }
 0x653   : > { %v1870_v57 = vpop.permute.xlu1 %1869 }
 0x654   : > { %v1905_v53 = vadd.f32 %v1870_v57, %v1745_v56 }
 0x655   : > { %3839 = vmatmul.msk.f32.gmra.mxu1 %vm2118_vm1, %v2529_v58 }
 0x656   : > { %1951 = vrot.lane.b32.xlu1 %v1106_v6, %s4199_s30  ;;  %2017 = vrot.lane.b32.xlu2 %v1507_v44, %s4200_s7  ;;  %v2531_v6 = vld [vmem:[%s5420_s17 + $0x28] sm:$0xff] }
 0x657   : > { %2077 = vrot.lane.b32.xlu0 %v1905_v53, %s4201_s8  ;;  %v4159_v53 = vld [vmem:[%s4252_s27 + $0x48] sm:$0xff] }
 0x658   : > { %v1872_v29 = vpop.permute.xlu0 %1871  ;;  %v382_v39 = vmul.f32 %v4159_v53, %v6838_v46  ;;  %v2537_v53 = vld [vmem:[%s5420_s17 + $0x58] sm:$0xff] }
 0x659   : > { %v1906_v19 = vadd.f32 %v1872_v29, %v1746_v62  ;;  %v2178_v62 = vsel %vm2168_vm3, %v2155_v30, 0.0  ;;  %v2153_v30 = vmul.f32 %v5259_v17, %v5259_v17 }
 0x65a   : > { %v542_v28 = vadd.f32 %v6839_v48, %v382_v39 }
 0x65b   : > { %v2004_v47 = vpop.permute.xlu1 %2003 }
 0x65c   : > { %v2126_v1 = vsel %vm2118_vm1, %v2109_v33, %v2004_v47  ;;  %v702_v4 = vadd.f32 %v6840_v10, %v542_v28  ;;  %v6847_v28 = vld [vmem:[#allocation5_spill] sm:$0xff]  ;;  %v6848_v10 = vld [vmem:[#allocation23_spill] sm:$0xff] }
 0x65d   : > { %3840 = vmatmul.msk.f32.gmra.mxu1 %vm2118_vm1, %v2530_v59  ;;  %v384_v14 = vmul.f32 %v5407_v61, %v6847_v28  ;;  %v2711_v28 = vld [vmem:[%s6604_s3 + $0x38] sm:$0xff] }
 0x65e   : > { %1953 = vrot.lane.b32.xlu1 %v1107_v32, %s4199_s30  ;;  %1955 = vrot.lane.b32.xlu2 %v1108_v22, %s4199_s30  ;;  %v6841_v32 = vld [vmem:[#allocation91_spill] sm:$0xff] }
 0x65f   : > { %2079 = vrot.lane.b32.xlu0 %v1906_v19, %s4201_s8  ;;  %v1188_v13 = vmul.f32 %v5446_v60, %v6841_v32  ;;  %v2181_v19 = vsel %vm2168_vm3, %v2156_v34, 0.0  ;;  %v2172_v32 = vsel %vm2168_vm3, %v2153_v30, 0.0 }
 0x660   : > { %v2068_v3 = vpop.permute.xlu2 %2067 }
 0x661   : > { %v2143_v45 = vsel %vm2135_vm2, %v2126_v1, %v2068_v3  ;;  %v1348_v11 = vadd.f32 %v6842_v20, %v1188_v13  ;;  %v2535_v3 = vld [vmem:[%s5420_s17 + $0x48] sm:$0xff]  ;;  %v2154_v13 = vmul.f32 %v5302_v24, %v5302_v24 }
 0x662   : > { %3827 = vmatmul.msk.f32.gmra.mxu0 %vm2168_vm3, %v2143_v45  ;;  %v6853_v20 = vld [vmem:[#allocation15_spill] sm:$0xff] }
 0x663   : > { %v1567_v27 = vpop.permute.xlu1 %1566  ;;  %v1508_v1 = vadd.f32 %v6843_v21, %v1348_v11  ;;  %v386_v11 = vmul.f32 %v5402_v2, %v6853_v20 }
 0x664   : > { %v1587_v16 = vmul.f32 %v5427_v41, %v1567_v27  ;;  %v2159_v27 = vmul.f32 %v2143_v45, %v2143_v45  ;;  %v383_v45 = vmul.f32 %v4160_v49, %v6844_v7 }
 0x665   : > { %3841 = vmatmul.msk.f32.gmra.mxu1 %vm2118_vm1, %v2531_v6 }
 0x666   : > { %v2190_v38 = vsel %vm2168_vm3, %v2159_v27, 0.0 }
 0x668   : > { %v1942_v0 = vpop.permute.xlu2 %1941 }
 0x669   : > { %v2110_v54 = vsel %vm2101_vm0, %v701_v55, %v1942_v0  ;;  %v543_v55 = vadd.f32 %v6845_v12, %v383_v45 }
 0x66b   : > { %v2006_v35 = vpop.permute.xlu1 %2005 }
 0x66c   : > { %v2127_v56 = vsel %vm2118_vm1, %v2110_v54, %v2006_v35  ;;  %v6846_v54 = vld [vmem:[#allocation45_spill] sm:$0xff] }
 0x66d   : > { %3842 = vmatmul.msk.f32.gmra.mxu1 %vm2118_vm1, %v2532_v51  ;;  %v2538_v51 = vld [vmem:[%s5420_s17 + $0x60] sm:$0xff] }
 0x670   : > { %v2070_v40 = vpop.permute.xlu2 %2069 }
 0x671   : > { %v5482_v57 = vsel %vm2135_vm2, %v2127_v56, %v2070_v40  ;;  %v703_v56 = vadd.f32 %v6846_v54, %v543_v55 }
 0x672   : > { %3828 = vmatmul.msk.f32.gmra.mxu0 %vm2168_vm3, %v5482_v57 }
 0x673   : > { %v1571_v9 = vpop.permute.xlu1 %1570 }
 0x674   : > { %v1588_v23 = vmul.f32 %v5446_v60, %v1571_v9 }
 0x675   : > { %3843 = vmatmul.msk.f32.gmra.mxu1 %vm2118_vm1, %v2533_v43 }
 0x678   : > { %v1944_v44 = vpop.permute.xlu2 %1943 }
 0x679   : > { %v2111_v42 = vsel %vm2101_vm0, %v702_v4, %v1944_v44  ;;  %v544_v4 = vadd.f32 %v6848_v10, %v384_v14  ;;  %v2710_v14 = vld [vmem:[%s6604_s3 + $0x30] sm:$0xff]  ;;  %v2709_v10 = vld [vmem:[%s6604_s3 + $0x28] sm:$0xff] }
 0x67b   : > { %v2008_v15 = vpop.permute.xlu1 %2007 }
 0x67c   : > { %v2128_v31 = vsel %vm2118_vm1, %v2111_v42, %v2008_v15  ;;  %v6849_v42 = vld [vmem:[#allocation40_spill] sm:$0xff] }
 0x67d   : > { %3844 = vmatmul.msk.f32.gmra.mxu1 %vm2118_vm1, %v2534_v63 }
 0x683   : > { %v1946_v35 = vpop.permute.xlu1 %1945 }
 0x684   : > { %v2112_v59 = vsel %vm2101_vm0, %v703_v56, %v1946_v35 }
 0x685   : > { %3845 = vmatmul.msk.f32.gmra.mxu1 %vm2118_vm1, %v2535_v3 }
 0x688   : > { %2170 = vadd.xlane.f32.xlu1 %v2169_v36  ;;  %v2072_v8 = vpop.permute.xlu2 %2071  ;;  %v1714_v52 = vpop.permute.xlu0 %1713  ;;  %v704_v36 = vadd.f32 %v6849_v42, %v544_v4  ;;  %v2540_v42 = vld [vmem:[%s5420_s17 + $0x70] sm:$0xff] }
 0x689   : > { %v5503_v29 = vsel %vm2135_vm2, %v2128_v31, %v2072_v8  ;;  %v1747_v26 = vadd.f32 %v1714_v52, %v1587_v16  ;;  %v2539_v8 = vld [vmem:[%s5420_s17 + $0x68] sm:$0xff]  ;;  %v6850_v52 = vld [vmem:[#allocation16_spill] sm:$0xff] }
 0x68a   : > { %3829 = vmatmul.msk.f32.gmra.mxu0 %vm2168_vm3, %v5503_v29  ;;  %v385_v43 = vmul.f32 %v5432_v18, %v6850_v52 }
 0x68b   : > { %v1948_v48 = vpop.permute.xlu1 %1947 }
 0x68c   : > { %v2113_v31 = vsel %vm2101_vm0, %v704_v36, %v1948_v48  ;;  %v2712_v48 = vld [vmem:[%s6604_s3 + $0x40] sm:$0xff]  ;;  %v2707_v36 = vld [vmem:[%s6604_s3 + $0x18] sm:$0xff] }
 0x68d   : > { %3846 = vmatmul.msk.f32.gmra.mxu1 %vm2118_vm1, %v2536_v37  ;;  %v2161_v37 = vmul.f32 %v5503_v29, %v5503_v29  ;;  %v2160_v29 = vmul.f32 %v5482_v57, %v5482_v57  ;;  %v2717_v57 = vld [vmem:[%s6604_s3 + $0x68] sm:$0xff] }
 0x68f   : > { %v2196_v35 = vsel %vm2168_vm3, %v2161_v37, 0.0  ;;  %v2193_v56 = vsel %vm2168_vm3, %v2160_v29, 0.0 }
 0x690   : > { %2179 = vadd.xlane.f32.xlu1 %v2178_v62  ;;  %v1874_v47 = vpop.permute.xlu0 %1873  ;;  %v2010_v40 = vpop.permute.xlu2 %2009 }
 0x691   : > { %v1907_v22 = vadd.f32 %v1874_v47, %v1747_v26  ;;  %v2129_v6 = vsel %vm2118_vm1, %v2112_v59, %v2010_v40  ;;  %v6851_v47 = vld [vmem:[#allocation31_spill] sm:$0xff]  ;;  %v2719_v59 = vld [vmem:[%s6604_s3 + $0x78] sm:$0xff] }
 0x692   : > { %v545_v63 = vadd.f32 %v6851_v47, %v385_v43  ;;  %2722 = vmatpush.msrb.mxu2 %v2719_v59  ;;  %v6856_v43 = vld [vmem:[#allocation8_spill] sm:$0xff] }
 0x693   : > { %2081 = vrot.lane.b32.xlu0 %v1907_v22, %s4201_s8  ;;  %v6852_v22 = vld [vmem:[#allocation48_spill] sm:$0xff]  ;;  %v387_v30 = vmul.f32 %v5427_v41, %v6856_v43 }
 0x694   : > { %v705_v34 = vadd.f32 %v6852_v22, %v545_v63  ;;  %v2541_v63 = vld [vmem:[%s5420_s17 + $0x78] sm:$0xff]  ;;  %v6858_v22 = vld [vmem:[#allocation43_spill] sm:$0xff] }
 0x695   : > { %3847 = vmatmul.msk.f32.gmra.mxu1 %vm2118_vm1, %v2537_v53  ;;  %v2716_v53 = vld [vmem:[%s6604_s3 + $0x60] sm:$0xff] }
 0x698   : > { %2182 = vadd.xlane.f32.xlu1 %v2181_v19  ;;  %v1716_v33 = vpop.permute.xlu0 %1715  ;;  %v2012_v15 = vpop.permute.xlu2 %2011  ;;  %v2158_v19 = vmul.f32 %v5395_v50, %v5395_v50 }
 0x699   : > { %v1748_v0 = vadd.f32 %v1716_v33, %v1588_v23  ;;  %v2130_v16 = vsel %vm2118_vm1, %v2113_v31, %v2012_v15  ;;  %v2708_v15 = vld [vmem:[%s6604_s3 + $0x20] sm:$0xff]  ;;  %v2706_v31 = vld [vmem:[%s6604_s3 + $0x10] sm:$0xff] }
 0x69a   : > { %v2187_v2 = vsel %vm2168_vm3, %v2158_v19, 0.0  ;;  %v6859_v19 = vld [vmem:[#allocation17_spill] sm:$0xff] }
 0x69b   : > { %2019 = vrot.lane.b32.xlu0 %v1508_v1, %s4200_s7  ;;  %v6854_v1 = vld [vmem:[#allocation32_spill] sm:$0xff] }
 0x69c   : > { %v546_v3 = vadd.f32 %v6854_v1, %v386_v11 }
 0x69d   : > { %3848 = vmatmul.msk.f32.gmra.mxu1 %vm2118_vm1, %v2538_v51  ;;  %v2713_v51 = vld [vmem:[%s6604_s3 + $0x48] sm:$0xff] }
 0x6a0   : > { %2191 = vadd.xlane.f32.xlu1 %v2190_v38  ;;  %v1876_v25 = vpop.permute.xlu0 %1875  ;;  %v2014_v18 = vpop.permute.xlu2 %2013  ;;  %v6855_v38 = vld [vmem:[#allocation47_spill] sm:$0xff] }
 0x6a1   : > { %v1908_v58 = vadd.f32 %v1876_v25, %v1748_v0  ;;  %v2175_v0 = vsel %vm2168_vm3, %v2154_v13, 0.0  ;;  %v706_v24 = vadd.f32 %v6855_v38, %v546_v3  ;;  %v2157_v25 = vmul.f32 %v5376_v5, %v5376_v5  ;;  %v6860_v3 = vld [vmem:[#allocation33_spill] sm:$0xff]  ;;  %v6861_v38 = vld [vmem:[#allocation50_spill] sm:$0xff] }
 0x6a3   : > { %2083 = vrot.lane.b32.xlu2 %v1908_v58, %s4201_s8  ;;  %v2184_v55 = vsel %vm2168_vm3, %v2157_v25, 0.0 }
 0x6a5   : > { %3849 = vmatmul.msk.f32.gmra.mxu1 %vm2118_vm1, %v2539_v8  ;;  %v2705_v8 = vld [vmem:[%s6604_s3 + $0x8] sm:$0xff] }
 0x6a8   : > { %v2016_v58 = vpop.permute.xlu2 %2015 }
 0x6ad   : > { %3850 = vmatmul.msk.f32.gmra.mxu1 %vm2118_vm1, %v2540_v42 }
 0x6b0   : > { %v2074_v9 = vpop.permute.xlu0 %2073 }
 0x6b1   : > { %v2146_v44 = vsel %vm2135_vm2, %v2129_v6, %v2074_v9  ;;  %v2718_v9 = vld [vmem:[%s6604_s3 + $0x70] sm:$0xff] }
 0x6b2   : > { %v2162_v46 = vmul.f32 %v2146_v44, %v2146_v44  ;;  %3830 = vmatmul.msk.f32.gmra.mxu0 %vm2168_vm3, %v2146_v44  ;;  %2723 = vmatpush.msrb.mxu2 %v2718_v9 }
 0x6b4   : > { %v2199_v39 = vsel %vm2168_vm3, %v2162_v46, 0.0  ;;  %2724 = vmatpush.msrb.mxu2 %v2717_v57  ;;  %v2715_v46 = vld [vmem:[%s6604_s3 + $0x58] sm:$0xff] }
 0x6b5   : > { %2200 = vadd.xlane.f32.xlu1 %v2199_v39  ;;  %v2714_v39 = vld [vmem:[%s6604_s3 + $0x50] sm:$0xff]  ;;  %3851 = vmatmul.msk.f32.gmra.mxu1 %vm2118_vm1, %v2541_v63 }
 0x6b6   : > { %2725 = vmatpush.msrb.mxu2 %v2716_v53 }
 0x6b8   : > { %v1950_v61 = vpop.permute.xlu0 %1949  ;;  %2726 = vmatpush.msrb.mxu2 %v2715_v46 }
 0x6b9   : > { %v2114_v17 = vsel %vm2101_vm0, %v705_v34, %v1950_v61  ;;  %v2704_v61 = vld [vmem:[%s6604_s3] sm:$0xff] }
 0x6ba   : > { %v2131_v21 = vsel %vm2118_vm1, %v2114_v17, %v2014_v18  ;;  %2727 = vmatpush.msrb.mxu2 %v2714_v39 }
 0x6bc   : > { %2728 = vmatpush.msrb.mxu2 %v2713_v51 }
 0x6be   : > { %2729 = vmatpush.msrb.mxu2 %v2712_v48 }
 0x6c0   : > { %v2076_v26 = vpop.permute.xlu1 %2075  ;;  %2730 = vmatpush.msrb.mxu2 %v2711_v28 }
 0x6c1   : > { %v2147_v62 = vsel %vm2135_vm2, %v2130_v16, %v2076_v26  ;;  %v2018_v16 = vpop.permute.xlu2 %2017 }
 0x6c2   : > { %3831 = vmatmul.msk.f32.gmra.mxu0 %vm2168_vm3, %v2147_v62  ;;  %v2163_v6 = vmul.f32 %v2147_v62, %v2147_v62  ;;  %2731 = vmatpush.msrb.mxu2 %v2710_v14  ;;  %v6857_v62 = vld [vmem:[#allocation26_spill] sm:$0xff] }
 0x6c3   : > { %v547_v47 = vadd.f32 %v6857_v62, %v387_v30 }
 0x6c4   : > { %v2202_v44 = vsel %vm2168_vm3, %v2163_v6, 0.0  ;;  %2732 = vmatpush.msrb.mxu2 %v2709_v10 }
 0x6c5   : > { %2173 = vadd.xlane.f32.xlu0 %v2172_v32  ;;  %v707_v34 = vadd.f32 %v6858_v22, %v547_v47 }
 0x6c6   : > { %2733 = vmatpush.msrb.mxu2 %v2708_v15 }
 0x6c8   : > { %v1952_v23 = vpop.permute.xlu1 %1951  ;;  %2734 = vmatpush.msrb.mxu2 %v2707_v36 }
 0x6c9   : > { %v2078_v33 = vpop.permute.xlu0 %2077  ;;  %v2115_v50 = vsel %vm2101_vm0, %v706_v24, %v1952_v23  ;;  %v1956_v20 = vpop.permute.xlu2 %1955 }
 0x6ca   : > { %v2148_v27 = vsel %vm2135_vm2, %v2131_v21, %v2078_v33  ;;  %v2132_v7 = vsel %vm2118_vm1, %v2115_v50, %v2016_v58  ;;  %2735 = vmatpush.msrb.mxu2 %v2706_v31  ;;  %v388_v33 = vmul.f32 %v5446_v60, %v6859_v19 }
 0x6cb   : > { %3832 = vmatmul.msk.f32.vlgmr.msra.gmra.mxu2 %vm2168_vm3, %v2148_v27  ;;  %v2164_v54 = vmul.f32 %v2148_v27, %v2148_v27 }
 0x6cc   : > { %2176 = vadd.xlane.f32.xlu2 %v2175_v0  ;;  %2736 = vmatpush.msrb.mxu2 %v2705_v8  ;;  %v548_v27 = vadd.f32 %v6860_v3, %v388_v33 }
 0x6cd   : > { %2188 = vadd.xlane.f32.xlu0 %v2187_v2  ;;  %v2205_v40 = vsel %vm2168_vm3, %v2164_v54, 0.0 }
 0x6ce   : > { %2737 = vmatpush.msrb.mxu2 %v2704_v61  ;;  %v708_v24 = vadd.f32 %v6861_v38, %v548_v27 }
 0x6d0   : > { %v1954_v4 = vpop.permute.xlu1 %1953  ;;  %v2117_v50 = vsel %vm2101_vm0, %v708_v24, %v1956_v20  ;;  %v5694_v20 = vld [vmem:[%s6605_s4 + $0x38] sm:$0xff] }
 0x6d1   : > { %v2080_v49 = vpop.permute.xlu0 %2079  ;;  %v2116_v32 = vsel %vm2101_vm0, %v707_v34, %v1954_v4  ;;  %2944 = vmatpush.msrb.mxu1 %v5694_v20 }
 0x6d2   : > { %v2149_v45 = vsel %vm2135_vm2, %v2132_v7, %v2080_v49  ;;  %v2133_v13 = vsel %vm2118_vm1, %v2116_v32, %v2018_v16  ;;  %v2462_v49 = vpop.f32.mrf.mxu0 }
 0x6d3   : > { %v2165_v12 = vmul.f32 %v2149_v45, %v2149_v45  ;;  %3833 = vmatmul.msk.f32.gmra.mxu2 %vm2168_vm3, %v2149_v45 }
 0x6d4   : > { %2185 = vadd.xlane.f32.xlu2 %v2184_v55 }
 0x6d5   : > { %2197 = vadd.xlane.f32.xlu0 %v2196_v35  ;;  %v2208_v5 = vsel %vm2168_vm3, %v2165_v12, 0.0  ;;  %v5661_v12 = vld [vmem:[%s6603_s2 + $0x18] ss:$0 sm:$0xff] }
 0x6d6   : > { %2209 = vadd.xlane.f32.xlu1 %v2208_v5  ;;  %v2607_v5 = vpop.f32.mrf.mxu1 }
 0x6da   : > { %v2465_v42 = vpop.f32.mrf.mxu0 }
 0x6dc   : > { %2194 = vadd.xlane.f32.xlu2 %v2193_v56 }
 0x6dd   : > { %2206 = vadd.xlane.f32.xlu0 %v2205_v40 }
 0x6de   : > { %v2610_v6 = vpop.f32.mrf.mxu1 }
 0x6e4   : > { %2203 = vadd.xlane.f32.xlu2 %v2202_v44 }
 0x6e6   : > { %v5669_v46 = vpop.f32.mrf.mxu1 }
 0x6ee   : > { %v5679_v43 = vpop.f32.mrf.mxu1 }
 0x6fb   : > { %v2171_v52 = vpop.xlane.xlu1 %2170 }
 0x6fc   : > { %v2217_v26 = vmax.f32 %v2171_v52, 1e-24 }
 0x6fd   : > { %v2084_v60 = vpop.permute.xlu2 %2083 }
 0x6fe   : > { %3976 = vrsqrt.f32 %v2217_v26  ;;  %vm2239_vm5 = vweird.f32 %v2217_v26 }
 0x703   : > { %v2180_v59 = vpop.xlane.xlu1 %2179 }
 0x704   : > { %v3977_v18 = vpop.eup %3976  ;;  %v5666_v9 = vmax.f32 %v2180_v59, 1e-24 }
 0x705   : > { %v2234_v17 = vmul.f32 %v3977_v18, %v2217_v26  ;;  %v2082_v41 = vpop.permute.xlu0 %2081  ;;  %vm2240_vm4 = vweird.f32 %v3977_v18 }
 0x706   : > { %v2150_v11 = vsel %vm2135_vm2, %v2133_v13, %v2082_v41  ;;  %vm2241_vm6 = vmor %vm2239_vm5, %vm2240_vm4  ;;  %v2468_v41 = vpop.f32.mrf.mxu0  ;;  %v2809_v13 = vld [vmem:[%s6605_s4 + $0x30] sm:$0xff]  ;;  %vm2269_vm14 = vweird.f32 %v5666_v9 }
 0x707   : > { %v2235_v21 = vmul.f32 %v3977_v18, %v2234_v17  ;;  %v2166_v1 = vmul.f32 %v2150_v11, %v2150_v11  ;;  %3834 = vmatmul.msk.f32.gmra.mxu2 %vm2168_vm3, %v2150_v11  ;;  %3889 = vmatpush.msra.mxu3 %v2809_v13 }
 0x708   : > { %2879 = vmatpush.msra.mxu2 %v2809_v13 }
 0x709   : > { %v2236_v23 = vmul.f32 0.5, %v2235_v21  ;;  %v2211_v0 = vsel %vm2168_vm3, %v2166_v1, 0.0 }
 0x70a   : > { %2212 = vadd.xlane.f32.xlu2 %v2211_v0 }
 0x70b   : > { %v2237_v2 = vsub.f32 1.5, %v2236_v23  ;;  %v2183_v53 = vpop.xlane.xlu1 %2182  ;;  %v2619_v23 = vpop.f32.mrf.mxu1 }
 0x70c   : > { %v5671_v39 = vmax.f32 %v2183_v53, 1e-24 }
 0x70d   : > { %v2238_v25 = vmul.f32 %v3977_v18, %v2237_v2  ;;  %v2020_v37 = vpop.permute.xlu0 %2019 }
 0x70e   : > { %v2134_v58 = vsel %vm2118_vm1, %v2117_v50, %v2020_v37 }
 0x70f   : > { %v2242_v7 = vsel %vm2241_vm6, %v3977_v18, %v2238_v25  ;;  %v2151_v45 = vsel %vm2135_vm2, %v2134_v58, %v2084_v60  ;;  %v2471_v60 = vpop.f32.mrf.mxu0  ;;  %vm2279_vm2 = vweird.f32 %v5671_v39 }
 0x710   : > { %v2510_v55 = vmul.f32 %v2462_v49, %v2242_v7  ;;  %v2167_v35 = vmul.f32 %v2151_v45, %v2151_v45  ;;  %3835 = vmatmul.msk.f32.gmra.mxu2 %vm2168_vm3, %v2151_v45 }
 0x712   : > { %v2655_v29 = vadd.f32 %v2607_v5, %v2510_v55  ;;  %v2214_v54 = vsel %vm2168_vm3, %v2167_v35, 0.0 }
 0x713   : > { %2215 = vadd.xlane.f32.xlu0 %v2214_v54  ;;  %v2192_v2 = vpop.xlane.xlu1 %2191 }
 0x714   : > { %v2672_v56 = vadd.f32 %v5661_v12, %v2655_v29  ;;  %v5709_v58 = vmax.f32 %v2192_v2, 1e-24 }
 0x716   : > { %3978 = vtanh.f32 %v2672_v56  ;;  %v2622_v56 = vpop.f32.mrf.mxu1 }
 0x717   : > { %3980 = vrsqrt.f32 %v5666_v9 }
 0x71c   : > { %v3979_v40 = vpop.eup %3978 }
 0x71d   : > { %2738 = vmatmul.f32.vlgmr.msrb.gmra.mxu2 %v3979_v40  ;;  %v5673_v48 = vpop.eup %3980 }
 0x71e   : > { %v2264_v4 = vmul.f32 %v5673_v48, %v5666_v9  ;;  %vm2270_vm13 = vweird.f32 %v5673_v48 }
 0x71f   : > { %vm2271_vm15 = vmor %vm2269_vm14, %vm2270_vm13 }
 0x720   : > { %v2265_v52 = vmul.f32 %v5673_v48, %v2264_v4 }
 0x722   : > { %v2266_v63 = vmul.f32 0.5, %v2265_v52 }
 0x724   : > { %v2267_v33 = vsub.f32 1.5, %v2266_v63 }
 0x726   : > { %v2268_v38 = vmul.f32 %v5673_v48, %v2267_v33 }
 0x728   : > { %v2272_v7 = vsel %vm2271_vm15, %v5673_v48, %v2268_v38 }
 0x729   : > { %v2513_v29 = vmul.f32 %v2471_v60, %v2272_v7 }
 0x738   : > { %v2174_v57 = vpop.xlane.xlu0 %2173 }
 0x739   : > { %v2218_v44 = vmax.f32 %v2174_v57, 1e-24  ;;  %v2474_v57 = vpop.f32.mrf.mxu0 }
 0x73b   : > { %3982 = vrsqrt.f32 %v2218_v44  ;;  %vm2249_vm8 = vweird.f32 %v2218_v44 }
 0x73f   : > { %v2177_v51 = vpop.xlane.xlu2 %2176 }
 0x740   : > { %v2219_v28 = vmax.f32 %v2177_v51, 1e-24  ;;  %v2189_v32 = vpop.xlane.xlu0 %2188 }
 0x741   : > { %v3983_v14 = vpop.eup %3982  ;;  %v5696_v19 = vmax.f32 %v2189_v32, 1e-24 }
 0x742   : > { %v2244_v10 = vmul.f32 %v3983_v14, %v2218_v44  ;;  %3984 = vrsqrt.f32 %v2219_v28  ;;  %vm2250_vm7 = vweird.f32 %v3983_v14  ;;  %vm2259_vm11 = vweird.f32 %v2219_v28 }
 0x743   : > { %3986 = vrsqrt.f32 %v5671_v39  ;;  %vm2251_vm9 = vmor %vm2249_vm8, %vm2250_vm7  ;;  %v2658_v44 = vadd.f32 %v5679_v43, %v2513_v29  ;;  %v2477_v43 = vpop.f32.mrf.mxu0  ;;  %vm2299_vm8 = vweird.f32 %v5696_v19 }
 0x744   : > { %v2245_v15 = vmul.f32 %v3983_v14, %v2244_v10 }
 0x745   : > { %v2675_v10 = vadd.f32 %v5661_v12, %v2658_v44 }
 0x746   : > { %v2246_v36 = vmul.f32 0.5, %v2245_v15 }
 0x747   : > { %v2186_v31 = vpop.xlane.xlu2 %2185 }
 0x748   : > { %v3985_v8 = vpop.eup %3984  ;;  %v2247_v30 = vsub.f32 1.5, %v2246_v36  ;;  %v5681_v16 = vmax.f32 %v2186_v31, 1e-24  ;;  %v2198_v36 = vpop.xlane.xlu0 %2197 }
 0x749   : > { %v5683_v26 = vpop.eup %3986  ;;  %v2254_v61 = vmul.f32 %v3985_v8, %v2219_v28  ;;  %vm2260_vm10 = vweird.f32 %v3985_v8  ;;  %v2625_v31 = vpop.f32.mrf.mxu1  ;;  %v5737_v52 = vmax.f32 %v2198_v36, 1e-24 }
 0x74a   : > { %v2248_v62 = vmul.f32 %v3983_v14, %v2247_v30  ;;  %3988 = vrsqrt.f32 %v5681_v16  ;;  %v2274_v22 = vmul.f32 %v5683_v26, %v5671_v39  ;;  %vm2261_vm12 = vmor %vm2259_vm11, %vm2260_vm10  ;;  %vm2280_vm1 = vweird.f32 %v5683_v26 }
 0x74b   : > { %v2255_v47 = vmul.f32 %v3985_v8, %v2254_v61  ;;  %3990 = vrsqrt.f32 %v5696_v19  ;;  %vm2281_vm3 = vmor %vm2279_vm2, %vm2280_vm1  ;;  %vm2289_vm5 = vweird.f32 %v5681_v16  ;;  %vm2309_vm11 = vweird.f32 %v5709_v58 }
 0x74c   : > { %v2252_v34 = vsel %vm2251_vm9, %v3983_v14, %v2248_v62  ;;  %v2275_v21 = vmul.f32 %v5683_v26, %v2274_v22  ;;  %v2201_v22 = vpop.xlane.xlu1 %2200  ;;  %vm2329_vm2 = vweird.f32 %v5737_v52 }
 0x74d   : > { %v2511_v18 = vmul.f32 %v2465_v42, %v2252_v34  ;;  %v2256_v17 = vmul.f32 0.5, %v2255_v47  ;;  %v5759_v13 = vmax.f32 %v2201_v22, 1e-24 }
 0x74e   : > { %v2276_v24 = vmul.f32 0.5, %v2275_v21 }
 0x74f   : > { %v2257_v11 = vsub.f32 1.5, %v2256_v17  ;;  %v2656_v27 = vadd.f32 %v2610_v6, %v2511_v18  ;;  %v2195_v6 = vpop.xlane.xlu2 %2194  ;;  %v2807_v17 = vld [vmem:[%s6605_s4 + $0x20] sm:$0xff] }
 0x750   : > { %v5700_v1 = vpop.eup %3988  ;;  %v2277_v45 = vsub.f32 1.5, %v2276_v24  ;;  %v5724_v53 = vmax.f32 %v2195_v6, 1e-24  ;;  %2880 = vmatpush.msra.mxu2 %v2807_v17  ;;  %3890 = vmatpush.msra.mxu3 %v2807_v17  ;;  %v2207_v6 = vpop.xlane.xlu0 %2206 }
 0x751   : > { %v2258_v3 = vmul.f32 %v3985_v8, %v2257_v11  ;;  %v2284_v25 = vmul.f32 %v5700_v1, %v5681_v16  ;;  %v2673_v37 = vadd.f32 %v5661_v12, %v2656_v27  ;;  %v5714_v35 = vpop.eup %3990  ;;  %vm2290_vm4 = vweird.f32 %v5700_v1  ;;  %v2628_v21 = vpop.f32.mrf.mxu1 }
 0x752   : > { %v2278_v54 = vmul.f32 %v5683_v26, %v2277_v45  ;;  %v2294_v40 = vmul.f32 %v5714_v35, %v5696_v19  ;;  %vm2291_vm6 = vmor %vm2289_vm5, %vm2290_vm4  ;;  %vm2300_vm7 = vweird.f32 %v5714_v35  ;;  %vm2319_vm14 = vweird.f32 %v5724_v53 }
 0x753   : > { %v2262_v0 = vsel %vm2261_vm12, %v3985_v8, %v2258_v3  ;;  %3992 = vtanh.f32 %v2673_v37  ;;  %v2285_v55 = vmul.f32 %v5700_v1, %v2284_v25  ;;  %vm2301_vm9 = vmor %vm2299_vm8, %vm2300_vm7  ;;  %v5787_v44 = vmax.f32 %v2207_v6, 1e-24 }
 0x754   : > { %v2512_v50 = vmul.f32 %v2468_v41, %v2262_v0  ;;  %3994 = vrsqrt.f32 %v5709_v58  ;;  %v2295_v51 = vmul.f32 %v5714_v35, %v2294_v40  ;;  %v5755_v41 = vld [vmem:[%s6605_s4 + $0x28] sm:$0xff]  ;;  %v5782_v40 = vpop.f32.mrf.mxu2  ;;  %vm2339_vm5 = vweird.f32 %v5759_v13 }
 0x755   : > { %v2286_v59 = vmul.f32 0.5, %v2285_v55  ;;  %2945 = vmatpush.msrb.mxu1 %v5755_v41 }
 0x756   : > { %v2657_v49 = vadd.f32 %v5669_v46, %v2512_v50  ;;  %v2282_v46 = vsel %vm2281_vm3, %v5683_v26, %v2278_v54  ;;  %v2296_v15 = vmul.f32 0.5, %v2295_v51 }
 0x757   : > { %v2287_v48 = vsub.f32 1.5, %v2286_v59  ;;  %v2514_v4 = vmul.f32 %v2474_v57, %v2282_v46  ;;  %v2204_v50 = vpop.xlane.xlu2 %2203 }
 0x758   : > { %v2674_v5 = vadd.f32 %v5661_v12, %v2657_v49  ;;  %v2297_v26 = vsub.f32 1.5, %v2296_v15  ;;  %v5772_v37 = vmax.f32 %v2204_v50, 1e-24  ;;  %v2210_v15 = vpop.xlane.xlu1 %2209 }
 0x759   : > { %v3993_v9 = vpop.eup %3992  ;;  %v2288_v42 = vmul.f32 %v5700_v1, %v2287_v48  ;;  %v2659_v8 = vadd.f32 %v2619_v23, %v2514_v4  ;;  %v2480_v23 = vpop.f32.mrf.mxu0 }
 0x75a   : > { %3996 = vtanh.f32 %v2674_v5  ;;  %2741 = vmatmul.f32.gmra.mxu2 %v3993_v9  ;;  %v5728_v28 = vpop.eup %3994  ;;  %v2298_v34 = vmul.f32 %v5714_v35, %v2297_v26  ;;  %v2631_v5 = vpop.f32.mrf.mxu1  ;;  %v5813_v26 = vld [vmem:[%s6605_s4 + $0x8] sm:$0xff]  ;;  %vm2349_vm8 = vweird.f32 %v5772_v37 }
 0x75b   : > { %3998 = vrsqrt.f32 %v5724_v53  ;;  %v2304_v39 = vmul.f32 %v5728_v28, %v5709_v58  ;;  %v2292_v61 = vsel %vm2291_vm6, %v5700_v1, %v2288_v42  ;;  %v2676_v47 = vadd.f32 %v5661_v12, %v2659_v8 }
 0x75c   : > { %4000 = vtanh.f32 %v2675_v10  ;;  %v2515_v63 = vmul.f32 %v2477_v43, %v2292_v61  ;;  %v2302_v1 = vsel %vm2301_vm9, %v5714_v35, %v2298_v34  ;;  %vm2310_vm10 = vweird.f32 %v5728_v28  ;;  %v5800_v8 = vpop.f32.mrf.mxu2  ;;  %v2805_v43 = vld [vmem:[%s6605_s4 + $0x10] sm:$0xff] }
 0x75d   : > { %v2305_v30 = vmul.f32 %v5728_v28, %v2304_v39  ;;  %4002 = vrsqrt.f32 %v5737_v52  ;;  %v2516_v19 = vmul.f32 %v2480_v23, %v2302_v1  ;;  %vm2311_vm12 = vmor %vm2309_vm11, %vm2310_vm10  ;;  %v5815_v61 = vmax.f32 %v2210_v15, 1e-24  ;;  %2881 = vmatpush.msra.mxu2 %v2805_v43  ;;  %3891 = vmatpush.msra.mxu3 %v2805_v43 }
 0x75e   : > { %4004 = vtanh.f32 %v2676_v47  ;;  %v2660_v11 = vadd.f32 %v2622_v56, %v2515_v63  ;;  %vm2359_vm11 = vweird.f32 %v5787_v44 }
 0x75f   : > { %v2306_v16 = vmul.f32 0.5, %v2305_v30  ;;  %4006 = vrsqrt.f32 %v5759_v13  ;;  %v2661_v60 = vadd.f32 %v2625_v31, %v2516_v19  ;;  %v5808_v30 = vld [vmem:[%s6605_s4 + $0x18] sm:$0xff] }
 0x760   : > { %v3997_v14 = vpop.eup %3996  ;;  %v2677_v0 = vadd.f32 %v5661_v12, %v2660_v11  ;;  %2946 = vmatpush.msrb.mxu1 %v5808_v30 }
 0x761   : > { %v5741_v62 = vpop.eup %3998  ;;  %v2307_v33 = vsub.f32 1.5, %v2306_v16  ;;  %v2483_v35 = vpop.f32.mrf.mxu0  ;;  %v2678_v58 = vadd.f32 %v5661_v12, %v2661_v60 }
 0x762   : > { %2744 = vmatmul.f32.gmra.mxu2 %v3997_v14  ;;  %v2314_v32 = vmul.f32 %v5741_v62, %v5724_v53  ;;  %v4001_v18 = vpop.eup %4000  ;;  %4008 = vtanh.f32 %v2677_v0  ;;  %vm2320_vm13 = vweird.f32 %v5741_v62  ;;  %v2634_v39 = vpop.f32.mrf.mxu1  ;;  %2947 = vmatpush.msrb.mxu1 %v5813_v26 }
 0x763   : > { %v5763_v27 = vpop.eup %4002  ;;  %v2308_v38 = vmul.f32 %v5728_v28, %v2307_v33  ;;  %4010 = vrsqrt.f32 %v5772_v37  ;;  %vm2321_vm15 = vmor %vm2319_vm14, %vm2320_vm13  ;;  %vm2369_vm14 = vweird.f32 %v5815_v61 }
 0x764   : > { %v2315_v3 = vmul.f32 %v5741_v62, %v2314_v32  ;;  %v2324_v24 = vmul.f32 %v5763_v27, %v5737_v52  ;;  %v4005_v25 = vpop.eup %4004  ;;  %4012 = vtanh.f32 %v2678_v58  ;;  %vm2330_vm1 = vweird.f32 %v5763_v27 }
 0x765   : > { %v2312_v49 = vsel %vm2311_vm12, %v5728_v28, %v2308_v38  ;;  %v5776_v55 = vpop.eup %4006  ;;  %4014 = vrsqrt.f32 %v5787_v44  ;;  %vm2331_vm3 = vmor %vm2329_vm2, %vm2330_vm1  ;;  %vm2818_vm1 = vcmask 261120  }
 0x766   : > { %v2316_v2 = vmul.f32 0.5, %v2315_v3  ;;  %v2325_v7 = vmul.f32 %v5763_v27, %v2324_v24  ;;  %v2517_v29 = vmul.f32 %v2483_v35, %v2312_v49  ;;  %v2334_v54 = vmul.f32 %v5776_v55, %v5759_v13 }
 0x767   : > { %vm2340_vm4 = vweird.f32 %v5776_v55 }
 0x768   : > { %v2317_v45 = vsub.f32 1.5, %v2316_v2  ;;  %v2326_v56 = vmul.f32 0.5, %v2325_v7  ;;  %v4009_v9 = vpop.eup %4008  ;;  %v2662_v57 = vadd.f32 %v2628_v21, %v2517_v29  ;;  %v2335_v46 = vmul.f32 %v5776_v55, %v2334_v54  ;;  %vm2341_vm6 = vmor %vm2339_vm5, %vm2340_vm4 }
 0x769   : > { %v5791_v28 = vpop.eup %4010  ;;  %v2486_v14 = vpop.f32.mrf.mxu0 }
 0x76a   : > { %2747 = vmatmul.f32.gmra.mxu2 %v4001_v18  ;;  %v2318_v59 = vmul.f32 %v5741_v62, %v2317_v45  ;;  %v2327_v51 = vsub.f32 1.5, %v2326_v56  ;;  %v2679_v10 = vadd.f32 %v5661_v12, %v2662_v57  ;;  %v2336_v53 = vmul.f32 0.5, %v2335_v46  ;;  %v4013_v31 = vpop.eup %4012  ;;  %v2637_v1 = vpop.f32.mrf.mxu1 }
 0x76b   : > { %v2344_v36 = vmul.f32 %v5791_v28, %v5772_v37  ;;  %v5820_v16 = vpop.eup %4014  ;;  %vm2350_vm7 = vweird.f32 %v5791_v28 }
 0x76c   : > { %v2322_v48 = vsel %vm2321_vm15, %v5741_v62, %v2318_v59  ;;  %v2328_v42 = vmul.f32 %v5763_v27, %v2327_v51  ;;  %4016 = vtanh.f32 %v2679_v10  ;;  %v2337_v62 = vsub.f32 1.5, %v2336_v53  ;;  %vm2351_vm9 = vmor %vm2349_vm8, %vm2350_vm7 }
 0x76d   : > { %v2518_v4 = vmul.f32 %v2486_v14, %v2322_v48  ;;  %v2345_v63 = vmul.f32 %v5791_v28, %v2344_v36  ;;  %4018 = vrsqrt.f32 %v5815_v61  ;;  %v2354_v17 = vmul.f32 %v5820_v16, %v5787_v44 }
 0x76e   : > { %v2332_v47 = vsel %vm2331_vm3, %v5763_v27, %v2328_v42  ;;  %v2338_v18 = vmul.f32 %v5776_v55, %v2337_v62  ;;  %vm2360_vm10 = vweird.f32 %v5820_v16  ;;  %vm3642_vm8 = vcmask 15360  }
 0x76f   : > { %v2663_v52 = vadd.f32 %v2631_v5, %v2518_v4  ;;  %v2346_v11 = vmul.f32 0.5, %v2345_v63  ;;  %v2355_v0 = vmul.f32 %v5820_v16, %v2354_v17  ;;  %vm2361_vm12 = vmor %vm2359_vm11, %vm2360_vm10  ;;  %v2803_v63 = vld [vmem:[%s6605_s4] sm:$0xff]  ;;  %vm3724_vm10 = vcmask 285696  }
 0x770   : > { %v2342_v19 = vsel %vm2341_vm6, %v5776_v55, %v2338_v18  ;;  %2882 = vmatpush.msra.mxu2 %v2803_v63  ;;  %3892 = vmatpush.msra.mxu3 %v2803_v63  ;;  %v3038_v63 = vld [vmem:[%s6606_s5 + $0x48] sm:$0xff] }
 0x771   : > { %v2489_v22 = vpop.f32.mrf.mxu0  ;;  %v2680_v32 = vadd.f32 %v5661_v12, %v2663_v52  ;;  %v2347_v38 = vsub.f32 1.5, %v2346_v11  ;;  %v2356_v60 = vmul.f32 0.5, %v2355_v0 }
 0x772   : > { %2750 = vmatmul.f32.gmra.mxu2 %v4005_v25  ;;  %v2519_v34 = vmul.f32 %v2489_v22, %v2332_v47  ;;  %v4017_v21 = vpop.eup %4016  ;;  %v2640_v55 = vpop.f32.mrf.mxu1 }
 0x773   : > { %4020 = vtanh.f32 %v2680_v32  ;;  %v5836_v24 = vpop.eup %4018  ;;  %v2348_v49 = vmul.f32 %v5791_v28, %v2347_v38  ;;  %v2357_v58 = vsub.f32 1.5, %v2356_v60  ;;  %3893 = vmatpush.msrb.mxu2 %v5694_v20 }
 0x774   : > { %v2664_v23 = vadd.f32 %v2634_v39, %v2519_v34  ;;  %v2364_v25 = vmul.f32 %v5836_v24, %v5815_v61  ;;  %vm2370_vm13 = vweird.f32 %v5836_v24 }
 0x775   : > { %v2352_v54 = vsel %vm2351_vm9, %v5791_v28, %v2348_v49  ;;  %v2358_v46 = vmul.f32 %v5820_v16, %v2357_v58  ;;  %v5862_v28 = vld [vmem:[%s6604_s3 + $0x80] ss:$0 sm:$0xff]  ;;  %vm2371_vm15 = vmor %vm2369_vm14, %vm2370_vm13  ;;  %3894 = vmatpush.msrb.mxu2 %v5755_v41  ;;  %vm3707_vm9 = vcmask 23552  }
 0x776   : > { %v2681_v13 = vadd.f32 %v5661_v12, %v2664_v23  ;;  %v2365_v29 = vmul.f32 %v5836_v24, %v2364_v25 }
 0x777   : > { %v2362_v4 = vsel %vm2361_vm12, %v5820_v16, %v2358_v46  ;;  %3895 = vmatpush.msrb.mxu2 %v5808_v30  ;;  %v3042_v46 = vld [vmem:[%s6606_s5 + $0x68] sm:$0xff] }
 0x778   : > { %v2366_v37 = vmul.f32 0.5, %v2365_v29 }
 0x779   : > { %v2492_v2 = vpop.f32.mrf.mxu0  ;;  %v4021_v45 = vpop.eup %4020  ;;  %3896 = vmatpush.msrb.mxu2 %v5813_v26 }
 0x77a   : > { %2753 = vmatmul.f32.gmra.mxu2 %v4009_v9  ;;  %v2520_v50 = vmul.f32 %v2492_v2, %v2342_v19  ;;  %v2367_v10 = vsub.f32 1.5, %v2366_v37  ;;  %v2643_v53 = vpop.f32.mrf.mxu1  ;;  %v3058_v37 = vld [vmem:[%s6606_s5 + $0xe8] sm:$0xff] }
 0x77c   : > { %v2665_v35 = vadd.f32 %v2637_v1, %v2520_v50  ;;  %v2368_v44 = vmul.f32 %v5836_v24, %v2367_v10  ;;  %v3057_v10 = vld [vmem:[%s6606_s5 + $0xe0] sm:$0xff] }
 0x77d   : > { %v2213_v33 = vpop.xlane.xlu2 %2212 }
 0x77e   : > { %v5832_v27 = vmax.f32 %v2213_v33, 1e-24  ;;  %v2682_v9 = vadd.f32 %v5661_v12, %v2665_v35  ;;  %v2372_v16 = vsel %vm2371_vm15, %v5836_v24, %v2368_v44 }
 0x77f   : > { %v2523_v61 = vmul.f32 %v5800_v8, %v2372_v16 }
 0x780   : > { %4022 = vrsqrt.f32 %v5832_v27  ;;  %vm2379_vm3 = vweird.f32 %v5832_v27 }
 0x781   : > { %4024 = vtanh.f32 %v2681_v13  ;;  %v2495_v6 = vpop.f32.mrf.mxu0 }
 0x782   : > { %2756 = vmatmul.f32.gmra.mxu2 %v4013_v31  ;;  %v2521_v57 = vmul.f32 %v2495_v6, %v2352_v54  ;;  %v2522_v31 = vmul.f32 %v5782_v40, %v2362_v4  ;;  %v2646_v18 = vpop.f32.mrf.mxu1  ;;  %v3044_v54 = vld [vmem:[%s6606_s5 + $0x78] sm:$0xff]  ;;  %v3041_v4 = vld [vmem:[%s6606_s5 + $0x60] sm:$0xff] }
 0x783   : > { %v2668_v20 = vadd.f32 %v2646_v18, %v2523_v61  ;;  %3063 = vmatpush.msrb.mxu0 %v3044_v54  ;;  %v3052_v18 = vld [vmem:[%s6606_s5 + $0xb8] sm:$0xff] }
 0x784   : > { %v2666_v14 = vadd.f32 %v2640_v55, %v2521_v57  ;;  %v2667_v40 = vadd.f32 %v2643_v53, %v2522_v31  ;;  %v3043_v57 = vld [vmem:[%s6606_s5 + $0x70] sm:$0xff]  ;;  %v3056_v53 = vld [vmem:[%s6606_s5 + $0xd8] sm:$0xff] }
 0x785   : > { %v2685_v23 = vadd.f32 %v5661_v12, %v2668_v20  ;;  %3064 = vmatpush.msrb.mxu0 %v3043_v57  ;;  %v3055_v31 = vld [vmem:[%s6606_s5 + $0xd0] sm:$0xff] }
 0x786   : > { %v2216_v7 = vpop.xlane.xlu0 %2215  ;;  %v5851_v59 = vpop.eup %4022  ;;  %v2683_v43 = vadd.f32 %v5661_v12, %v2666_v14  ;;  %v2684_v17 = vadd.f32 %v5661_v12, %v2667_v40 }
 0x787   : > { %v5845_v5 = vmax.f32 %v2216_v7, 1e-24  ;;  %v2374_v51 = vmul.f32 %v5851_v59, %v5832_v27  ;;  %v4025_v48 = vpop.eup %4024  ;;  %vm2380_vm2 = vweird.f32 %v5851_v59  ;;  %3065 = vmatpush.msrb.mxu0 %v3042_v46 }
 0x788   : > { %vm2381_vm4 = vmor %vm2379_vm3, %vm2380_vm2 }
 0x789   : > { %4026 = vrsqrt.f32 %v5845_v5  ;;  %v2375_v39 = vmul.f32 %v5851_v59, %v2374_v51  ;;  %vm2389_vm6 = vweird.f32 %v5845_v5  ;;  %3066 = vmatpush.msrb.mxu0 %v3041_v4 }
 0x78a   : > { %v5830_v3 = vpop.f32.mrf.mxu2  ;;  %2759 = vmatmul.f32.gmra.mxu2 %v4017_v21  ;;  %4028 = vtanh.f32 %v2682_v9  ;;  %v2649_v1 = vpop.f32.mrf.mxu1 }
 0x78b   : > { %v2376_v52 = vmul.f32 0.5, %v2375_v39 }
 0x78d   : > { %v2377_v22 = vsub.f32 1.5, %v2376_v52 }
 0x78f   : > { %v4027_v42 = vpop.eup %4026  ;;  %v2378_v33 = vmul.f32 %v5851_v59, %v2377_v22 }
 0x790   : > { %v2384_v62 = vmul.f32 %v4027_v42, %v5845_v5  ;;  %v4029_v47 = vpop.eup %4028  ;;  %vm2390_vm5 = vweird.f32 %v4027_v42 }
 0x791   : > { %v2382_v41 = vsel %vm2381_vm4, %v5851_v59, %v2378_v33  ;;  %vm2391_vm7 = vmor %vm2389_vm6, %vm2390_vm5  ;;  %v3036_v33 = vld [vmem:[%s6606_s5 + $0x38] sm:$0xff] }
 0x792   : > { %2762 = vmatmul.f32.gmra.mxu2 %v4021_v45  ;;  %v2385_v34 = vmul.f32 %v4027_v42, %v2384_v62  ;;  %v2524_v19 = vmul.f32 %v5830_v3, %v2382_v41  ;;  %v2652_v2 = vpop.f32.mrf.mxu1  ;;  %v3039_v62 = vld [vmem:[%s6606_s5 + $0x50] sm:$0xff] }
 0x793   : > { %v5849_v56 = vpop.f32.mrf.mxu2 }
 0x794   : > { %v2386_v11 = vmul.f32 0.5, %v2385_v34  ;;  %v2669_v27 = vadd.f32 %v2649_v1, %v2524_v19  ;;  %v3053_v34 = vld [vmem:[%s6606_s5 + $0xc0] sm:$0xff]  ;;  %v3035_v1 = vld [vmem:[%s6606_s5 + $0x30] sm:$0xff]  ;;  %v3034_v19 = vld [vmem:[%s6606_s5 + $0x28] sm:$0xff] }
 0x796   : > { %v2387_v8 = vsub.f32 1.5, %v2386_v11  ;;  %v2686_v24 = vadd.f32 %v5661_v12, %v2669_v27 }
 0x798   : > { %v2388_v0 = vmul.f32 %v4027_v42, %v2387_v8 }
 0x79a   : > { %2765 = vmatmul.f32.gmra.mxu2 %v4025_v48  ;;  %v2392_v38 = vsel %vm2391_vm7, %v4027_v42, %v2388_v0 }
 0x79b   : > { %v2525_v26 = vmul.f32 %v5849_v56, %v2392_v38  ;;  %v3059_v56 = vld [vmem:[%s6606_s5 + $0xf0] sm:$0xff]  ;;  %v3049_v38 = vld [vmem:[%s6606_s5 + $0xa0] sm:$0xff] }
 0x79d   : > { %v2670_v13 = vadd.f32 %v2652_v2, %v2525_v26  ;;  %v3033_v26 = vld [vmem:[%s6606_s5 + $0x20] sm:$0xff] }
 0x79f   : > { %v2687_v3 = vadd.f32 %v5661_v12, %v2670_v13  ;;  %v3060_v12 = vld [vmem:[%s6606_s5 + $0xf8] sm:$0xff] }
 0x7a0   : > { %v2739_v15 = vpop.f32.mrf.mxu2  ;;  %3128 = vmatpush.msrb.mxu3 %v3060_v12 }
 0x7a1   : > { %v2740_v36 = vadd.f32 %v5862_v28, %v2739_v15 }
 0x7a2   : > { %2768 = vmatmul.f32.gmra.mxu2 %v4029_v47  ;;  %3129 = vmatpush.msrb.mxu3 %v3059_v56  ;;  %v3054_v47 = vld [vmem:[%s6606_s5 + $0xc8] sm:$0xff] }
 0x7a3   : > { %4030 = vtanh.f32 %v2740_v36  ;;  %v3040_v36 = vld [vmem:[%s6606_s5 + $0x58] sm:$0xff]  ;;  %v3852_v56 = vld [vmem:[%s6605_s4 + $0x40] ss:$8 sm:$0x3] }
 0x7a4   : > { %4032 = vtanh.f32 %v2683_v43  ;;  %3130 = vmatpush.msrb.mxu3 %v3058_v37  ;;  %3067 = vmatpush.msrb.mxu0 %v3040_v36  ;;  %v6036_v57 = vperm.slane %v3852_v56, 1  ;;  %v6040_v46 = vperm.slane %v3852_v56, 0 }
 0x7a5   : > { %4034 = vtanh.f32 %v2684_v17 }
 0x7a6   : > { %4036 = vtanh.f32 %v2685_v23  ;;  %3131 = vmatpush.msrb.mxu3 %v3057_v10  ;;  %3068 = vmatpush.msrb.mxu0 %v3039_v62  ;;  %v3050_v23 = vld [vmem:[%s6606_s5 + $0xa8] sm:$0xff] }
 0x7a7   : > { %4038 = vtanh.f32 %v2686_v24  ;;  %v3048_v24 = vld [vmem:[%s6606_s5 + $0x98] sm:$0xff] }
 0x7a8   : > { %4040 = vtanh.f32 %v2687_v3  ;;  %3132 = vmatpush.msrb.mxu3 %v3056_v53  ;;  %3069 = vmatpush.msrb.mxu0 %v3038_v63  ;;  %v3032_v3 = vld [vmem:[%s6606_s5 + $0x18] sm:$0xff] }
 0x7a9   : > { %v4031_v32 = vpop.eup %4030 }
 0x7aa   : > { %3869 = vmatmul.msk.f32.vlgmr.msrb.gmra.mxu1 %vm2818_vm1, %v4031_v32  ;;  %v4033_v21 = vpop.eup %4032  ;;  %3133 = vmatpush.msrb.mxu3 %v3055_v31 }
 0x7ab   : > { %2771 = vmatmul.f32.gmra.mxu2 %v4033_v21  ;;  %v4035_v30 = vpop.eup %4034  ;;  %v3051_v21 = vld [vmem:[%s6606_s5 + $0xb0] sm:$0xff] }
 0x7ac   : > { %v4037_v50 = vpop.eup %4036  ;;  %3134 = vmatpush.msrb.mxu3 %v3054_v47 }
 0x7ad   : > { %v4039_v25 = vpop.eup %4038 }
 0x7ae   : > { %v4041_v60 = vpop.eup %4040  ;;  %3135 = vmatpush.msrb.mxu3 %v3053_v34 }
 0x7b0   : > { %3136 = vmatpush.msrb.mxu3 %v3052_v18 }
 0x7b2   : > { %3137 = vmatpush.msrb.mxu3 %v3051_v21 }
 0x7b3   : > { %2774 = vmatmul.f32.gmra.mxu2 %v4035_v30 }
 0x7b4   : > { %3138 = vmatpush.msrb.mxu3 %v3050_v23 }
 0x7b6   : > { %3139 = vmatpush.msrb.mxu3 %v3049_v38 }
 0x7b8   : > { %3140 = vmatpush.msrb.mxu3 %v3048_v24 }
 0x7bb   : > { %2777 = vmatmul.f32.gmra.mxu2 %v4037_v50 }
 0x7c3   : > { %2780 = vmatmul.f32.gmra.mxu2 %v4039_v25  ;;  %v3031_v25 = vld [vmem:[%s6606_s5 + $0x10] sm:$0xff] }
 0x7cb   : > { %2783 = vmatmul.f32.gmra.mxu2 %v4041_v60  ;;  %v3047_v60 = vld [vmem:[%s6606_s5 + $0x90] sm:$0xff] }
 0x7cc   : > { %3141 = vmatpush.msrb.mxu3 %v3047_v60 }
 0x7d3   : > { %3853 = vmatmul.msk.f32.vlgmr.msra.gmra.mxu2 %vm2818_vm1, %v4031_v32  ;;  %v3037_v32 = vld [vmem:[%s6606_s5 + $0x40] sm:$0xff] }
 0x7d4   : > { %3070 = vmatpush.msrb.mxu0 %v3037_v32 }
 0x7d6   : > { %3071 = vmatpush.msrb.mxu0 %v3036_v33 }
 0x7d8   : > { %3072 = vmatpush.msrb.mxu0 %v3035_v1 }
 0x7da   : > { %3073 = vmatpush.msrb.mxu0 %v3034_v19 }
 0x7dc   : > { %3074 = vmatpush.msrb.mxu0 %v3033_v26 }
 0x7dd   : > { %v2742_v49 = vpop.f32.mrf.mxu2 }
 0x7de   : > { %v2743_v7 = vadd.f32 %v5862_v28, %v2742_v49  ;;  %3075 = vmatpush.msrb.mxu0 %v3032_v3  ;;  %v3030_v49 = vld [vmem:[%s6606_s5 + $0x8] sm:$0xff] }
 0x7e0   : > { %4042 = vtanh.f32 %v2743_v7  ;;  %v3046_v7 = vld [vmem:[%s6606_s5 + $0x88] sm:$0xff]  ;;  %3076 = vmatpush.msrb.mxu0 %v3031_v25 }
 0x7e1   : > { %3142 = vmatpush.msrb.mxu3 %v3046_v7 }
 0x7e2   : > { %3077 = vmatpush.msrb.mxu0 %v3030_v49 }
 0x7e5   : > { %v2745_v45 = vpop.f32.mrf.mxu2 }
 0x7e6   : > { %v4043_v55 = vpop.eup %4042  ;;  %v2746_v35 = vadd.f32 %v5862_v28, %v2745_v45  ;;  %v3045_v45 = vld [vmem:[%s6606_s5 + $0x80] sm:$0xff] }
 0x7e7   : > { %3854 = vmatmul.msk.f32.gmra.mxu2 %vm2818_vm1, %v4043_v55  ;;  %3870 = vmatmul.msk.f32.gmra.mxu1 %vm2818_vm1, %v4043_v55  ;;  %v3029_v55 = vld [vmem:[%s6606_s5] sm:$0xff] }
 0x7e8   : > { %4044 = vtanh.f32 %v2746_v35  ;;  %3143 = vmatpush.msrb.mxu3 %v3045_v45  ;;  %3078 = vmatpush.msrb.mxu0 %v3029_v55 }
 0x7ed   : > { %v2748_v5 = vpop.f32.mrf.mxu2 }
 0x7ee   : > { %v4045_v29 = vpop.eup %4044  ;;  %v2749_v58 = vadd.f32 %v5862_v28, %v2748_v5 }
 0x7ef   : > { %3855 = vmatmul.msk.f32.gmra.mxu2 %vm2818_vm1, %v4045_v29  ;;  %3871 = vmatmul.msk.f32.gmra.mxu1 %vm2818_vm1, %v4045_v29 }
 0x7f0   : > { %4046 = vtanh.f32 %v2749_v58 }
 0x7f5   : > { %v2751_v59 = vpop.f32.mrf.mxu2 }
 0x7f6   : > { %v4047_v6 = vpop.eup %4046  ;;  %v2752_v9 = vadd.f32 %v5862_v28, %v2751_v59 }
 0x7f7   : > { %3856 = vmatmul.msk.f32.gmra.mxu2 %vm2818_vm1, %v4047_v6  ;;  %3872 = vmatmul.msk.f32.gmra.mxu1 %vm2818_vm1, %v4047_v6 }
 0x7f8   : > { %4048 = vtanh.f32 %v2752_v9 }
 0x7fd   : > { %v2754_v51 = vpop.f32.mrf.mxu2 }
 0x7fe   : > { %v4049_v48 = vpop.eup %4048  ;;  %v2755_v14 = vadd.f32 %v5862_v28, %v2754_v51 }
 0x7ff   : > { %3857 = vmatmul.msk.f32.vlgmr.msra.gmra.mxu3 %vm2818_vm1, %v4049_v48  ;;  %3873 = vmatmul.msk.f32.gmra.mxu1 %vm2818_vm1, %v4049_v48 }
 0x800   : > { %4050 = vtanh.f32 %v2755_v14 }
 0x805   : > { %v2757_v39 = vpop.f32.mrf.mxu2 }
 0x806   : > { %v4051_v15 = vpop.eup %4050  ;;  %v2758_v42 = vadd.f32 %v5862_v28, %v2757_v39 }
 0x807   : > { %3858 = vmatmul.msk.f32.gmra.mxu3 %vm2818_vm1, %v4051_v15  ;;  %3874 = vmatmul.msk.f32.gmra.mxu1 %vm2818_vm1, %v4051_v15 }
 0x808   : > { %4052 = vtanh.f32 %v2758_v42 }
 0x80d   : > { %v2760_v43 = vpop.f32.mrf.mxu2 }
 0x80e   : > { %v4053_v44 = vpop.eup %4052  ;;  %v2761_v52 = vadd.f32 %v5862_v28, %v2760_v43 }
 0x80f   : > { %3859 = vmatmul.msk.f32.gmra.mxu3 %vm2818_vm1, %v4053_v44  ;;  %3875 = vmatmul.msk.f32.gmra.mxu1 %vm2818_vm1, %v4053_v44 }
 0x810   : > { %4054 = vtanh.f32 %v2761_v52 }
 0x815   : > { %v2763_v40 = vpop.f32.mrf.mxu2 }
 0x816   : > { %v4055_v16 = vpop.eup %4054  ;;  %v2764_v22 = vadd.f32 %v5862_v28, %v2763_v40 }
 0x817   : > { %3860 = vmatmul.msk.f32.gmra.mxu3 %vm2818_vm1, %v4055_v16  ;;  %3876 = vmatmul.msk.f32.gmra.mxu1 %vm2818_vm1, %v4055_v16 }
 0x818   : > { %4056 = vtanh.f32 %v2764_v22 }
 0x81d   : > { %v2766_v61 = vpop.f32.mrf.mxu2 }
 0x81e   : > { %v4057_v17 = vpop.eup %4056  ;;  %v2767_v11 = vadd.f32 %v5862_v28, %v2766_v61 }
 0x81f   : > { %3861 = vmatmul.msk.f32.gmra.mxu3 %vm2818_vm1, %v4057_v17  ;;  %3877 = vmatmul.msk.f32.gmra.mxu1 %vm2818_vm1, %v4057_v17 }
 0x820   : > { %4058 = vtanh.f32 %v2767_v11 }
 0x825   : > { %v2769_v20 = vpop.f32.mrf.mxu2 }
 0x826   : > { %v4059_v41 = vpop.eup %4058  ;;  %v2770_v8 = vadd.f32 %v5862_v28, %v2769_v20 }
 0x827   : > { %3862 = vmatmul.msk.f32.gmra.mxu3 %vm2818_vm1, %v4059_v41  ;;  %3878 = vmatmul.msk.f32.gmra.mxu1 %vm2818_vm1, %v4059_v41  ;;  %v2949_v37 = vpop.f32.mrf.mxu1 }
 0x828   : > { %4060 = vtanh.f32 %v2770_v8  ;;  %v2950_v51 = vadd.f32 %v2949_v37, %v6036_v57 }
 0x82e   : > { %v2772_v0 = vpop.f32.mrf.mxu2  ;;  %v4061_v30 = vpop.eup %4060 }
 0x82f   : > { %v2773_v27 = vadd.f32 %v5862_v28, %v2772_v0  ;;  %3863 = vmatmul.msk.f32.gmra.mxu3 %vm2818_vm1, %v4061_v30  ;;  %3879 = vmatmul.msk.f32.gmra.mxu1 %vm2818_vm1, %v4061_v30 }
 0x831   : > { %4062 = vtanh.f32 %v2773_v27 }
 0x836   : > { %v2775_v2 = vpop.f32.mrf.mxu2 }
 0x837   : > { %v4063_v50 = vpop.eup %4062  ;;  %v2776_v13 = vadd.f32 %v5862_v28, %v2775_v2 }
 0x838   : > { %3864 = vmatmul.msk.f32.gmra.mxu3 %vm2818_vm1, %v4063_v50  ;;  %3880 = vmatmul.msk.f32.gmra.mxu1 %vm2818_vm1, %v4063_v50 }
 0x839   : > { %4064 = vtanh.f32 %v2776_v13 }
 0x83e   : > { %v2778_v35 = vpop.f32.mrf.mxu2 }
 0x83f   : > { %v4065_v12 = vpop.eup %4064  ;;  %v2779_v5 = vadd.f32 %v5862_v28, %v2778_v35 }
 0x840   : > { %3865 = vmatmul.msk.f32.gmra.mxu3 %vm2818_vm1, %v4065_v12  ;;  %3881 = vmatmul.msk.f32.gmra.mxu1 %vm2818_vm1, %v4065_v12 }
 0x841   : > { %4066 = vtanh.f32 %v2779_v5 }
 0x846   : > { %v2781_v29 = vpop.f32.mrf.mxu2 }
 0x847   : > { %v4067_v58 = vpop.eup %4066  ;;  %v2782_v54 = vadd.f32 %v5862_v28, %v2781_v29 }
 0x848   : > { %3866 = vmatmul.msk.f32.gmra.mxu3 %vm2818_vm1, %v4067_v58  ;;  %3882 = vmatmul.msk.f32.vlgmr.msrb.gmra.mxu2 %vm2818_vm1, %v4067_v58 }
 0x849   : > { %4068 = vtanh.f32 %v2782_v54 }
 0x84e   : > { %v2784_v59 = vpop.f32.mrf.mxu2 }
 0x84f   : > { %v4069_v6 = vpop.eup %4068  ;;  %v2785_v9 = vadd.f32 %v5862_v28, %v2784_v59 }
 0x850   : > { %3867 = vmatmul.msk.f32.gmra.mxu3 %vm2818_vm1, %v4069_v6  ;;  %3883 = vmatmul.msk.f32.gmra.mxu2 %vm2818_vm1, %v4069_v6 }
 0x851   : > { %4070 = vtanh.f32 %v2785_v9 }
 0x852   : > { %4072 = vtanh.f32 %v2950_v51 }
 0x856   : > { %v2884_v48 = vpop.f32.mrf.mxu2 }
 0x857   : > { %v4071_v14 = vpop.eup %4070  ;;  %v2885_v10 = vadd.f32 %v2884_v48, %v6040_v46 }
 0x858   : > { %3868 = vmatmul.msk.f32.gmra.mxu3 %vm2818_vm1, %v4071_v14  ;;  %3884 = vmatmul.msk.f32.gmra.mxu2 %vm2818_vm1, %v4071_v14  ;;  %v4073_v28 = vpop.eup %4072 }
 0x859   : > { %4074 = vtanh.f32 %v2885_v10 }
 0x85f   : > { %v4075_v4 = vpop.eup %4074 }
 0x860   : > { %3079 = vmatmul.f32.vlgmr.msrb.gmra.mxu0 %v4075_v4  ;;  %3144 = vmatmul.f32.vlgmr.msrb.gmra.mxu3 %v4073_v28 }
 0x864   : > { %v2952_v53 = vpop.f32.mrf.mxu1 }
 0x865   : > { %v2953_v39 = vadd.f32 %v2952_v53, %v6036_v57 }
 0x867   : > { %4076 = vtanh.f32 %v2953_v39 }
 0x86a   : > { %v2887_v15 = vpop.f32.mrf.mxu2 }
 0x86b   : > { %v2888_v42 = vadd.f32 %v2887_v15, %v6040_v46 }
 0x86c   : > { %v2955_v36 = vpop.f32.mrf.mxu1 }
 0x86d   : > { %v4077_v31 = vpop.eup %4076  ;;  %4078 = vtanh.f32 %v2888_v42  ;;  %v2956_v43 = vadd.f32 %v2955_v36, %v6036_v57 }
 0x86e   : > { %3147 = vmatmul.f32.gmra.mxu3 %v4077_v31 }
 0x86f   : > { %4080 = vtanh.f32 %v2956_v43 }
 0x872   : > { %v2890_v44 = vpop.f32.mrf.mxu2 }
 0x873   : > { %v4079_v52 = vpop.eup %4078  ;;  %v2891_v62 = vadd.f32 %v2890_v44, %v6040_v46 }
 0x874   : > { %v2958_v47 = vpop.f32.mrf.mxu1  ;;  %3082 = vmatmul.f32.gmra.mxu0 %v4079_v52 }
 0x875   : > { %v4081_v63 = vpop.eup %4080  ;;  %4082 = vtanh.f32 %v2891_v62  ;;  %v2959_v40 = vadd.f32 %v2958_v47, %v6036_v57 }
 0x876   : > { %3150 = vmatmul.f32.gmra.mxu3 %v4081_v63 }
 0x877   : > { %4084 = vtanh.f32 %v2959_v40 }
 0x87a   : > { %v2893_v16 = vpop.f32.mrf.mxu2 }
 0x87b   : > { %v4083_v22 = vpop.eup %4082  ;;  %v2894_v34 = vadd.f32 %v2893_v16, %v6040_v46 }
 0x87c   : > { %v2961_v32 = vpop.f32.mrf.mxu1  ;;  %3085 = vmatmul.f32.gmra.mxu0 %v4083_v22 }
 0x87d   : > { %v4085_v18 = vpop.eup %4084  ;;  %4086 = vtanh.f32 %v2894_v34  ;;  %v2962_v61 = vadd.f32 %v2961_v32, %v6036_v57 }
 0x87e   : > { %3153 = vmatmul.f32.gmra.mxu3 %v4085_v18 }
 0x87f   : > { %4088 = vtanh.f32 %v2962_v61 }
 0x882   : > { %v2896_v17 = vpop.f32.mrf.mxu3 }
 0x883   : > { %v4087_v11 = vpop.eup %4086  ;;  %v2897_v33 = vadd.f32 %v2896_v17, %v6040_v46 }
 0x884   : > { %v2964_v21 = vpop.f32.mrf.mxu1  ;;  %3088 = vmatmul.f32.gmra.mxu0 %v4087_v11 }
 0x885   : > { %v4089_v20 = vpop.eup %4088  ;;  %4090 = vtanh.f32 %v2897_v33  ;;  %v2965_v41 = vadd.f32 %v2964_v21, %v6036_v57 }
 0x886   : > { %3156 = vmatmul.f32.gmra.mxu3 %v4089_v20 }
 0x887   : > { %4092 = vtanh.f32 %v2965_v41 }
 0x88a   : > { %v2899_v8 = vpop.f32.mrf.mxu3 }
 0x88b   : > { %v4091_v1 = vpop.eup %4090  ;;  %v2900_v23 = vadd.f32 %v2899_v8, %v6040_v46 }
 0x88c   : > { %v2967_v19 = vpop.f32.mrf.mxu1  ;;  %3091 = vmatmul.f32.gmra.mxu0 %v4091_v1  ;;  %v6079_v1 = vld [vmem:[%s6606_s5 + $0x100] ss:$0 sm:$0xff] }
 0x88d   : > { %v4093_v0 = vpop.eup %4092  ;;  %4094 = vtanh.f32 %v2900_v23  ;;  %v2968_v30 = vadd.f32 %v2967_v19, %v6036_v57 }
 0x88e   : > { %3159 = vmatmul.f32.gmra.mxu3 %v4093_v0 }
 0x88f   : > { %4096 = vtanh.f32 %v2968_v30 }
 0x892   : > { %v2902_v27 = vpop.f32.mrf.mxu3 }
 0x893   : > { %v4095_v38 = vpop.eup %4094  ;;  %v2903_v26 = vadd.f32 %v2902_v27, %v6040_v46 }
 0x894   : > { %v2970_v24 = vpop.f32.mrf.mxu1  ;;  %3094 = vmatmul.f32.gmra.mxu0 %v4095_v38 }
 0x895   : > { %v4097_v2 = vpop.eup %4096  ;;  %4098 = vtanh.f32 %v2903_v26  ;;  %v2971_v50 = vadd.f32 %v2970_v24, %v6036_v57 }
 0x896   : > { %3162 = vmatmul.f32.gmra.mxu3 %v4097_v2 }
 0x897   : > { %4100 = vtanh.f32 %v2971_v50 }
 0x89a   : > { %v2905_v13 = vpop.f32.mrf.mxu3 }
 0x89b   : > { %v4099_v3 = vpop.eup %4098  ;;  %v2906_v25 = vadd.f32 %v2905_v13, %v6040_v46 }
 0x89c   : > { %v2973_v60 = vpop.f32.mrf.mxu1  ;;  %3097 = vmatmul.f32.gmra.mxu0 %v4099_v3  ;;  %v6094_v3 = vld [vmem:[%s4252_s27 + $0x8] sm:$0xff] }
 0x89d   : > { %v4101_v49 = vpop.eup %4100  ;;  %4102 = vtanh.f32 %v2906_v25  ;;  %v2974_v7 = vadd.f32 %v2973_v60, %v6036_v57 }
 0x89e   : > { %3165 = vmatmul.f32.gmra.mxu3 %v4101_v49 }
 0x89f   : > { %4104 = vtanh.f32 %v2974_v7 }
 0x8a2   : > { %v2908_v45 = vpop.f32.mrf.mxu3 }
 0x8a3   : > { %v4103_v55 = vpop.eup %4102  ;;  %v2909_v35 = vadd.f32 %v2908_v45, %v6040_v46 }
 0x8a4   : > { %v2976_v12 = vpop.f32.mrf.mxu1  ;;  %3100 = vmatmul.f32.gmra.mxu0 %v4103_v55 }
 0x8a5   : > { %v4105_v5 = vpop.eup %4104  ;;  %4106 = vtanh.f32 %v2909_v35  ;;  %v2977_v29 = vadd.f32 %v2976_v12, %v6036_v57  ;;  %v6103_v35 = vld [vmem:[%s4252_s27 + $0x10] sm:$0xff] }
 0x8a6   : > { %3168 = vmatmul.f32.gmra.mxu3 %v4105_v5 }
 0x8a7   : > { %4108 = vtanh.f32 %v2977_v29 }
 0x8aa   : > { %v2911_v58 = vpop.f32.mrf.mxu3 }
 0x8ab   : > { %v4107_v54 = vpop.eup %4106  ;;  %v2912_v56 = vadd.f32 %v2911_v58, %v6040_v46 }
 0x8ac   : > { %v2979_v59 = vpop.f32.mrf.mxu1  ;;  %3103 = vmatmul.f32.gmra.mxu0 %v4107_v54 }
 0x8ad   : > { %v4109_v6 = vpop.eup %4108  ;;  %4110 = vtanh.f32 %v2912_v56  ;;  %v2980_v9 = vadd.f32 %v2979_v59, %v6036_v57  ;;  %v6112_v59 = vld [vmem:[%s4252_s27 + $0x18] sm:$0xff] }
 0x8ae   : > { %3171 = vmatmul.f32.gmra.mxu3 %v4109_v6 }
 0x8af   : > { %4112 = vtanh.f32 %v2980_v9 }
 0x8b2   : > { %v2914_v37 = vpop.f32.mrf.mxu3 }
 0x8b3   : > { %v4111_v51 = vpop.eup %4110  ;;  %v2915_v48 = vadd.f32 %v2914_v37, %v6040_v46 }
 0x8b4   : > { %3106 = vmatmul.f32.gmra.mxu0 %v4111_v51 }
 0x8b5   : > { %v2982_v14 = vpop.f32.mrf.mxu1  ;;  %v4113_v10 = vpop.eup %4112  ;;  %4114 = vtanh.f32 %v2915_v48 }
 0x8b6   : > { %v2983_v28 = vadd.f32 %v2982_v14, %v6036_v57  ;;  %3174 = vmatmul.f32.gmra.mxu3 %v4113_v10  ;;  %v6121_v10 = vld [vmem:[%s4252_s27 + $0x20] sm:$0xff] }
 0x8b8   : > { %4116 = vtanh.f32 %v2983_v28 }
 0x8bb   : > { %v2917_v4 = vpop.f32.mrf.mxu3  ;;  %v4115_v53 = vpop.eup %4114 }
 0x8bc   : > { %v2918_v39 = vadd.f32 %v2917_v4, %v6040_v46  ;;  %3109 = vmatmul.f32.gmra.mxu0 %v4115_v53 }
 0x8bd   : > { %v2985_v15 = vpop.f32.mrf.mxu1 }
 0x8be   : > { %v4117_v42 = vpop.eup %4116  ;;  %4118 = vtanh.f32 %v2918_v39  ;;  %v2986_v36 = vadd.f32 %v2985_v15, %v6036_v57 }
 0x8bf   : > { %3177 = vmatmul.f32.gmra.mxu3 %v4117_v42 }
 0x8c0   : > { %4120 = vtanh.f32 %v2986_v36  ;;  %v6130_v36 = vld [vmem:[%s4252_s27 + $0x28] sm:$0xff] }
 0x8c3   : > { %v2920_v31 = vpop.f32.mrf.mxu3 }
 0x8c4   : > { %v4119_v43 = vpop.eup %4118  ;;  %v2921_v44 = vadd.f32 %v2920_v31, %v6040_v46 }
 0x8c5   : > { %3112 = vmatmul.f32.gmra.mxu0 %v4119_v43 }
 0x8c6   : > { %v4121_v52 = vpop.eup %4120  ;;  %4122 = vtanh.f32 %v2921_v44 }
 0x8c7   : > { %3180 = vmatmul.f32.gmra.mxu3 %v4121_v52 }
 0x8cb   : > { %v2923_v62 = vpop.f32.mrf.mxu3  ;;  %v2988_v47 = vpop.f32.mrf.mxu2 }
 0x8cc   : > { %v4123_v63 = vpop.eup %4122  ;;  %v2924_v40 = vadd.f32 %v2923_v62, %v6040_v46  ;;  %v2989_v16 = vadd.f32 %v2988_v47, %v6036_v57 }
 0x8cd   : > { %3115 = vmatmul.f32.gmra.mxu0 %v4123_v63  ;;  %v6139_v63 = vld [vmem:[%s4252_s27 + $0x30] sm:$0xff] }
 0x8ce   : > { %4124 = vtanh.f32 %v2924_v40 }
 0x8cf   : > { %4126 = vtanh.f32 %v2989_v16 }
 0x8d3   : > { %v2926_v22 = vpop.f32.mrf.mxu3  ;;  %v2991_v34 = vpop.f32.mrf.mxu2 }
 0x8d4   : > { %v4125_v32 = vpop.eup %4124  ;;  %v2927_v18 = vadd.f32 %v2926_v22, %v6040_v46  ;;  %v2992_v61 = vadd.f32 %v2991_v34, %v6036_v57 }
 0x8d5   : > { %v4127_v17 = vpop.eup %4126  ;;  %3118 = vmatmul.f32.gmra.mxu0 %v4125_v32 }
 0x8d6   : > { %4128 = vtanh.f32 %v2927_v18  ;;  %3183 = vmatmul.f32.gmra.mxu3 %v4127_v17 }
 0x8d7   : > { %4130 = vtanh.f32 %v2992_v61  ;;  %v6148_v61 = vld [vmem:[%s4252_s27 + $0x38] sm:$0xff] }
 0x8db   : > { %v2929_v11 = vpop.f32.mrf.mxu3  ;;  %v2994_v33 = vpop.f32.mrf.mxu2 }
 0x8dc   : > { %v4129_v21 = vpop.eup %4128  ;;  %v2930_v20 = vadd.f32 %v2929_v11, %v6040_v46  ;;  %v2995_v41 = vadd.f32 %v2994_v33, %v6036_v57  ;;  %v6085_v57 = vld [vmem:[%s4252_s27] sm:$0xff] }
 0x8dd   : > { %v4131_v8 = vpop.eup %4130  ;;  %3121 = vmatmul.f32.gmra.mxu0 %v4129_v21  ;;  %v3080_v23 = vpop.f32.mrf.mxu0 }
 0x8de   : > { %4132 = vtanh.f32 %v2930_v20  ;;  %3186 = vmatmul.f32.gmra.mxu3 %v4131_v8  ;;  %v3081_v19 = vadd.f32 %v6079_v1, %v3080_v23  ;;  %v6157_v8 = vld [vmem:[%s4252_s27 + $0x40] sm:$0xff] }
 0x8df   : > { %4134 = vtanh.f32 %v2995_v41 }
 0x8e3   : > { %v3145_v0 = vpop.f32.mrf.mxu3 }
 0x8e4   : > { %v4133_v30 = vpop.eup %4132  ;;  %v6082_v46 = vadd.f32 %v3145_v0, %v3081_v19 }
 0x8e5   : > { %v4135_v27 = vpop.eup %4134  ;;  %3124 = vmatmul.f32.gmra.mxu0 %v4133_v30 }
 0x8e6   : > { %3189 = vmatmul.f32.gmra.mxu3 %v4135_v27  ;;  %v3193_v38 = vmul.f32 %v6085_v57, %v6082_v46 }
 0x8e8   : > { %v3209_v26 = vsel %vm2101_vm0, %v3193_v38, 0.0 }
 0x8e9   : > { %3210 = vadd.xlane.f32.xlu1 %v3209_v26  ;;  %v6166_v26 = vld [vmem:[%s4252_s27 + $0x48] sm:$0xff] }
 0x8f1   : > { %v3083_v24 = vpop.f32.mrf.mxu0  ;;  %v3148_v2 = vpop.f32.mrf.mxu3 }
 0x8f2   : > { %v3084_v50 = vadd.f32 %v6079_v1, %v3083_v24 }
 0x8f4   : > { %v6091_v13 = vadd.f32 %v3148_v2, %v3084_v50 }
 0x8f6   : > { %v3194_v25 = vmul.f32 %v6094_v3, %v6091_v13 }
 0x8f8   : > { %v3212_v60 = vsel %vm2101_vm0, %v3194_v25, 0.0 }
 0x8f9   : > { %v3086_v49 = vpop.f32.mrf.mxu0  ;;  %v3151_v7 = vpop.f32.mrf.mxu3  ;;  %3213 = vadd.xlane.f32.xlu2 %v3212_v60 }
 0x8fa   : > { %v3087_v45 = vadd.f32 %v6079_v1, %v3086_v49 }
 0x8fc   : > { %v6100_v55 = vadd.f32 %v3151_v7, %v3087_v45  ;;  %v6175_v7 = vld [vmem:[%s4252_s27 + $0x50] sm:$0xff] }
 0x8fe   : > { %v3195_v12 = vmul.f32 %v6103_v35, %v6100_v55 }
 0x900   : > { %v3215_v5 = vsel %vm2101_vm0, %v3195_v12, 0.0 }
 0x901   : > { %v3089_v29 = vpop.f32.mrf.mxu0  ;;  %v3154_v58 = vpop.f32.mrf.mxu3  ;;  %3216 = vadd.xlane.f32.xlu0 %v3215_v5 }
 0x902   : > { %v3090_v54 = vadd.f32 %v6079_v1, %v3089_v29 }
 0x904   : > { %v6109_v56 = vadd.f32 %v3154_v58, %v3090_v54 }
 0x906   : > { %v3196_v6 = vmul.f32 %v6112_v59, %v6109_v56 }
 0x908   : > { %v3218_v9 = vsel %vm2101_vm0, %v3196_v6, 0.0  ;;  %v6184_v6 = vld [vmem:[%s4252_s27 + $0x58] sm:$0xff] }
 0x909   : > { %v3092_v37 = vpop.f32.mrf.mxu0  ;;  %v3157_v51 = vpop.f32.mrf.mxu3  ;;  %3219 = vadd.xlane.f32.xlu1 %v3218_v9 }
 0x90a   : > { %v3093_v48 = vadd.f32 %v6079_v1, %v3092_v37 }
 0x90c   : > { %v6118_v14 = vadd.f32 %v3157_v51, %v3093_v48 }
 0x90e   : > { %v3197_v28 = vmul.f32 %v6121_v10, %v6118_v14 }
 0x910   : > { %v3221_v4 = vsel %vm2101_vm0, %v3197_v28, 0.0 }
 0x911   : > { %v3095_v53 = vpop.f32.mrf.mxu0  ;;  %v3160_v39 = vpop.f32.mrf.mxu3  ;;  %3222 = vadd.xlane.f32.xlu2 %v3221_v4 }
 0x912   : > { %v3096_v15 = vadd.f32 %v6079_v1, %v3095_v53  ;;  %v6193_v53 = vld [vmem:[%s4252_s27 + $0x60] sm:$0xff] }
 0x914   : > { %v6127_v42 = vadd.f32 %v3160_v39, %v3096_v15 }
 0x916   : > { %v3198_v31 = vmul.f32 %v6130_v36, %v6127_v42 }
 0x918   : > { %v3224_v43 = vsel %vm2101_vm0, %v3198_v31, 0.0 }
 0x919   : > { %v3098_v44 = vpop.f32.mrf.mxu0  ;;  %v3163_v52 = vpop.f32.mrf.mxu3  ;;  %3225 = vadd.xlane.f32.xlu0 %v3224_v43 }
 0x91a   : > { %v3099_v62 = vadd.f32 %v6079_v1, %v3098_v44 }
 0x91c   : > { %v6136_v47 = vadd.f32 %v3163_v52, %v3099_v62 }
 0x91e   : > { %v3199_v40 = vmul.f32 %v6139_v63, %v6136_v47 }
 0x920   : > { %v3227_v16 = vsel %vm2101_vm0, %v3199_v40, 0.0  ;;  %v6202_v40 = vld [vmem:[%s4252_s27 + $0x68] sm:$0xff] }
 0x921   : > { %v3101_v22 = vpop.f32.mrf.mxu0  ;;  %v3166_v34 = vpop.f32.mrf.mxu3  ;;  %3228 = vadd.xlane.f32.xlu1 %v3227_v16 }
 0x922   : > { %v3102_v32 = vadd.f32 %v6079_v1, %v3101_v22 }
 0x924   : > { %v6145_v18 = vadd.f32 %v3166_v34, %v3102_v32 }
 0x926   : > { %v3200_v17 = vmul.f32 %v6148_v61, %v6145_v18 }
 0x928   : > { %v3230_v11 = vsel %vm2101_vm0, %v3200_v17, 0.0 }
 0x929   : > { %v3104_v33 = vpop.f32.mrf.mxu0  ;;  %v3169_v21 = vpop.f32.mrf.mxu3  ;;  %3231 = vadd.xlane.f32.xlu2 %v3230_v11  ;;  %v6211_v11 = vld [vmem:[%s4252_s27 + $0x70] sm:$0xff] }
 0x92a   : > { %v3105_v20 = vadd.f32 %v6079_v1, %v3104_v33 }
 0x92c   : > { %v6154_v41 = vadd.f32 %v3169_v21, %v3105_v20 }
 0x92e   : > { %v3201_v23 = vmul.f32 %v6157_v8, %v6154_v41 }
 0x930   : > { %v3233_v19 = vsel %vm2101_vm0, %v3201_v23, 0.0 }
 0x931   : > { %v3107_v0 = vpop.f32.mrf.mxu0  ;;  %v3172_v30 = vpop.f32.mrf.mxu3  ;;  %3234 = vadd.xlane.f32.xlu0 %v3233_v19 }
 0x932   : > { %v3108_v27 = vadd.f32 %v6079_v1, %v3107_v0 }
 0x934   : > { %v6163_v38 = vadd.f32 %v3172_v30, %v3108_v27  ;;  %v6220_v30 = vld [vmem:[%s4252_s27 + $0x78] sm:$0xff]  ;;  %s4202_s27 = smov 127  }
 0x936   : > { %v3202_v24 = vmul.f32 %v6166_v26, %v6163_v38 }
 0x938   : > { %v3236_v2 = vsel %vm2101_vm0, %v3202_v24, 0.0 }
 0x939   : > { %v3110_v50 = vpop.f32.mrf.mxu0  ;;  %v3175_v25 = vpop.f32.mrf.mxu3  ;;  %3237 = vadd.xlane.f32.xlu1 %v3236_v2 }
 0x93a   : > { %v3111_v60 = vadd.f32 %v6079_v1, %v3110_v50 }
 0x93c   : > { %v6172_v49 = vadd.f32 %v3175_v25, %v3111_v60 }
 0x93e   : > { %v3203_v45 = vmul.f32 %v6175_v7, %v6172_v49 }
 0x940   : > { %v3239_v12 = vsel %vm2101_vm0, %v3203_v45, 0.0 }
 0x941   : > { %3240 = vadd.xlane.f32.xlu2 %v3239_v12 }
 0x942   : > { %v3113_v5 = vpop.f32.mrf.mxu0  ;;  %v3178_v29 = vpop.f32.mrf.mxu3 }
 0x943   : > { %v3114_v58 = vadd.f32 %v6079_v1, %v3113_v5 }
 0x945   : > { %v6181_v54 = vadd.f32 %v3178_v29, %v3114_v58 }
 0x947   : > { %v3204_v9 = vmul.f32 %v6184_v6, %v6181_v54 }
 0x949   : > { %v3242_v37 = vsel %vm2101_vm0, %v3204_v9, 0.0 }
 0x94a   : > { %v3116_v51 = vpop.f32.mrf.mxu0  ;;  %3243 = vadd.xlane.f32.xlu0 %v3242_v37  ;;  %v3181_v28 = vpop.f32.mrf.mxu3 }
 0x94b   : > { %v3117_v48 = vadd.f32 %v6079_v1, %v3116_v51 }
 0x94d   : > { %v6190_v4 = vadd.f32 %v3181_v28, %v3117_v48 }
 0x94f   : > { %v3205_v39 = vmul.f32 %v6193_v53, %v6190_v4 }
 0x951   : > { %v3245_v15 = vsel %vm2101_vm0, %v3205_v39, 0.0 }
 0x952   : > { %v3119_v31 = vpop.f32.mrf.mxu0  ;;  %3246 = vadd.xlane.f32.xlu1 %v3245_v15 }
 0x953   : > { %v3120_v43 = vadd.f32 %v6079_v1, %v3119_v31 }
 0x959   : > { %v3184_v44 = vpop.f32.mrf.mxu3 }
 0x95a   : > { %v6199_v52 = vadd.f32 %v3184_v44, %v3120_v43  ;;  %v3122_v62 = vpop.f32.mrf.mxu0 }
 0x95b   : > { %v3123_v34 = vadd.f32 %v6079_v1, %v3122_v62 }
 0x95c   : > { %v3206_v16 = vmul.f32 %v6202_v40, %v6199_v52  ;;  %v6265_v60 = vpop.xlane.xlu1 %3210 }
 0x95e   : > { %v3248_v22 = vsel %vm2101_vm0, %v3206_v16, 0.0 }
 0x95f   : > { %3249 = vadd.xlane.f32.xlu2 %v3248_v22 }
 0x961   : > { %v3187_v32 = vpop.f32.mrf.mxu3 }
 0x962   : > { %v6208_v17 = vadd.f32 %v3187_v32, %v3123_v34  ;;  %v3125_v21 = vpop.f32.mrf.mxu0 }
 0x963   : > { %v3126_v23 = vadd.f32 %v6079_v1, %v3125_v21 }
 0x964   : > { %v3207_v33 = vmul.f32 %v6211_v11, %v6208_v17 }
 0x966   : > { %v3251_v20 = vsel %vm2101_vm0, %v3207_v33, 0.0 }
 0x967   : > { %3252 = vadd.xlane.f32.xlu0 %v3251_v20 }
 0x969   : > { %v3190_v19 = vpop.f32.mrf.mxu3 }
 0x96a   : > { %v6217_v0 = vadd.f32 %v3190_v19, %v3126_v23 }
 0x96c   : > { %v3208_v27 = vmul.f32 %v6220_v30, %v6217_v0  ;;  %v6257_v1 = vpop.xlane.xlu2 %3213 }
 0x96e   : > { %v3254_v24 = vsel %vm2101_vm0, %v3208_v27, 0.0 }
 0x96f   : > { %3255 = vadd.xlane.f32.xlu1 %v3254_v24 }
 0x974   : > { %v6263_v25 = vpop.xlane.xlu0 %3216 }
 0x977   : > { %3273 = vrot.lane.b32.xlu2 %v6082_v46, %s4199_s30 }
 0x97b   : > { %3275 = vrot.lane.b32.xlu0 %v6091_v13, %s4199_s30 }
 0x97c   : > { %v6271_v5 = vpop.xlane.xlu1 %3219 }
 0x97f   : > { %3281 = vrot.lane.b32.xlu2 %v6118_v14, %s4199_s30 }
 0x983   : > { %3279 = vrot.lane.b32.xlu0 %v6109_v56, %s4199_s30 }
 0x984   : > { %v6259_v2 = vpop.xlane.xlu2 %3222 }
 0x987   : > { %3287 = vrot.lane.b32.xlu2 %v6145_v18, %s4199_s30 }
 0x988   : > { %3277 = vrot.lane.b32.xlu1 %v6100_v55, %s4199_s30 }
 0x98b   : > { %3285 = vrot.lane.b32.xlu0 %v6136_v47, %s4199_s30 }
 0x98c   : > { %v6269_v12 = vpop.xlane.xlu0 %3225 }
 0x98f   : > { %3293 = vrot.lane.b32.xlu2 %v6172_v49, %s4199_s30 }
 0x990   : > { %3283 = vrot.lane.b32.xlu1 %v6127_v42, %s4199_s30 }
 0x993   : > { %3291 = vrot.lane.b32.xlu0 %v6163_v38, %s4199_s30 }
 0x994   : > { %v6277_v9 = vpop.xlane.xlu1 %3228 }
 0x997   : > { %3299 = vrot.lane.b32.xlu2 %v6199_v52, %s4199_s30 }
 0x998   : > { %3289 = vrot.lane.b32.xlu1 %v6154_v41, %s4199_s30 }
 0x99b   : > { %3297 = vrot.lane.b32.xlu0 %v6190_v4, %s4199_s30 }
 0x99c   : > { %v6261_v50 = vpop.xlane.xlu2 %3231 }
 0x9a0   : > { %3295 = vrot.lane.b32.xlu1 %v6181_v54, %s4199_s30 }
 0x9a3   : > { %3303 = vrot.lane.b32.xlu0 %v6217_v0, %s4199_s30 }
 0x9a4   : > { %v6275_v58 = vpop.xlane.xlu0 %3234 }
 0x9a5   : > { %6864 = vst [vmem:[#allocation38_spill] sm:$0xff] %v6275_v58 }
 0x9a8   : > { %3301 = vrot.lane.b32.xlu1 %v6208_v17, %s4199_s30  ;;  %s6506_s30 = scalar_lea.vmem %s6607_s6, %s4246_s24 }
 0x9ac   : > { %v6283_v28 = vpop.xlane.xlu1 %3237 }
 0x9b4   : > { %v6267_v45 = vpop.xlane.xlu2 %3240 }
 0x9b5   : > { %6862 = vst [vmem:[#allocation7_spill] sm:$0xff] %v6267_v45 }
 0x9bd   : > { %v6280_v48 = vpop.xlane.xlu0 %3243 }
 0x9be   : > { %6865 = vst [vmem:[#allocation83_spill] sm:$0xff] %v6280_v48 }
 0x9c5   : > { %v6287_v15 = vpop.xlane.xlu1 %3246 }
 0x9d2   : > { %v6273_v29 = vpop.xlane.xlu2 %3249 }
 0x9d3   : > { %6863 = vst [vmem:[#allocation22_spill] sm:$0xff] %v6273_v29 }
 0x9da   : > { %v3274_v37 = vpop.permute.xlu2 %3273  ;;  %v6285_v39 = vpop.xlane.xlu0 %3252 }
 0x9db   : > { %v3321_v51 = vmul.f32 %v6085_v57, %v3274_v37  ;;  %6866 = vst [vmem:[#allocation81_spill] sm:$0xff] %v6285_v39 }
 0x9dd   : > { %3353 = vrot.lane.b32.xlu2 %v3321_v51, %s4187_s28 }
 0x9e2   : > { %v3282_v31 = vpop.permute.xlu2 %3281  ;;  %v6291_v62 = vpop.xlane.xlu1 %3255 }
 0x9e3   : > { %v3325_v22 = vmul.f32 %v6121_v10, %v3282_v31 }
 0x9ea   : > { %v3288_v32 = vpop.permute.xlu2 %3287 }
 0x9eb   : > { %v3328_v23 = vmul.f32 %v6148_v61, %v3288_v32 }
 0x9ed   : > { %v3276_v43 = vpop.permute.xlu0 %3275 }
 0x9ee   : > { %v3322_v44 = vmul.f32 %v6094_v3, %v3276_v43 }
 0x9f0   : > { %3355 = vrot.lane.b32.xlu1 %v3322_v44, %s4187_s28 }
 0x9f2   : > { %v3294_v27 = vpop.permute.xlu2 %3293 }
 0x9f3   : > { %v3331_v31 = vmul.f32 %v6175_v7, %v3294_v27 }
 0x9f5   : > { %v3280_v16 = vpop.permute.xlu0 %3279 }
 0x9f6   : > { %v3324_v34 = vmul.f32 %v6112_v59, %v3280_v16 }
 0x9f8   : > { %3359 = vrot.lane.b32.xlu2 %v3324_v34, %s4187_s28  ;;  %3361 = vrot.lane.b32.xlu1 %v3325_v22, %s4187_s28 }
 0x9fa   : > { %v3278_v33 = vpop.permute.xlu1 %3277  ;;  %v3300_v16 = vpop.permute.xlu2 %3299 }
 0x9fb   : > { %v3323_v21 = vmul.f32 %v6103_v35, %v3278_v33  ;;  %v3334_v32 = vmul.f32 %v6202_v40, %v3300_v16 }
 0x9fd   : > { %v3286_v20 = vpop.permute.xlu0 %3285  ;;  %3357 = vrot.lane.b32.xlu0 %v3323_v21, %s4187_s28 }
 0x9fe   : > { %v3327_v19 = vmul.f32 %v6139_v63, %v3286_v20 }
 0xa00   : > { %3365 = vrot.lane.b32.xlu2 %v3327_v19, %s4187_s28  ;;  %3367 = vrot.lane.b32.xlu1 %v3328_v23, %s4187_s28 }
 0xa02   : > { %v3284_v24 = vpop.permute.xlu1 %3283 }
 0xa03   : > { %v3326_v37 = vmul.f32 %v6130_v36, %v3284_v24 }
 0xa05   : > { %v3292_v51 = vpop.permute.xlu0 %3291  ;;  %3363 = vrot.lane.b32.xlu0 %v3326_v37, %s4187_s28 }
 0xa06   : > { %v3330_v43 = vmul.f32 %v6166_v26, %v3292_v51 }
 0xa08   : > { %3371 = vrot.lane.b32.xlu2 %v3330_v43, %s4187_s28  ;;  %3373 = vrot.lane.b32.xlu1 %v3331_v31, %s4187_s28 }
 0xa0a   : > { %v3290_v44 = vpop.permute.xlu1 %3289 }
 0xa0b   : > { %v3329_v22 = vmul.f32 %v6157_v8, %v3290_v44 }
 0xa0d   : > { %v3298_v34 = vpop.permute.xlu0 %3297  ;;  %3369 = vrot.lane.b32.xlu0 %v3329_v22, %s4187_s28 }
 0xa0e   : > { %v3333_v33 = vmul.f32 %v6193_v53, %v3298_v34 }
 0xa10   : > { %3377 = vrot.lane.b32.xlu2 %v3333_v33, %s4187_s28  ;;  %3379 = vrot.lane.b32.xlu1 %v3334_v32, %s4187_s28 }
 0xa12   : > { %v3296_v21 = vpop.permute.xlu1 %3295 }
 0xa13   : > { %v3332_v20 = vmul.f32 %v6184_v6, %v3296_v21 }
 0xa15   : > { %v3304_v23 = vpop.permute.xlu0 %3303  ;;  %3375 = vrot.lane.b32.xlu0 %v3332_v20, %s4187_s28 }
 0xa16   : > { %v3336_v19 = vmul.f32 %v6220_v30, %v3304_v23 }
 0xa18   : > { %3383 = vrot.lane.b32.xlu2 %v3336_v19, %s4187_s28 }
 0xa1a   : > { %v3302_v27 = vpop.permute.xlu1 %3301 }
 0xa1b   : > { %v3335_v24 = vmul.f32 %v6211_v11, %v3302_v27 }
 0xa1d   : > { %3381 = vrot.lane.b32.xlu0 %v3335_v24, %s4187_s28 }
 0xa37   : > { %v3354_v37 = vpop.permute.xlu2 %3353 }
 0xa38   : > { %v3401_v51 = vsel %vm2101_vm0, %v3354_v37, 0.0 }
 0xa3a   : > { %3402 = vadd.xlane.f32.xlu1 %v3401_v51 }
 0xa52   : > { %v3360_v31 = vpop.permute.xlu2 %3359 }
 0xa53   : > { %v3410_v43 = vsel %vm2101_vm0, %v3360_v31, 0.0 }
 0xa54   : > { %3411 = vadd.xlane.f32.xlu1 %v3410_v43 }
 0xa5a   : > { %v3366_v44 = vpop.permute.xlu2 %3365 }
 0xa5b   : > { %v3419_v16 = vsel %vm2101_vm0, %v3366_v44, 0.0 }
 0xa5c   : > { %3420 = vadd.xlane.f32.xlu1 %v3419_v16 }
 0xa62   : > { %v3372_v22 = vpop.permute.xlu2 %3371  ;;  %v3356_v34 = vpop.permute.xlu1 %3355 }
 0xa63   : > { %v3428_v32 = vsel %vm2101_vm0, %v3372_v22, 0.0  ;;  %v3404_v33 = vsel %vm2101_vm0, %v3356_v34, 0.0 }
 0xa64   : > { %3429 = vadd.xlane.f32.xlu1 %v3428_v32  ;;  %3405 = vadd.xlane.f32.xlu0 %v3404_v33 }
 0xa6a   : > { %v3378_v21 = vpop.permute.xlu2 %3377  ;;  %v3362_v20 = vpop.permute.xlu1 %3361 }
 0xa6b   : > { %v3437_v23 = vsel %vm2101_vm0, %v3378_v21, 0.0  ;;  %v3413_v19 = vsel %vm2101_vm0, %v3362_v20, 0.0 }
 0xa6c   : > { %3438 = vadd.xlane.f32.xlu1 %v3437_v23  ;;  %3414 = vadd.xlane.f32.xlu0 %v3413_v19 }
 0xa6f   : > { %v3358_v27 = vpop.permute.xlu0 %3357 }
 0xa70   : > { %v3407_v24 = vsel %vm2101_vm0, %v3358_v27, 0.0 }
 0xa71   : > { %3408 = vadd.xlane.f32.xlu2 %v3407_v24 }
 0xa72   : > { %v3384_v37 = vpop.permute.xlu2 %3383  ;;  %v3368_v51 = vpop.permute.xlu1 %3367 }
 0xa73   : > { %v3446_v31 = vsel %vm2101_vm0, %v3384_v37, 0.0  ;;  %v3422_v43 = vsel %vm2101_vm0, %v3368_v51, 0.0 }
 0xa74   : > { %3447 = vadd.xlane.f32.xlu1 %v3446_v31  ;;  %3423 = vadd.xlane.f32.xlu0 %v3422_v43 }
 0xa77   : > { %v3364_v44 = vpop.permute.xlu0 %3363 }
 0xa78   : > { %v3416_v16 = vsel %vm2101_vm0, %v3364_v44, 0.0 }
 0xa79   : > { %3417 = vadd.xlane.f32.xlu2 %v3416_v16 }
 0xa7a   : > { %v3374_v22 = vpop.permute.xlu1 %3373 }
 0xa7b   : > { %v3431_v34 = vsel %vm2101_vm0, %v3374_v22, 0.0 }
 0xa7c   : > { %3432 = vadd.xlane.f32.xlu0 %v3431_v34 }
 0xa7f   : > { %v3370_v32 = vpop.permute.xlu0 %3369 }
 0xa80   : > { %v3425_v33 = vsel %vm2101_vm0, %v3370_v32, 0.0 }
 0xa81   : > { %3426 = vadd.xlane.f32.xlu2 %v3425_v33 }
 0xa82   : > { %v3380_v21 = vpop.permute.xlu1 %3379 }
 0xa83   : > { %v3440_v20 = vsel %vm2101_vm0, %v3380_v21, 0.0 }
 0xa84   : > { %3441 = vadd.xlane.f32.xlu0 %v3440_v20 }
 0xa87   : > { %v3376_v23 = vpop.permute.xlu0 %3375 }
 0xa88   : > { %v3434_v19 = vsel %vm2101_vm0, %v3376_v23, 0.0 }
 0xa89   : > { %3435 = vadd.xlane.f32.xlu2 %v3434_v19 }
 0xa8d   : > { %3453 = vrot.lane.b32.xlu1 %v6100_v55, %s4200_s7 }
 0xa8f   : > { %v3382_v27 = vpop.permute.xlu0 %3381 }
 0xa90   : > { %v3443_v24 = vsel %vm2101_vm0, %v3382_v27, 0.0 }
 0xa91   : > { %3444 = vadd.xlane.f32.xlu2 %v3443_v24 }
 0xa95   : > { %3461 = vrot.lane.b32.xlu1 %v6136_v47, %s4200_s7 }
 0xa98   : > { %3449 = vrot.lane.b32.xlu0 %v6082_v46, %s4200_s7 }
 0xa9d   : > { %3467 = vrot.lane.b32.xlu1 %v6163_v38, %s4200_s7 }
 0xaa0   : > { %3455 = vrot.lane.b32.xlu0 %v6109_v56, %s4200_s7 }
 0xaa5   : > { %3473 = vrot.lane.b32.xlu1 %v6190_v4, %s4200_s7 }
 0xaa8   : > { %3459 = vrot.lane.b32.xlu0 %v6127_v42, %s4200_s7 }
 0xaa9   : > { %3451 = vrot.lane.b32.xlu2 %v6091_v13, %s4200_s7 }
 0xaad   : > { %3479 = vrot.lane.b32.xlu1 %v6217_v0, %s4200_s7  ;;  %v6367_v37 = vpop.xlane.xlu1 %3402 }
 0xab0   : > { %3465 = vrot.lane.b32.xlu0 %v6154_v41, %s4200_s7 }
 0xab1   : > { %3457 = vrot.lane.b32.xlu2 %v6118_v14, %s4200_s7 }
 0xab8   : > { %3471 = vrot.lane.b32.xlu0 %v6181_v54, %s4200_s7 }
 0xab9   : > { %3463 = vrot.lane.b32.xlu2 %v6145_v18, %s4200_s7 }
 0xac0   : > { %3477 = vrot.lane.b32.xlu0 %v6208_v17, %s4200_s7 }
 0xac1   : > { %3469 = vrot.lane.b32.xlu2 %v6172_v49, %s4200_s7 }
 0xac7   : > { %v6371_v51 = vpop.xlane.xlu1 %3411 }
 0xac9   : > { %3475 = vrot.lane.b32.xlu2 %v6199_v52, %s4200_s7 }
 0xacf   : > { %v6373_v31 = vpop.xlane.xlu1 %3420 }
 0xad7   : > { %v6375_v43 = vpop.xlane.xlu0 %3405  ;;  %v6377_v44 = vpop.xlane.xlu1 %3429 }
 0xadf   : > { %v6379_v16 = vpop.xlane.xlu0 %3414  ;;  %v6385_v32 = vpop.xlane.xlu1 %3438 }
 0xae4   : > { %v6381_v22 = vpop.xlane.xlu2 %3408 }
 0xae7   : > { %v6387_v33 = vpop.xlane.xlu0 %3423  ;;  %v6391_v20 = vpop.xlane.xlu1 %3447 }
 0xaec   : > { %v6383_v34 = vpop.xlane.xlu2 %3417 }
 0xaef   : > { %v6393_v23 = vpop.xlane.xlu0 %3432 }
 0xaf0   : > { %6868 = vst [vmem:[#allocation98_spill] sm:$0xff] %v6393_v23 }
 0xaf4   : > { %v6389_v21 = vpop.xlane.xlu2 %3426 }
 0xaf5   : > { %6867 = vst [vmem:[#allocation92_spill] sm:$0xff] %v6389_v21 }
 0xaf7   : > { %v6398_v39 = vpop.xlane.xlu0 %3441 }
 0xaf8   : > { %6870 = vst [vmem:[#allocation105_spill] sm:$0xff] %v6398_v39 }
 0xafc   : > { %v6395_v19 = vpop.xlane.xlu2 %3435 }
 0xafd   : > { %6869 = vst [vmem:[#allocation106_spill] sm:$0xff] %v6395_v19 }
 0xaff   : > { %v3454_v27 = vpop.permute.xlu1 %3453 }
 0xb00   : > { %v3499_v24 = vmul.f32 %v6103_v35, %v3454_v27 }
 0xb02   : > { %3533 = vrot.lane.b32.xlu1 %v3499_v24, %s4189_s29 }
 0xb04   : > { %v6401_v48 = vpop.xlane.xlu2 %3444 }
 0xb07   : > { %v3462_v19 = vpop.permute.xlu1 %3461 }
 0xb0a   : > { %v3450_v29 = vpop.permute.xlu0 %3449 }
 0xb0b   : > { %v3497_v58 = vmul.f32 %v6085_v57, %v3450_v29  ;;  %v3503_v57 = vmul.f32 %v6139_v63, %v3462_v19 }
 0xb0c   : > { %v3452_v45 = vpop.permute.xlu2 %3451 }
 0xb0d   : > { %v3498_v21 = vmul.f32 %v6094_v3, %v3452_v45  ;;  %3529 = vrot.lane.b32.xlu2 %v3497_v58, %s4189_s29 }
 0xb0f   : > { %3531 = vrot.lane.b32.xlu0 %v3498_v21, %s4189_s29  ;;  %v3468_v45 = vpop.permute.xlu1 %3467 }
 0xb12   : > { %v3456_v23 = vpop.permute.xlu0 %3455 }
 0xb13   : > { %v3500_v35 = vmul.f32 %v6112_v59, %v3456_v23 }
 0xb14   : > { %v3458_v27 = vpop.permute.xlu2 %3457 }
 0xb15   : > { %v3501_v39 = vmul.f32 %v6121_v10, %v3458_v27  ;;  %3535 = vrot.lane.b32.xlu2 %v3500_v35, %s4189_s29  ;;  %v3506_v10 = vmul.f32 %v6166_v26, %v3468_v45 }
 0xb17   : > { %3537 = vrot.lane.b32.xlu0 %v3501_v39, %s4189_s29 }
 0xb1a   : > { %v3460_v24 = vpop.permute.xlu0 %3459 }
 0xb1b   : > { %v3502_v3 = vmul.f32 %v6130_v36, %v3460_v24  ;;  %v3474_v36 = vpop.permute.xlu1 %3473 }
 0xb1c   : > { %v3464_v29 = vpop.permute.xlu2 %3463  ;;  %v3509_v23 = vmul.f32 %v6193_v53, %v3474_v36 }
 0xb1d   : > { %v3504_v58 = vmul.f32 %v6148_v61, %v3464_v29  ;;  %3539 = vrot.lane.b32.xlu1 %v3502_v3, %s4189_s29  ;;  %3541 = vrot.lane.b32.xlu2 %v3503_v57, %s4189_s29 }
 0xb1f   : > { %3543 = vrot.lane.b32.xlu0 %v3504_v58, %s4189_s29 }
 0xb22   : > { %v3466_v59 = vpop.permute.xlu0 %3465 }
 0xb23   : > { %v3505_v39 = vmul.f32 %v6157_v8, %v3466_v59  ;;  %v3480_v8 = vpop.permute.xlu1 %3479 }
 0xb24   : > { %v3470_v21 = vpop.permute.xlu2 %3469  ;;  %v3512_v27 = vmul.f32 %v6220_v30, %v3480_v8 }
 0xb25   : > { %v3507_v63 = vmul.f32 %v6175_v7, %v3470_v21  ;;  %3545 = vrot.lane.b32.xlu1 %v3505_v39, %s4189_s29  ;;  %3547 = vrot.lane.b32.xlu2 %v3506_v10, %s4189_s29 }
 0xb27   : > { %3549 = vrot.lane.b32.xlu0 %v3507_v63, %s4189_s29 }
 0xb2a   : > { %v3472_v61 = vpop.permute.xlu0 %3471 }
 0xb2b   : > { %v3508_v19 = vmul.f32 %v6184_v6, %v3472_v61 }
 0xb2c   : > { %v3476_v35 = vpop.permute.xlu2 %3475 }
 0xb2d   : > { %v3510_v26 = vmul.f32 %v6202_v40, %v3476_v35  ;;  %3551 = vrot.lane.b32.xlu1 %v3508_v19, %s4189_s29  ;;  %3553 = vrot.lane.b32.xlu2 %v3509_v23, %s4189_s29 }
 0xb2f   : > { %3555 = vrot.lane.b32.xlu0 %v3510_v26, %s4189_s29 }
 0xb32   : > { %v3478_v7 = vpop.permute.xlu0 %3477 }
 0xb33   : > { %v3511_v24 = vmul.f32 %v6211_v11, %v3478_v7 }
 0xb35   : > { %3557 = vrot.lane.b32.xlu1 %v3511_v24, %s4189_s29  ;;  %3559 = vrot.lane.b32.xlu2 %v3512_v27, %s4189_s29 }
 0xb67   : > { %v3530_v6 = vpop.permute.xlu2 %3529 }
 0xb68   : > { %v3577_v53 = vsel %vm2101_vm0, %v3530_v6, 0.0 }
 0xb69   : > { %3578 = vadd.xlane.f32.xlu0 %v3577_v53 }
 0xb6f   : > { %v3536_v40 = vpop.permute.xlu2 %3535 }
 0xb70   : > { %v3586_v57 = vsel %vm2101_vm0, %v3536_v40, 0.0 }
 0xb71   : > { %3587 = vadd.xlane.f32.xlu0 %v3586_v57 }
 0xb74   : > { %v3534_v3 = vpop.permute.xlu1 %3533 }
 0xb75   : > { %v3583_v45 = vsel %vm2101_vm0, %v3534_v3, 0.0 }
 0xb76   : > { %3584 = vadd.xlane.f32.xlu2 %v3583_v45 }
 0xb77   : > { %v3542_v29 = vpop.permute.xlu2 %3541 }
 0xb78   : > { %v3595_v30 = vsel %vm2101_vm0, %v3542_v29, 0.0 }
 0xb79   : > { %3596 = vadd.xlane.f32.xlu0 %v3595_v30 }
 0xb7f   : > { %v3548_v11 = vpop.permute.xlu2 %3547 }
 0xb80   : > { %v3604_v58 = vsel %vm2101_vm0, %v3548_v11, 0.0 }
 0xb81   : > { %v3532_v59 = vpop.permute.xlu0 %3531  ;;  %3605 = vadd.xlane.f32.xlu0 %v3604_v58 }
 0xb82   : > { %v3580_v10 = vsel %vm2101_vm0, %v3532_v59, 0.0 }
 0xb83   : > { %3581 = vadd.xlane.f32.xlu1 %v3580_v10 }
 0xb87   : > { %v3554_v39 = vpop.permute.xlu2 %3553 }
 0xb88   : > { %v3613_v21 = vsel %vm2101_vm0, %v3554_v39, 0.0 }
 0xb89   : > { %v3538_v63 = vpop.permute.xlu0 %3537  ;;  %3614 = vadd.xlane.f32.xlu0 %v3613_v21 }
 0xb8a   : > { %v3589_v36 = vsel %vm2101_vm0, %v3538_v63, 0.0 }
 0xb8b   : > { %3590 = vadd.xlane.f32.xlu1 %v3589_v36 }
 0xb8f   : > { %v3560_v61 = vpop.permute.xlu2 %3559  ;;  %v3540_v23 = vpop.permute.xlu1 %3539 }
 0xb90   : > { %v3622_v19 = vsel %vm2101_vm0, %v3560_v61, 0.0  ;;  %v3592_v35 = vsel %vm2101_vm0, %v3540_v23, 0.0 }
 0xb91   : > { %v3544_v26 = vpop.permute.xlu0 %3543  ;;  %3623 = vadd.xlane.f32.xlu0 %v3622_v19  ;;  %3593 = vadd.xlane.f32.xlu2 %v3592_v35 }
 0xb92   : > { %v3598_v8 = vsel %vm2101_vm0, %v3544_v26, 0.0  ;;  %v6872_v26 = vld [vmem:[#allocation7_spill] sm:$0xff] }
 0xb93   : > { %3599 = vadd.xlane.f32.xlu1 %v3598_v8 }
 0xb97   : > { %v3546_v7 = vpop.permute.xlu1 %3545 }
 0xb98   : > { %v3601_v27 = vsel %vm2101_vm0, %v3546_v7, 0.0 }
 0xb99   : > { %v3550_v24 = vpop.permute.xlu0 %3549  ;;  %3602 = vadd.xlane.f32.xlu2 %v3601_v27 }
 0xb9a   : > { %v3607_v6 = vsel %vm2101_vm0, %v3550_v24, 0.0 }
 0xb9b   : > { %3608 = vadd.xlane.f32.xlu1 %v3607_v6 }
 0xb9f   : > { %v3552_v53 = vpop.permute.xlu1 %3551 }
 0xba0   : > { %v3610_v40 = vsel %vm2101_vm0, %v3552_v53, 0.0  ;;  %v6874_v53 = vld [vmem:[#allocation38_spill] sm:$0xff] }
 0xba1   : > { %v3556_v57 = vpop.permute.xlu0 %3555  ;;  %3611 = vadd.xlane.f32.xlu2 %v3610_v40 }
 0xba2   : > { %v3616_v3 = vsel %vm2101_vm0, %v3556_v57, 0.0 }
 0xba3   : > { %3617 = vadd.xlane.f32.xlu1 %v3616_v3 }
 0xba5   : > { %3663 = vrot.lane.b32.xlu0 %v6100_v55, %s4202_s27 }
 0xba7   : > { %v3558_v45 = vpop.permute.xlu1 %3557 }
 0xba8   : > { %v3619_v29 = vsel %vm2101_vm0, %v3558_v45, 0.0  ;;  %vm3625_vm0 = vcmask 7168  }
 0xba9   : > { %3620 = vadd.xlane.f32.xlu2 %v3619_v29  ;;  %v3627_v39 = vsel %vm3625_vm0, %v6257_v1, %v6375_v43  ;;  %v3631_v43 = vsel %vm3625_vm0, %v6269_v12, %v6383_v34  ;;  %v6873_v34 = vld [vmem:[#allocation92_spill] sm:$0xff]  ;;  %v6875_v29 = vld [vmem:[#allocation105_spill] sm:$0xff] }
 0xbaa   : > { %v3634_v40 = vsel %vm3625_vm0, %v6874_v53, %v6873_v34 }
 0xbad   : > { %3667 = vrot.lane.b32.xlu0 %v6118_v14, %s4202_s27 }
 0xbb5   : > { %3673 = vrot.lane.b32.xlu0 %v6145_v18, %s4202_s27 }
 0xbbc   : > { %3659 = vrot.lane.b32.xlu1 %v6082_v46, %s4202_s27  ;;  %v3626_v46 = vsel %vm3625_vm0, %v6265_v60, %v6367_v37 }
 0xbbd   : > { %3679 = vrot.lane.b32.xlu0 %v6172_v49, %s4202_s27 }
 0xbc1   : > { %3661 = vrot.lane.b32.xlu2 %v6091_v13, %s4202_s27 }
 0xbc4   : > { %3665 = vrot.lane.b32.xlu1 %v6109_v56, %s4202_s27  ;;  %v3629_v56 = vsel %vm3625_vm0, %v6271_v5, %v6371_v51  ;;  %v3641_v5 = vsel %vm3625_vm0, %v6291_v62, %v6391_v20 }
 0xbc5   : > { %3685 = vrot.lane.b32.xlu0 %v6199_v52, %s4202_s27 }
 0xbc9   : > { %3669 = vrot.lane.b32.xlu2 %v6127_v42, %s4202_s27 }
 0xbcc   : > { %3671 = vrot.lane.b32.xlu1 %v6136_v47, %s4202_s27  ;;  %v3632_v47 = vsel %vm3625_vm0, %v6277_v9, %v6373_v31 }
 0xbd1   : > { %3675 = vrot.lane.b32.xlu2 %v6154_v41, %s4202_s27 }
 0xbd4   : > { %3677 = vrot.lane.b32.xlu1 %v6163_v38, %s4202_s27  ;;  %v3635_v38 = vsel %vm3625_vm0, %v6283_v28, %v6377_v44 }
 0xbd9   : > { %3681 = vrot.lane.b32.xlu2 %v6181_v54, %s4202_s27 }
 0xbdc   : > { %v3579_v13 = vpop.xlane.xlu0 %3578  ;;  %3683 = vrot.lane.b32.xlu1 %v6190_v4, %s4202_s27  ;;  %v3638_v4 = vsel %vm3625_vm0, %v6287_v15, %v6385_v32  ;;  %v3628_v15 = vsel %vm3625_vm0, %v6263_v25, %v6381_v22  ;;  %v3630_v25 = vsel %vm3625_vm0, %v6259_v2, %v6379_v16  ;;  %v3633_v2 = vsel %vm3625_vm0, %v6261_v50, %v6387_v33  ;;  %v6871_v33 = vld [vmem:[#allocation98_spill] sm:$0xff] }
 0xbdd   : > { %v3643_v55 = vsel %vm3642_vm8, %v3626_v46, %v3579_v13  ;;  %v3636_v8 = vsel %vm3625_vm0, %v6872_v26, %v6871_v33  ;;  %v6876_v46 = vld [vmem:[#allocation22_spill] sm:$0xff] }
 0xbde   : > { %v3639_v13 = vsel %vm3625_vm0, %v6876_v46, %v6875_v29 }
 0xbe1   : > { %3687 = vrot.lane.b32.xlu2 %v6208_v17, %s4202_s27 }
 0xbe4   : > { %v3588_v14 = vpop.xlane.xlu0 %3587  ;;  %3689 = vrot.lane.b32.xlu1 %v6217_v0, %s4202_s27 }
 0xbe5   : > { %v6473_v42 = vsel %vm3642_vm8, %v3629_v56, %v3588_v14 }
 0xbe9   : > { %v3585_v52 = vpop.xlane.xlu2 %3584 }
 0xbea   : > { %v3645_v62 = vsel %vm3642_vm8, %v3628_v15, %v3585_v52 }
 0xbec   : > { %v3597_v18 = vpop.xlane.xlu0 %3596 }
 0xbed   : > { %v6479_v41 = vsel %vm3642_vm8, %v3632_v47, %v3597_v18 }
 0xbf4   : > { %v3606_v49 = vpop.xlane.xlu0 %3605 }
 0xbf5   : > { %v6485_v54 = vsel %vm3642_vm8, %v3635_v38, %v3606_v49  ;;  %v6877_v38 = vld [vmem:[#allocation106_spill] sm:$0xff]  ;;  %v6878_v49 = vld [vmem:[#allocation83_spill] sm:$0xff] }
 0xbf6   : > { %v3582_v60 = vpop.xlane.xlu1 %3581 }
 0xbf7   : > { %v3644_v21 = vsel %vm3642_vm8, %v3627_v39, %v3582_v60 }
 0xbfc   : > { %v3615_v17 = vpop.xlane.xlu0 %3614 }
 0xbfd   : > { %v6491_v0 = vsel %vm3642_vm8, %v3638_v4, %v3615_v17  ;;  %v3637_v4 = vsel %vm3625_vm0, %v6878_v49, %v6877_v38 }
 0xbfe   : > { %v3591_v51 = vpop.xlane.xlu1 %3590 }
 0xbff   : > { %v3647_v22 = vsel %vm3642_vm8, %v3630_v25, %v3591_v51 }
 0xc04   : > { %v3624_v9 = vpop.xlane.xlu0 %3623  ;;  %v3594_v28 = vpop.xlane.xlu2 %3593 }
 0xc05   : > { %v6497_v37 = vsel %vm3642_vm8, %v3641_v5, %v3624_v9  ;;  %v3648_v19 = vsel %vm3642_vm8, %v3631_v43, %v3594_v28  ;;  %v6879_v9 = vld [vmem:[#allocation81_spill] sm:$0xff] }
 0xc06   : > { %v3600_v44 = vpop.xlane.xlu1 %3599  ;;  %v3640_v28 = vsel %vm3625_vm0, %v6879_v9, %v6401_v48 }
 0xc07   : > { %v3650_v61 = vsel %vm3642_vm8, %v3633_v2, %v3600_v44 }
 0xc0c   : > { %v3603_v31 = vpop.xlane.xlu2 %3602 }
 0xc0d   : > { %v3651_v57 = vsel %vm3642_vm8, %v3634_v40, %v3603_v31 }
 0xc0e   : > { %v3609_v11 = vpop.xlane.xlu1 %3608 }
 0xc0f   : > { %v3653_v27 = vsel %vm3642_vm8, %v3636_v8, %v3609_v11 }
 0xc14   : > { %v3612_v30 = vpop.xlane.xlu2 %3611 }
 0xc15   : > { %v3654_v52 = vsel %vm3642_vm8, %v3637_v4, %v3612_v30 }
 0xc16   : > { %v3618_v16 = vpop.xlane.xlu1 %3617 }
 0xc17   : > { %v3664_v32 = vpop.permute.xlu0 %3663  ;;  %v3656_v56 = vsel %vm3642_vm8, %v3639_v13, %v3618_v16 }
 0xc18   : > { %v3710_v20 = vsel %vm3707_vm9, %v3645_v62, %v3664_v32 }
 0xc19   : > { %3727 = vst.msk [vmem:[%s6506_s30 + $0x10] sm:$0xff] %vm3724_vm10, %v3710_v20 }
 0xc1c   : > { %v3621_v58 = vpop.xlane.xlu2 %3620 }
 0xc1d   : > { %v3657_v51 = vsel %vm3642_vm8, %v3640_v28, %v3621_v58 }
 0xc1f   : > { %v3668_v59 = vpop.permute.xlu0 %3667 }
 0xc20   : > { %v3712_v10 = vsel %vm3707_vm9, %v3647_v22, %v3668_v59 }
 0xc21   : > { %3729 = vst.msk [vmem:[%s6506_s30 + $0x20] sm:$0xff] %vm3724_vm10, %v3712_v10 }
 0xc24   : > { %v3662_v63 = vpop.permute.xlu2 %3661 }
 0xc25   : > { %v3709_v36 = vsel %vm3707_vm9, %v3644_v21, %v3662_v63 }
 0xc26   : > { %3726 = vst.msk [vmem:[%s6506_s30 + $0x8] sm:$0xff] %vm3724_vm10, %v3709_v36 }
 0xc27   : > { %v3674_v23 = vpop.permute.xlu0 %3673 }
 0xc28   : > { %v3715_v1 = vsel %vm3707_vm9, %v3650_v61, %v3674_v23 }
 0xc29   : > { %3732 = vst.msk [vmem:[%s6506_s30 + $0x38] sm:$0xff] %vm3724_vm10, %v3715_v1 }
 0xc2c   : > { %v3670_v35 = vpop.permute.xlu2 %3669 }
 0xc2d   : > { %v3713_v50 = vsel %vm3707_vm9, %v3648_v19, %v3670_v35 }
 0xc2e   : > { %3730 = vst.msk [vmem:[%s6506_s30 + $0x28] sm:$0xff] %vm3724_vm10, %v3713_v50  ;;  %v3660_v7 = vpop.permute.xlu1 %3659 }
 0xc2f   : > { %v3708_v24 = vsel %vm3707_vm9, %v3643_v55, %v3660_v7  ;;  %v3680_v6 = vpop.permute.xlu0 %3679 }
 0xc30   : > { %3725 = vst.msk [vmem:[%s6506_s30] sm:$0xff] %vm3724_vm10, %v3708_v24  ;;  %v3718_v12 = vsel %vm3707_vm9, %v3653_v27, %v3680_v6 }
 0xc31   : > { %3735 = vst.msk [vmem:[%s6506_s30 + $0x50] sm:$0xff] %vm3724_vm10, %v3718_v12 }
 0xc34   : > { %v3676_v3 = vpop.permute.xlu2 %3675 }
 0xc35   : > { %v3716_v45 = vsel %vm3707_vm9, %v3651_v57, %v3676_v3 }
 0xc36   : > { %3733 = vst.msk [vmem:[%s6506_s30 + $0x40] sm:$0xff] %vm3724_vm10, %v3716_v45  ;;  %v3666_v55 = vpop.permute.xlu1 %3665 }
 0xc37   : > { %v3711_v14 = vsel %vm3707_vm9, %v6473_v42, %v3666_v55  ;;  %v3686_v47 = vpop.permute.xlu0 %3685 }
 0xc38   : > { %3728 = vst.msk [vmem:[%s6506_s30 + $0x18] sm:$0xff] %vm3724_vm10, %v3711_v14  ;;  %v3721_v18 = vsel %vm3707_vm9, %v3656_v56, %v3686_v47 }
 0xc39   : > { %3738 = vst.msk [vmem:[%s6506_s30 + $0x68] sm:$0xff] %vm3724_vm10, %v3721_v18 }
 0xc3c   : > { %v3682_v17 = vpop.permute.xlu2 %3681 }
 0xc3d   : > { %v3719_v60 = vsel %vm3707_vm9, %v3654_v52, %v3682_v17 }
 0xc3e   : > { %3736 = vst.msk [vmem:[%s6506_s30 + $0x58] sm:$0xff] %vm3724_vm10, %v3719_v60  ;;  %v3672_v42 = vpop.permute.xlu1 %3671 }
 0xc3f   : > { %v3714_v5 = vsel %vm3707_vm9, %v6479_v41, %v3672_v42 }
 0xc40   : > { %3731 = vst.msk [vmem:[%s6506_s30 + $0x30] sm:$0xff] %vm3724_vm10, %v3714_v5 }
 0xc44   : > { %v3688_v31 = vpop.permute.xlu2 %3687 }
 0xc45   : > { %v3722_v44 = vsel %vm3707_vm9, %v3657_v51, %v3688_v31 }
 0xc46   : > { %3739 = vst.msk [vmem:[%s6506_s30 + $0x70] sm:$0xff] %vm3724_vm10, %v3722_v44  ;;  %v3678_v30 = vpop.permute.xlu1 %3677 }
 0xc47   : > { %v3717_v15 = vsel %vm3707_vm9, %v6485_v54, %v3678_v30 }
 0xc48   : > { %3734 = vst.msk [vmem:[%s6506_s30 + $0x48] sm:$0xff] %vm3724_vm10, %v3717_v15 }
 0xc4e   : > { %v3684_v41 = vpop.permute.xlu1 %3683 }
 0xc4f   : > { %v3720_v62 = vsel %vm3707_vm9, %v6491_v0, %v3684_v41 }
 0xc50   : > { %3737 = vst.msk [vmem:[%s6506_s30 + $0x60] sm:$0xff] %vm3724_vm10, %v3720_v62 }
 0xc56   : > { %v3690_v48 = vpop.permute.xlu1 %3689 }
 0xc57   : > { %v3723_v32 = vsel %vm3707_vm9, %v6497_v37, %v3690_v48 }
 0xc58   : > { %3740 = vst.msk [vmem:[%s6506_s30 + $0x78] sm:$0xff] %vm3724_vm10, %v3723_v32 }
 0xc59 PF: > { %s16_s21 = sadd.s32 1, %s4183_s21  }
 0xc5a   : > { %p13_p4 = scmp.ge.s32.totalorder %s16_s21, 4  }
 0xc5c   :  { %15 = sbr.rel (!%p13_p4) target bundleno = 1 (0x1), region = 78 }

</bundles_post_ra>
